<compile_context>
chip_gen: v6e
topology: v6e:2x2x1
jax: 0.10.0
libtpu: 0.0.40
codegen_flags: <defaults>
</compile_context>

<pallas_src>
import jax
import jax.numpy as jnp
from jax import lax
from jax.experimental import pallas as pl
from jax.experimental.pallas import tpu as pltpu


def _round_up(x, m):
    return (x + m - 1) // m * m


# ---------------------------------------------------------------------------
# Fused kernel: conv(im2col matmul) + relu + BiGRU + Linear
# ---------------------------------------------------------------------------
def _fused_seq_tagger_call(x2, wc, bc,
                           wih_f, wih_b, whh_f, whh_b,
                           bih_f, bih_b, bhn_f, bhn_b,
                           wfc_f, wfc_b, bfc,
                           *, Bp, S, Hp, Tp):
    SBp = x2.shape[0]                      # S * Bp, time-major rows (row = t*Bp + b)
    U = 4 if S % 4 == 0 else (2 if S % 2 == 0 else 1)   # manual unroll factor

    def kernel(x_ref, wc_ref, bc_ref,
               wih_f_ref, wih_b_ref, whh_f_ref, whh_b_ref,
               bih_f_ref, bih_b_ref, bhn_f_ref, bhn_b_ref,
               wfc_f_ref, wfc_b_ref, bfc_ref,
               out_ref,
               xg_f_ref, xg_b_ref, hf_ref, hb_ref):
        # ---- Conv1d(k=3, pad=1) + ReLU: one deep (S*Bp, 3E) x (3E, F) MXU pass ----
        c = jnp.dot(x_ref[...], wc_ref[...], preferred_element_type=jnp.float32)
        c = jnp.maximum(c + bc_ref[...], 0.0).astype(jnp.bfloat16)      # (S*Bp, F)

        # ---- Input contributions, both directions (r/z recurrent biases pre-folded) ----
        xg_f_ref[...] = (jnp.dot(c, wih_f_ref[...],
                                 preferred_element_type=jnp.float32) + bih_f_ref[...])
        xg_b_ref[...] = (jnp.dot(c, wih_b_ref[...],
                                 preferred_element_type=jnp.float32) + bih_b_ref[...])

        # PyTorch GRU gate math (r|z|n order); gates live at 128-aligned lane blocks.
        # h' = (1-z)*n + z*h  rewritten as  n + z*(h-n)  (one fewer multiply on the chain)
        def gates(gx, hg, h, bhn):
            r = jax.nn.sigmoid(gx[:, 0:Hp] + hg[:, 0:Hp])
            z = jax.nn.sigmoid(gx[:, Hp:2 * Hp] + hg[:, Hp:2 * Hp])
            n = jnp.tanh(gx[:, 2 * Hp:3 * Hp] + r * (hg[:, 2 * Hp:3 * Hp] + bhn))
            return n + z * (h - n)

        def one_step(t, h_f, h_b, h16_f, h16_b):
            tb = pl.multiple_of(t * Bp, Bp)                 # fwd rows: time t
            sb = pl.multiple_of((S - 1 - t) * Bp, Bp)       # bwd rows: time S-1-t
            gx_f = xg_f_ref[pl.ds(tb, Bp), :]               # (Bp, 3Hp) unmasked tile load
            gx_b = xg_b_ref[pl.ds(sb, Bp), :]
            hg_f = jnp.dot(h16_f, whh_f_ref[...], preferred_element_type=jnp.float32)
            hg_b = jnp.dot(h16_b, whh_b_ref[...], preferred_element_type=jnp.float32)
            h_f = gates(gx_f, hg_f, h_f, bhn_f_ref[...])    # f32 carry
            h_b = gates(gx_b, hg_b, h_b, bhn_b_ref[...])
            h16_f = h_f.astype(jnp.bfloat16)                # single cast: next-step MXU LHS
            h16_b = h_b.astype(jnp.bfloat16)                #   + bf16 history store
            hf_ref[pl.ds(tb, Bp), :] = h16_f
            hb_ref[pl.ds(sb, Bp), :] = h16_b
            return h_f, h_b, h16_f, h16_b

        def body(i, carry):
            h_f, h_b, h16_f, h16_b = carry
            for u in range(U):                              # manual unroll
                h_f, h_b, h16_f, h16_b = one_step(i * U + u, h_f, h_b, h16_f, h16_b)
            return (h_f, h_b, h16_f, h16_b)

        h0 = jnp.zeros((Bp, Hp), jnp.float32)
        h0_16 = jnp.zeros((Bp, Hp), jnp.bfloat16)
        lax.fori_loop(0, S // U, body, (h0, h0, h0_16, h0_16))

        # ---- Dropout(eval)=identity; Linear on concat(h_fwd,h_bwd) == split-matmul sum.
        emis = (jnp.dot(hf_ref[...], wfc_f_ref[...], preferred_element_type=jnp.float32)
                + jnp.dot(hb_ref[...], wfc_b_ref[...], preferred_element_type=jnp.float32)
                + bfc_ref[...])
        out_ref[...] = emis                                 # (S*Bp, Tp) lane-dense store

    operands = (x2, wc, bc, wih_f, wih_b, whh_f, whh_b,
                bih_f, bih_b, bhn_f, bhn_b, wfc_f, wfc_b, bfc)

    # Scoped-VMEM limit sized from the actual slabs (+ headroom), clamped to sane bounds.
    scratch_bytes = 2 * SBp * 3 * Hp * 4 + 2 * SBp * Hp * 2
    io_bytes = sum(int(a.size) * a.dtype.itemsize for a in operands) + SBp * Tp * 4
    vmem_limit = min(max(32 << 20, 2 * (scratch_bytes + io_bytes) + (4 << 20)), 100 << 20)

    # Single invocation -> no grid, no pipelining: every operand is a single whole-array
    # VMEM buffer (no double-buffering overhead).
    vmem_spec = pl.BlockSpec(memory_space=pltpu.MemorySpace.VMEM)
    return pl.pallas_call(
        kernel,
        out_shape=jax.ShapeDtypeStruct((SBp, Tp), jnp.float32),
        in_specs=[vmem_spec] * len(operands),
        out_specs=vmem_spec,
        scratch_shapes=[
            pltpu.VMEM((SBp, 3 * Hp), jnp.float32),   # xg forward  (f32: on-path loads)
            pltpu.VMEM((SBp, 3 * Hp), jnp.float32),   # xg backward
            pltpu.VMEM((SBp, Hp), jnp.bfloat16),      # h_fwd history (bf16)
            pltpu.VMEM((SBp, Hp), jnp.bfloat16),      # h_bwd history (bf16)
        ],
        compiler_params=pltpu.CompilerParams(vmem_limit_bytes=vmem_limit),
    )(*operands)


# ---------------------------------------------------------------------------
# Module wrapper (glue: embedding gather, im2col, batch/lane-alignment padding)
# ---------------------------------------------------------------------------
def init_params(key, vocab_size, tagset_size, embedding_dim, num_filters,
                kernel_size, hidden_dim):
    ks = jax.random.split(key, 12)
    u = lambda k, shape, s=0.1: jax.random.uniform(k, shape, jnp.float32, -s, s)
    E, F, H, T, K = embedding_dim, num_filters, hidden_dim, tagset_size, kernel_size
    return dict(
        embedding=u(ks[0], (vocab_size, E)),
        conv_w=u(ks[1], (K, E, F)),          # PyTorch conv1d weight (F,E,K) transposed
        conv_b=u(ks[2], (1, F)),
        wih_f=u(ks[3], (F, 3 * H)), whh_f=u(ks[4], (H, 3 * H)),
        bih_f=u(ks[5], (1, 3 * H)), bhh_f=u(ks[6], (1, 3 * H)),
        wih_b=u(ks[7], (F, 3 * H)), whh_b=u(ks[8], (H, 3 * H)),
        bih_b=u(ks[9], (1, 3 * H)), bhh_b=u(ks[10], (1, 3 * H)),
        fc_w=u(ks[11], (2 * H, T)),
        fc_b=jnp.zeros((1, T), jnp.float32),
    )


@jax.jit
def seq_tagger_forward(sentences, params):
    # --- embedding gather + batch padding + conv padding + im2col (glue, plain JAX) ---
    emb = jnp.take(params["embedding"], sentences, axis=0)          # (B, S, E)
    B, S, E = emb.shape
    Bp = _round_up(max(B, 8), 8)        # pad batch to sublane granularity (unmasked tiles)
    emb = jnp.pad(emb, ((0, Bp - B), (0, 0), (0, 0)))               # (Bp, S, E)
    xp = jnp.pad(emb, ((0, 0), (1, 1), (0, 0)))                     # (Bp, S+2, E)
    xcat = jnp.concatenate([xp[:, 0:S], xp[:, 1:S + 1], xp[:, 2:S + 2]],
                           axis=-1)                                 # (Bp, S, 3E)
    # time-major rows: row = t*Bp + b  -> contiguous per-step slices in the scan
    x2 = xcat.transpose(1, 0, 2).reshape(S * Bp, 3 * E).astype(jnp.bfloat16)

    F = params["conv_w"].shape[2]
    K = params["conv_w"].shape[0]
    H = params["whh_f"].shape[0]
    T = params["fc_b"].shape[1]
    Hp = _round_up(H, 128)          # pad hidden so each gate starts on a 128-lane boundary
    Tp = _round_up(T, 128)          # pad tagset so the output store is lane-dense

    wc = params["conv_w"].reshape(K * E, F).astype(jnp.bfloat16)    # (3E, F)
    bc = params["conv_b"]                                           # (1, F) f32

    def pad_gates(w, rows_pad=None):
        # (rows, 3H) -> (rows_pad, 3Hp) with gate g placed at columns [g*Hp, g*Hp+H).
        # Padding entries MUST be exactly zero so padded h lanes stay identically zero.
        rows = w.shape[0]
        rp = rows if rows_pad is None else rows_pad
        out = jnp.zeros((rp, 3 * Hp), jnp.float32)
        for g in range(3):
            out = out.at[:rows, g * Hp:g * Hp + H].set(w[:, g * H:(g + 1) * H])
        return out

    wih_f = pad_gates(params["wih_f"]).astype(jnp.bfloat16)         # (F, 3Hp)
    wih_b = pad_gates(params["wih_b"]).astype(jnp.bfloat16)
    whh_f = pad_gates(params["whh_f"], rows_pad=Hp).astype(jnp.bfloat16)   # (Hp, 3Hp)
    whh_b = pad_gates(params["whh_b"], rows_pad=Hp).astype(jnp.bfloat16)

    # Fold r/z-gate recurrent biases into the input bias (applied once in the xg
    # precompute); keep only the n-gate recurrent bias for inside the scan.
    bih_f_full = pad_gates(params["bih_f"])                         # (1, 3Hp) f32
    bih_b_full = pad_gates(params["bih_b"])
    bhh_f_full = pad_gates(params["bhh_f"])
    bhh_b_full = pad_gates(params["bhh_b"])
    bih_f = bih_f_full.at[:, :2 * Hp].add(bhh_f_full[:, :2 * Hp])
    bih_b = bih_b_full.at[:, :2 * Hp].add(bhh_b_full[:, :2 * Hp])
    bhn_f = bhh_f_full[:, 2 * Hp:3 * Hp]                            # (1, Hp) f32
    bhn_b = bhh_b_full[:, 2 * Hp:3 * Hp]

    wfc_f = jnp.zeros((Hp, Tp), jnp.float32).at[:H, :T].set(
        params["fc_w"][:H]).astype(jnp.bfloat16)
    wfc_b = jnp.zeros((Hp, Tp), jnp.float32).at[:H, :T].set(
        params["fc_w"][H:]).astype(jnp.bfloat16)
    bfc = jnp.zeros((1, Tp), jnp.float32).at[:, :T].set(params["fc_b"])

    out2 = _fused_seq_tagger_call(x2, wc, bc,
                                  wih_f, wih_b, whh_f, whh_b,
                                  bih_f, bih_b, bhn_f, bhn_b,
                                  wfc_f, wfc_b, bfc,
                                  Bp=Bp, S=S, Hp=Hp, Tp=Tp)          # (S*Bp, Tp)
    emissions = out2.reshape(S, Bp, Tp).transpose(1, 0, 2)[:B, :, :T]  # (B, S, T)
    return emissions


if __name__ == "__main__":
    # Small, TPU-friendly hyperparameters consistent with the module's forward.
    # E=F=H=128 -> zero gate-padding waste, lane-dense conv output, full MXU K depth.
    VOCAB, TAGS = 64, 8
    E, F, K, H = 128, 128, 3, 128
    B, S = 2, 16

    key = jax.random.PRNGKey(0)
    pkey, dkey = jax.random.split(key)
    params = init_params(pkey, VOCAB, TAGS, E, F, K, H)
    sentences = jax.random.randint(dkey, (B, S), 0, VOCAB, dtype=jnp.int32)

    emissions = seq_tagger_forward(sentences, params)
    emissions = jax.block_until_ready(emissions)
    assert emissions.shape == (B, S, TAGS)
    assert emissions.dtype == jnp.float32
    assert bool(jnp.all(jnp.isfinite(emissions)))
    print("KERNEL_OK")
</pallas_src>

<mosaic_0001>
module attributes {stable_mosaic.version = 11 : i64} {
  func.func @kernel(%arg0: memref<128x384xbf16, #tpu.memory_space<vmem>>, %arg1: memref<384x128xbf16, #tpu.memory_space<vmem>>, %arg2: memref<1x128xf32, #tpu.memory_space<vmem>>, %arg3: memref<128x384xbf16, #tpu.memory_space<vmem>>, %arg4: memref<128x384xbf16, #tpu.memory_space<vmem>>, %arg5: memref<128x384xbf16, #tpu.memory_space<vmem>>, %arg6: memref<128x384xbf16, #tpu.memory_space<vmem>>, %arg7: memref<1x384xf32, #tpu.memory_space<vmem>>, %arg8: memref<1x384xf32, #tpu.memory_space<vmem>>, %arg9: memref<1x128xf32, #tpu.memory_space<vmem>>, %arg10: memref<1x128xf32, #tpu.memory_space<vmem>>, %arg11: memref<128x128xbf16, #tpu.memory_space<vmem>>, %arg12: memref<128x128xbf16, #tpu.memory_space<vmem>>, %arg13: memref<1x128xf32, #tpu.memory_space<vmem>>, %arg14: memref<128x128xf32, #tpu.memory_space<vmem>>, %arg15: memref<128x384xf32, #tpu.memory_space<vmem>>, %arg16: memref<128x384xf32, #tpu.memory_space<vmem>>, %arg17: memref<128x128xbf16, #tpu.memory_space<vmem>>, %arg18: memref<128x128xbf16, #tpu.memory_space<vmem>>) attributes {dimension_semantics = [], scalar_prefetch = 0 : i64, scratch_operands = 4 : i64, tpu.core_type = #tpu.core_type<tc>} {
    %c0 = arith.constant 0 : index
    %c0_0 = arith.constant 0 : index
    %0 = vector.load %arg0[%c0, %c0_0] : memref<128x384xbf16, #tpu.memory_space<vmem>>, vector<128x384xbf16>
    %c0_1 = arith.constant 0 : index
    %c0_2 = arith.constant 0 : index
    %1 = vector.load %arg1[%c0_1, %c0_2] : memref<384x128xbf16, #tpu.memory_space<vmem>>, vector<384x128xbf16>
    %cst = arith.constant dense<0.000000e+00> : vector<128x128xf32>
    %2 = tpu.matmul %0, %1, %cst {dimension_numbers = #tpu.dot_dimension_numbers<[1], [0], [0], [1], [0, 0, 1, 1], [], []>} : vector<128x384xbf16>, vector<384x128xbf16>, vector<128x128xf32> -> vector<128x128xf32>
    %c0_3 = arith.constant 0 : index
    %c0_4 = arith.constant 0 : index
    %3 = vector.load %arg2[%c0_3, %c0_4] : memref<1x128xf32, #tpu.memory_space<vmem>>, vector<1x128xf32>
    %4 = vector.broadcast %3 : vector<1x128xf32> to vector<128x128xf32>
    %5 = arith.addf %2, %4 : vector<128x128xf32>
    %cst_5 = arith.constant 0.000000e+00 : f32
    %6 = vector.broadcast %cst_5 : f32 to vector<128x128xf32>
    %7 = arith.maximumf %5, %6 : vector<128x128xf32>
    %8 = arith.truncf %7 : vector<128x128xf32> to vector<128x128xbf16>
    %c0_6 = arith.constant 0 : index
    %c0_7 = arith.constant 0 : index
    %9 = vector.load %arg3[%c0_6, %c0_7] : memref<128x384xbf16, #tpu.memory_space<vmem>>, vector<128x384xbf16>
    %cst_8 = arith.constant dense<0.000000e+00> : vector<128x384xf32>
    %10 = tpu.matmul %8, %9, %cst_8 {dimension_numbers = #tpu.dot_dimension_numbers<[1], [0], [0], [1], [0, 0, 1, 1], [], []>} : vector<128x128xbf16>, vector<128x384xbf16>, vector<128x384xf32> -> vector<128x384xf32>
    %c0_9 = arith.constant 0 : index
    %c0_10 = arith.constant 0 : index
    %11 = vector.load %arg7[%c0_9, %c0_10] : memref<1x384xf32, #tpu.memory_space<vmem>>, vector<1x384xf32>
    %12 = vector.broadcast %11 : vector<1x384xf32> to vector<128x384xf32>
    %13 = arith.addf %10, %12 : vector<128x384xf32>
    %c0_11 = arith.constant 0 : index
    %c0_12 = arith.constant 0 : index
    %14 = vector.load %arg15[%c0_11, %c0_12] : memref<128x384xf32, #tpu.memory_space<vmem>>, vector<128x384xf32>
    tpu.vector_store %arg15[%c0_11, %c0_12], %13 {strides = array<i32>} : memref<128x384xf32, #tpu.memory_space<vmem>>, vector<128x384xf32>,
    %c0_13 = arith.constant 0 : index
    %c0_14 = arith.constant 0 : index
    %15 = vector.load %arg4[%c0_13, %c0_14] : memref<128x384xbf16, #tpu.memory_space<vmem>>, vector<128x384xbf16>
    %cst_15 = arith.constant dense<0.000000e+00> : vector<128x384xf32>
    %16 = tpu.matmul %8, %15, %cst_15 {dimension_numbers = #tpu.dot_dimension_numbers<[1], [0], [0], [1], [0, 0, 1, 1], [], []>} : vector<128x128xbf16>, vector<128x384xbf16>, vector<128x384xf32> -> vector<128x384xf32>
    %c0_16 = arith.constant 0 : index
    %c0_17 = arith.constant 0 : index
    %17 = vector.load %arg8[%c0_16, %c0_17] : memref<1x384xf32, #tpu.memory_space<vmem>>, vector<1x384xf32>
    %18 = vector.broadcast %17 : vector<1x384xf32> to vector<128x384xf32>
    %19 = arith.addf %16, %18 : vector<128x384xf32>
    %c0_18 = arith.constant 0 : index
    %c0_19 = arith.constant 0 : index
    %20 = vector.load %arg16[%c0_18, %c0_19] : memref<128x384xf32, #tpu.memory_space<vmem>>, vector<128x384xf32>
    tpu.vector_store %arg16[%c0_18, %c0_19], %19 {strides = array<i32>} : memref<128x384xf32, #tpu.memory_space<vmem>>, vector<128x384xf32>,
    %cst_20 = arith.constant 0.000000e+00 : f32
    %21 = vector.broadcast %cst_20 : f32 to vector<8x128xf32>
    %cst_21 = arith.constant 0.000000e+00 : bf16
    %22 = vector.broadcast %cst_21 : bf16 to vector<8x128xbf16>
    %c0_i32 = arith.constant 0 : i32
    %c4_i32 = arith.constant 4 : i32
    %23 = arith.addi %c0_i32, %c4_i32 : i32
    %c1_i32 = arith.constant 1 : i32
    %24:4 = scf.for %arg19 = %c0_i32 to %23 step %c1_i32 iter_args(%arg20 = %21, %arg21 = %21, %arg22 = %22, %arg23 = %22) -> (vector<8x128xf32>, vector<8x128xf32>, vector<8x128xbf16>, vector<8x128xbf16>)  : i32 {
      %c4_i32_37 = arith.constant 4 : i32
      %36 = arith.muli %arg19, %c4_i32_37 : i32
      %c0_i32_38 = arith.constant 0 : i32
      %37 = arith.addi %36, %c0_i32_38 : i32
      %c8_i32 = arith.constant 8 : i32
      %38 = arith.muli %37, %c8_i32 : i32
      %39 = tpu.assume_multiple %38, 8 : i32
      %c15_i32 = arith.constant 15 : i32
      %40 = arith.subi %c15_i32, %37 : i32
      %c8_i32_39 = arith.constant 8 : i32
      %41 = arith.muli %40, %c8_i32_39 : i32
      %42 = tpu.assume_multiple %41, 8 : i32
      %43 = arith.index_cast %39 : i32 to index
      %c0_40 = arith.constant 0 : index
      %44 = vector.load %arg15[%43, %c0_40] : memref<128x384xf32, #tpu.memory_space<vmem>>, vector<8x384xf32>
      %45 = arith.index_cast %42 : i32 to index
      %c0_41 = arith.constant 0 : index
      %46 = vector.load %arg16[%45, %c0_41] : memref<128x384xf32, #tpu.memory_space<vmem>>, vector<8x384xf32>
      %c0_42 = arith.constant 0 : index
      %c0_43 = arith.constant 0 : index
      %47 = vector.load %arg5[%c0_42, %c0_43] : memref<128x384xbf16, #tpu.memory_space<vmem>>, vector<128x384xbf16>
      %cst_44 = arith.constant dense<0.000000e+00> : vector<8x384xf32>
      %48 = tpu.matmul %arg22, %47, %cst_44 {dimension_numbers = #tpu.dot_dimension_numbers<[1], [0], [0], [1], [0, 0, 1, 1], [], []>} : vector<8x128xbf16>, vector<128x384xbf16>, vector<8x384xf32> -> vector<8x384xf32>
      %c0_45 = arith.constant 0 : index
      %c0_46 = arith.constant 0 : index
      %49 = vector.load %arg6[%c0_45, %c0_46] : memref<128x384xbf16, #tpu.memory_space<vmem>>, vector<128x384xbf16>
      %cst_47 = arith.constant dense<0.000000e+00> : vector<8x384xf32>
      %50 = tpu.matmul %arg23, %49, %cst_47 {dimension_numbers = #tpu.dot_dimension_numbers<[1], [0], [0], [1], [0, 0, 1, 1], [], []>} : vector<8x128xbf16>, vector<128x384xbf16>, vector<8x384xf32> -> vector<8x384xf32>
      %c0_48 = arith.constant 0 : index
      %c0_49 = arith.constant 0 : index
      %51 = vector.load %arg9[%c0_48, %c0_49] : memref<1x128xf32, #tpu.memory_space<vmem>>, vector<1x128xf32>
      %52 = vector.extract_strided_slice %44 {offsets = [0, 0], sizes = [8, 128], strides = [1, 1]} : vector<8x384xf32> to vector<8x128xf32>
      %53 = vector.extract_strided_slice %48 {offsets = [0, 0], sizes = [8, 128], strides = [1, 1]} : vector<8x384xf32> to vector<8x128xf32>
      %54 = arith.addf %52, %53 : vector<8x128xf32>
      %55 = arith.negf %54 : vector<8x128xf32>
      %56 = math.exp %55 : vector<8x128xf32>
      %cst_50 = arith.constant 1.000000e+00 : f32
      %57 = vector.broadcast %cst_50 : f32 to vector<8x128xf32>
      %58 = arith.addf %57, %56 : vector<8x128xf32>
      %59 = arith.divf %57, %58 : vector<8x128xf32>
      %60 = vector.extract_strided_slice %44 {offsets = [0, 128], sizes = [8, 128], strides = [1, 1]} : vector<8x384xf32> to vector<8x128xf32>
      %61 = vector.extract_strided_slice %48 {offsets = [0, 128], sizes = [8, 128], strides = [1, 1]} : vector<8x384xf32> to vector<8x128xf32>
      %62 = arith.addf %60, %61 : vector<8x128xf32>
      %63 = arith.negf %62 : vector<8x128xf32>
      %64 = math.exp %63 : vector<8x128xf32>
      %cst_51 = arith.constant 1.000000e+00 : f32
      %65 = vector.broadcast %cst_51 : f32 to vector<8x128xf32>
      %66 = arith.addf %65, %64 : vector<8x128xf32>
      %67 = arith.divf %65, %66 : vector<8x128xf32>
      %68 = vector.extract_strided_slice %44 {offsets = [0, 256], sizes = [8, 128], strides = [1, 1]} : vector<8x384xf32> to vector<8x128xf32>
      %69 = vector.extract_strided_slice %48 {offsets = [0, 256], sizes = [8, 128], strides = [1, 1]} : vector<8x384xf32> to vector<8x128xf32>
      %70 = vector.broadcast %51 : vector<1x128xf32> to vector<8x128xf32>
      %71 = arith.addf %69, %70 : vector<8x128xf32>
      %72 = arith.mulf %59, %71 : vector<8x128xf32>
      %73 = arith.addf %68, %72 : vector<8x128xf32>
      %74 = math.tanh %73 : vector<8x128xf32>
      %75 = arith.subf %arg20, %74 : vector<8x128xf32>
      %76 = arith.mulf %67, %75 : vector<8x128xf32>
      %77 = arith.addf %74, %76 : vector<8x128xf32>
      %c0_52 = arith.constant 0 : index
      %c0_53 = arith.constant 0 : index
      %78 = vector.load %arg10[%c0_52, %c0_53] : memref<1x128xf32, #tpu.memory_space<vmem>>, vector<1x128xf32>
      %79 = vector.extract_strided_slice %46 {offsets = [0, 0], sizes = [8, 128], strides = [1, 1]} : vector<8x384xf32> to vector<8x128xf32>
      %80 = vector.extract_strided_slice %50 {offsets = [0, 0], sizes = [8, 128], strides = [1, 1]} : vector<8x384xf32> to vector<8x128xf32>
      %81 = arith.addf %79, %80 : vector<8x128xf32>
      %82 = arith.negf %81 : vector<8x128xf32>
      %83 = math.exp %82 : vector<8x128xf32>
      %cst_54 = arith.constant 1.000000e+00 : f32
      %84 = vector.broadcast %cst_54 : f32 to vector<8x128xf32>
      %85 = arith.addf %84, %83 : vector<8x128xf32>
      %86 = arith.divf %84, %85 : vector<8x128xf32>
      %87 = vector.extract_strided_slice %46 {offsets = [0, 128], sizes = [8, 128], strides = [1, 1]} : vector<8x384xf32> to vector<8x128xf32>
      %88 = vector.extract_strided_slice %50 {offsets = [0, 128], sizes = [8, 128], strides = [1, 1]} : vector<8x384xf32> to vector<8x128xf32>
      %89 = arith.addf %87, %88 : vector<8x128xf32>
      %90 = arith.negf %89 : vector<8x128xf32>
      %91 = math.exp %90 : vector<8x128xf32>
      %cst_55 = arith.constant 1.000000e+00 : f32
      %92 = vector.broadcast %cst_55 : f32 to vector<8x128xf32>
      %93 = arith.addf %92, %91 : vector<8x128xf32>
      %94 = arith.divf %92, %93 : vector<8x128xf32>
      %95 = vector.extract_strided_slice %46 {offsets = [0, 256], sizes = [8, 128], strides = [1, 1]} : vector<8x384xf32> to vector<8x128xf32>
      %96 = vector.extract_strided_slice %50 {offsets = [0, 256], sizes = [8, 128], strides = [1, 1]} : vector<8x384xf32> to vector<8x128xf32>
      %97 = vector.broadcast %78 : vector<1x128xf32> to vector<8x128xf32>
      %98 = arith.addf %96, %97 : vector<8x128xf32>
      %99 = arith.mulf %86, %98 : vector<8x128xf32>
      %100 = arith.addf %95, %99 : vector<8x128xf32>
      %101 = math.tanh %100 : vector<8x128xf32>
      %102 = arith.subf %arg21, %101 : vector<8x128xf32>
      %103 = arith.mulf %94, %102 : vector<8x128xf32>
      %104 = arith.addf %101, %103 : vector<8x128xf32>
      %105 = arith.truncf %77 : vector<8x128xf32> to vector<8x128xbf16>
      %106 = arith.truncf %104 : vector<8x128xf32> to vector<8x128xbf16>
      %107 = arith.index_cast %39 : i32 to index
      %c0_56 = arith.constant 0 : index
      %108 = vector.load %arg17[%107, %c0_56] : memref<128x128xbf16, #tpu.memory_space<vmem>>, vector<8x128xbf16>
      tpu.vector_store %arg17[%107, %c0_56], %105 {strides = array<i32>} : memref<128x128xbf16, #tpu.memory_space<vmem>>, vector<8x128xbf16>,
      %109 = arith.index_cast %42 : i32 to index
      %c0_57 = arith.constant 0 : index
      %110 = vector.load %arg18[%109, %c0_57] : memref<128x128xbf16, #tpu.memory_space<vmem>>, vector<8x128xbf16>
      tpu.vector_store %arg18[%109, %c0_57], %106 {strides = array<i32>} : memref<128x128xbf16, #tpu.memory_space<vmem>>, vector<8x128xbf16>,
      %c4_i32_58 = arith.constant 4 : i32
      %111 = arith.muli %arg19, %c4_i32_58 : i32
      %c1_i32_59 = arith.constant 1 : i32
      %112 = arith.addi %111, %c1_i32_59 : i32
      %c8_i32_60 = arith.constant 8 : i32
      %113 = arith.muli %112, %c8_i32_60 : i32
      %114 = tpu.assume_multiple %113, 8 : i32
      %c15_i32_61 = arith.constant 15 : i32
      %115 = arith.subi %c15_i32_61, %112 : i32
      %c8_i32_62 = arith.constant 8 : i32
      %116 = arith.muli %115, %c8_i32_62 : i32
      %117 = tpu.assume_multiple %116, 8 : i32
      %118 = arith.index_cast %114 : i32 to index
      %c0_63 = arith.constant 0 : index
      %119 = vector.load %arg15[%118, %c0_63] : memref<128x384xf32, #tpu.memory_space<vmem>>, vector<8x384xf32>
      %120 = arith.index_cast %117 : i32 to index
      %c0_64 = arith.constant 0 : index
      %121 = vector.load %arg16[%120, %c0_64] : memref<128x384xf32, #tpu.memory_space<vmem>>, vector<8x384xf32>
      %c0_65 = arith.constant 0 : index
      %c0_66 = arith.constant 0 : index
      %122 = vector.load %arg5[%c0_65, %c0_66] : memref<128x384xbf16, #tpu.memory_space<vmem>>, vector<128x384xbf16>
      %cst_67 = arith.constant dense<0.000000e+00> : vector<8x384xf32>
      %123 = tpu.matmul %105, %122, %cst_67 {dimension_numbers = #tpu.dot_dimension_numbers<[1], [0], [0], [1], [0, 0, 1, 1], [], []>} : vector<8x128xbf16>, vector<128x384xbf16>, vector<8x384xf32> -> vector<8x384xf32>
      %c0_68 = arith.constant 0 : index
      %c0_69 = arith.constant 0 : index
      %124 = vector.load %arg6[%c0_68, %c0_69] : memref<128x384xbf16, #tpu.memory_space<vmem>>, vector<128x384xbf16>
      %cst_70 = arith.constant dense<0.000000e+00> : vector<8x384xf32>
      %125 = tpu.matmul %106, %124, %cst_70 {dimension_numbers = #tpu.dot_dimension_numbers<[1], [0], [0], [1], [0, 0, 1, 1], [], []>} : vector<8x128xbf16>, vector<128x384xbf16>, vector<8x384xf32> -> vector<8x384xf32>
      %c0_71 = arith.constant 0 : index
      %c0_72 = arith.constant 0 : index
      %126 = vector.load %arg9[%c0_71, %c0_72] : memref<1x128xf32, #tpu.memory_space<vmem>>, vector<1x128xf32>
      %127 = vector.extract_strided_slice %119 {offsets = [0, 0], sizes = [8, 128], strides = [1, 1]} : vector<8x384xf32> to vector<8x128xf32>
      %128 = vector.extract_strided_slice %123 {offsets = [0, 0], sizes = [8, 128], strides = [1, 1]} : vector<8x384xf32> to vector<8x128xf32>
      %129 = arith.addf %127, %128 : vector<8x128xf32>
      %130 = arith.negf %129 : vector<8x128xf32>
      %131 = math.exp %130 : vector<8x128xf32>
      %cst_73 = arith.constant 1.000000e+00 : f32
      %132 = vector.broadcast %cst_73 : f32 to vector<8x128xf32>
      %133 = arith.addf %132, %131 : vector<8x128xf32>
      %134 = arith.divf %132, %133 : vector<8x128xf32>
      %135 = vector.extract_strided_slice %119 {offsets = [0, 128], sizes = [8, 128], strides = [1, 1]} : vector<8x384xf32> to vector<8x128xf32>
      %136 = vector.extract_strided_slice %123 {offsets = [0, 128], sizes = [8, 128], strides = [1, 1]} : vector<8x384xf32> to vector<8x128xf32>
      %137 = arith.addf %135, %136 : vector<8x128xf32>
      %138 = arith.negf %137 : vector<8x128xf32>
      %139 = math.exp %138 : vector<8x128xf32>
      %cst_74 = arith.constant 1.000000e+00 : f32
      %140 = vector.broadcast %cst_74 : f32 to vector<8x128xf32>
      %141 = arith.addf %140, %139 : vector<8x128xf32>
      %142 = arith.divf %140, %141 : vector<8x128xf32>
      %143 = vector.extract_strided_slice %119 {offsets = [0, 256], sizes = [8, 128], strides = [1, 1]} : vector<8x384xf32> to vector<8x128xf32>
      %144 = vector.extract_strided_slice %123 {offsets = [0, 256], sizes = [8, 128], strides = [1, 1]} : vector<8x384xf32> to vector<8x128xf32>
      %145 = vector.broadcast %126 : vector<1x128xf32> to vector<8x128xf32>
      %146 = arith.addf %144, %145 : vector<8x128xf32>
      %147 = arith.mulf %134, %146 : vector<8x128xf32>
      %148 = arith.addf %143, %147 : vector<8x128xf32>
      %149 = math.tanh %148 : vector<8x128xf32>
      %150 = arith.subf %77, %149 : vector<8x128xf32>
      %151 = arith.mulf %142, %150 : vector<8x128xf32>
      %152 = arith.addf %149, %151 : vector<8x128xf32>
      %c0_75 = arith.constant 0 : index
      %c0_76 = arith.constant 0 : index
      %153 = vector.load %arg10[%c0_75, %c0_76] : memref<1x128xf32, #tpu.memory_space<vmem>>, vector<1x128xf32>
      %154 = vector.extract_strided_slice %121 {offsets = [0, 0], sizes = [8, 128], strides = [1, 1]} : vector<8x384xf32> to vector<8x128xf32>
      %155 = vector.extract_strided_slice %125 {offsets = [0, 0], sizes = [8, 128], strides = [1, 1]} : vector<8x384xf32> to vector<8x128xf32>
      %156 = arith.addf %154, %155 : vector<8x128xf32>
      %157 = arith.negf %156 : vector<8x128xf32>
      %158 = math.exp %157 : vector<8x128xf32>
      %cst_77 = arith.constant 1.000000e+00 : f32
      %159 = vector.broadcast %cst_77 : f32 to vector<8x128xf32>
      %160 = arith.addf %159, %158 : vector<8x128xf32>
      %161 = arith.divf %159, %160 : vector<8x128xf32>
      %162 = vector.extract_strided_slice %121 {offsets = [0, 128], sizes = [8, 128], strides = [1, 1]} : vector<8x384xf32> to vector<8x128xf32>
      %163 = vector.extract_strided_slice %125 {offsets = [0, 128], sizes = [8, 128], strides = [1, 1]} : vector<8x384xf32> to vector<8x128xf32>
      %164 = arith.addf %162, %163 : vector<8x128xf32>
      %165 = arith.negf %164 : vector<8x128xf32>
      %166 = math.exp %165 : vector<8x128xf32>
      %cst_78 = arith.constant 1.000000e+00 : f32
      %167 = vector.broadcast %cst_78 : f32 to vector<8x128xf32>
      %168 = arith.addf %167, %166 : vector<8x128xf32>
      %169 = arith.divf %167, %168 : vector<8x128xf32>
      %170 = vector.extract_strided_slice %121 {offsets = [0, 256], sizes = [8, 128], strides = [1, 1]} : vector<8x384xf32> to vector<8x128xf32>
      %171 = vector.extract_strided_slice %125 {offsets = [0, 256], sizes = [8, 128], strides = [1, 1]} : vector<8x384xf32> to vector<8x128xf32>
      %172 = vector.broadcast %153 : vector<1x128xf32> to vector<8x128xf32>
      %173 = arith.addf %171, %172 : vector<8x128xf32>
      %174 = arith.mulf %161, %173 : vector<8x128xf32>
      %175 = arith.addf %170, %174 : vector<8x128xf32>
      %176 = math.tanh %175 : vector<8x128xf32>
      %177 = arith.subf %104, %176 : vector<8x128xf32>
      %178 = arith.mulf %169, %177 : vector<8x128xf32>
      %179 = arith.addf %176, %178 : vector<8x128xf32>
      %180 = arith.truncf %152 : vector<8x128xf32> to vector<8x128xbf16>
      %181 = arith.truncf %179 : vector<8x128xf32> to vector<8x128xbf16>
      %182 = arith.index_cast %114 : i32 to index
      %c0_79 = arith.constant 0 : index
      %183 = vector.load %arg17[%182, %c0_79] : memref<128x128xbf16, #tpu.memory_space<vmem>>, vector<8x128xbf16>
      tpu.vector_store %arg17[%182, %c0_79], %180 {strides = array<i32>} : memref<128x128xbf16, #tpu.memory_space<vmem>>, vector<8x128xbf16>,
      %184 = arith.index_cast %117 : i32 to index
      %c0_80 = arith.constant 0 : index
      %185 = vector.load %arg18[%184, %c0_80] : memref<128x128xbf16, #tpu.memory_space<vmem>>, vector<8x128xbf16>
      tpu.vector_store %arg18[%184, %c0_80], %181 {strides = array<i32>} : memref<128x128xbf16, #tpu.memory_space<vmem>>, vector<8x128xbf16>,
      %c4_i32_81 = arith.constant 4 : i32
      %186 = arith.muli %arg19, %c4_i32_81 : i32
      %c2_i32 = arith.constant 2 : i32
      %187 = arith.addi %186, %c2_i32 : i32
      %c8_i32_82 = arith.constant 8 : i32
      %188 = arith.muli %187, %c8_i32_82 : i32
      %189 = tpu.assume_multiple %188, 8 : i32
      %c15_i32_83 = arith.constant 15 : i32
      %190 = arith.subi %c15_i32_83, %187 : i32
      %c8_i32_84 = arith.constant 8 : i32
      %191 = arith.muli %190, %c8_i32_84 : i32
      %192 = tpu.assume_multiple %191, 8 : i32
      %193 = arith.index_cast %189 : i32 to index
      %c0_85 = arith.constant 0 : index
      %194 = vector.load %arg15[%193, %c0_85] : memref<128x384xf32, #tpu.memory_space<vmem>>, vector<8x384xf32>
      %195 = arith.index_cast %192 : i32 to index
      %c0_86 = arith.constant 0 : index
      %196 = vector.load %arg16[%195, %c0_86] : memref<128x384xf32, #tpu.memory_space<vmem>>, vector<8x384xf32>
      %c0_87 = arith.constant 0 : index
      %c0_88 = arith.constant 0 : index
      %197 = vector.load %arg5[%c0_87, %c0_88] : memref<128x384xbf16, #tpu.memory_space<vmem>>, vector<128x384xbf16>
      %cst_89 = arith.constant dense<0.000000e+00> : vector<8x384xf32>
      %198 = tpu.matmul %180, %197, %cst_89 {dimension_numbers = #tpu.dot_dimension_numbers<[1], [0], [0], [1], [0, 0, 1, 1], [], []>} : vector<8x128xbf16>, vector<128x384xbf16>, vector<8x384xf32> -> vector<8x384xf32>
      %c0_90 = arith.constant 0 : index
      %c0_91 = arith.constant 0 : index
      %199 = vector.load %arg6[%c0_90, %c0_91] : memref<128x384xbf16, #tpu.memory_space<vmem>>, vector<128x384xbf16>
      %cst_92 = arith.constant dense<0.000000e+00> : vector<8x384xf32>
      %200 = tpu.matmul %181, %199, %cst_92 {dimension_numbers = #tpu.dot_dimension_numbers<[1], [0], [0], [1], [0, 0, 1, 1], [], []>} : vector<8x128xbf16>, vector<128x384xbf16>, vector<8x384xf32> -> vector<8x384xf32>
      %c0_93 = arith.constant 0 : index
      %c0_94 = arith.constant 0 : index
      %201 = vector.load %arg9[%c0_93, %c0_94] : memref<1x128xf32, #tpu.memory_space<vmem>>, vector<1x128xf32>
      %202 = vector.extract_strided_slice %194 {offsets = [0, 0], sizes = [8, 128], strides = [1, 1]} : vector<8x384xf32> to vector<8x128xf32>
      %203 = vector.extract_strided_slice %198 {offsets = [0, 0], sizes = [8, 128], strides = [1, 1]} : vector<8x384xf32> to vector<8x128xf32>
      %204 = arith.addf %202, %203 : vector<8x128xf32>
      %205 = arith.negf %204 : vector<8x128xf32>
      %206 = math.exp %205 : vector<8x128xf32>
      %cst_95 = arith.constant 1.000000e+00 : f32
      %207 = vector.broadcast %cst_95 : f32 to vector<8x128xf32>
      %208 = arith.addf %207, %206 : vector<8x128xf32>
      %209 = arith.divf %207, %208 : vector<8x128xf32>
      %210 = vector.extract_strided_slice %194 {offsets = [0, 128], sizes = [8, 128], strides = [1, 1]} : vector<8x384xf32> to vector<8x128xf32>
      %211 = vector.extract_strided_slice %198 {offsets = [0, 128], sizes = [8, 128], strides = [1, 1]} : vector<8x384xf32> to vector<8x128xf32>
      %212 = arith.addf %210, %211 : vector<8x128xf32>
      %213 = arith.negf %212 : vector<8x128xf32>
      %214 = math.exp %213 : vector<8x128xf32>
      %cst_96 = arith.constant 1.000000e+00 : f32
      %215 = vector.broadcast %cst_96 : f32 to vector<8x128xf32>
      %216 = arith.addf %215, %214 : vector<8x128xf32>
      %217 = arith.divf %215, %216 : vector<8x128xf32>
      %218 = vector.extract_strided_slice %194 {offsets = [0, 256], sizes = [8, 128], strides = [1, 1]} : vector<8x384xf32> to vector<8x128xf32>
      %219 = vector.extract_strided_slice %198 {offsets = [0, 256], sizes = [8, 128], strides = [1, 1]} : vector<8x384xf32> to vector<8x128xf32>
      %220 = vector.broadcast %201 : vector<1x128xf32> to vector<8x128xf32>
      %221 = arith.addf %219, %220 : vector<8x128xf32>
      %222 = arith.mulf %209, %221 : vector<8x128xf32>
      %223 = arith.addf %218, %222 : vector<8x128xf32>
      %224 = math.tanh %223 : vector<8x128xf32>
      %225 = arith.subf %152, %224 : vector<8x128xf32>
      %226 = arith.mulf %217, %225 : vector<8x128xf32>
      %227 = arith.addf %224, %226 : vector<8x128xf32>
      %c0_97 = arith.constant 0 : index
      %c0_98 = arith.constant 0 : index
      %228 = vector.load %arg10[%c0_97, %c0_98] : memref<1x128xf32, #tpu.memory_space<vmem>>, vector<1x128xf32>
      %229 = vector.extract_strided_slice %196 {offsets = [0, 0], sizes = [8, 128], strides = [1, 1]} : vector<8x384xf32> to vector<8x128xf32>
      %230 = vector.extract_strided_slice %200 {offsets = [0, 0], sizes = [8, 128], strides = [1, 1]} : vector<8x384xf32> to vector<8x128xf32>
      %231 = arith.addf %229, %230 : vector<8x128xf32>
      %232 = arith.negf %231 : vector<8x128xf32>
      %233 = math.exp %232 : vector<8x128xf32>
      %cst_99 = arith.constant 1.000000e+00 : f32
      %234 = vector.broadcast %cst_99 : f32 to vector<8x128xf32>
      %235 = arith.addf %234, %233 : vector<8x128xf32>
      %236 = arith.divf %234, %235 : vector<8x128xf32>
      %237 = vector.extract_strided_slice %196 {offsets = [0, 128], sizes = [8, 128], strides = [1, 1]} : vector<8x384xf32> to vector<8x128xf32>
      %238 = vector.extract_strided_slice %200 {offsets = [0, 128], sizes = [8, 128], strides = [1, 1]} : vector<8x384xf32> to vector<8x128xf32>
      %239 = arith.addf %237, %238 : vector<8x128xf32>
      %240 = arith.negf %239 : vector<8x128xf32>
      %241 = math.exp %240 : vector<8x128xf32>
      %cst_100 = arith.constant 1.000000e+00 : f32
      %242 = vector.broadcast %cst_100 : f32 to vector<8x128xf32>
      %243 = arith.addf %242, %241 : vector<8x128xf32>
      %244 = arith.divf %242, %243 : vector<8x128xf32>
      %245 = vector.extract_strided_slice %196 {offsets = [0, 256], sizes = [8, 128], strides = [1, 1]} : vector<8x384xf32> to vector<8x128xf32>
      %246 = vector.extract_strided_slice %200 {offsets = [0, 256], sizes = [8, 128], strides = [1, 1]} : vector<8x384xf32> to vector<8x128xf32>
      %247 = vector.broadcast %228 : vector<1x128xf32> to vector<8x128xf32>
      %248 = arith.addf %246, %247 : vector<8x128xf32>
      %249 = arith.mulf %236, %248 : vector<8x128xf32>
      %250 = arith.addf %245, %249 : vector<8x128xf32>
      %251 = math.tanh %250 : vector<8x128xf32>
      %252 = arith.subf %179, %251 : vector<8x128xf32>
      %253 = arith.mulf %244, %252 : vector<8x128xf32>
      %254 = arith.addf %251, %253 : vector<8x128xf32>
      %255 = arith.truncf %227 : vector<8x128xf32> to vector<8x128xbf16>
      %256 = arith.truncf %254 : vector<8x128xf32> to vector<8x128xbf16>
      %257 = arith.index_cast %189 : i32 to index
      %c0_101 = arith.constant 0 : index
      %258 = vector.load %arg17[%257, %c0_101] : memref<128x128xbf16, #tpu.memory_space<vmem>>, vector<8x128xbf16>
      tpu.vector_store %arg17[%257, %c0_101], %255 {strides = array<i32>} : memref<128x128xbf16, #tpu.memory_space<vmem>>, vector<8x128xbf16>,
      %259 = arith.index_cast %192 : i32 to index
      %c0_102 = arith.constant 0 : index
      %260 = vector.load %arg18[%259, %c0_102] : memref<128x128xbf16, #tpu.memory_space<vmem>>, vector<8x128xbf16>
      tpu.vector_store %arg18[%259, %c0_102], %256 {strides = array<i32>} : memref<128x128xbf16, #tpu.memory_space<vmem>>, vector<8x128xbf16>,
      %c4_i32_103 = arith.constant 4 : i32
      %261 = arith.muli %arg19, %c4_i32_103 : i32
      %c3_i32 = arith.constant 3 : i32
      %262 = arith.addi %261, %c3_i32 : i32
      %c8_i32_104 = arith.constant 8 : i32
      %263 = arith.muli %262, %c8_i32_104 : i32
      %264 = tpu.assume_multiple %263, 8 : i32
      %c15_i32_105 = arith.constant 15 : i32
      %265 = arith.subi %c15_i32_105, %262 : i32
      %c8_i32_106 = arith.constant 8 : i32
      %266 = arith.muli %265, %c8_i32_106 : i32
      %267 = tpu.assume_multiple %266, 8 : i32
      %268 = arith.index_cast %264 : i32 to index
      %c0_107 = arith.constant 0 : index
      %269 = vector.load %arg15[%268, %c0_107] : memref<128x384xf32, #tpu.memory_space<vmem>>, vector<8x384xf32>
      %270 = arith.index_cast %267 : i32 to index
      %c0_108 = arith.constant 0 : index
      %271 = vector.load %arg16[%270, %c0_108] : memref<128x384xf32, #tpu.memory_space<vmem>>, vector<8x384xf32>
      %c0_109 = arith.constant 0 : index
      %c0_110 = arith.constant 0 : index
      %272 = vector.load %arg5[%c0_109, %c0_110] : memref<128x384xbf16, #tpu.memory_space<vmem>>, vector<128x384xbf16>
      %cst_111 = arith.constant dense<0.000000e+00> : vector<8x384xf32>
      %273 = tpu.matmul %255, %272, %cst_111 {dimension_numbers = #tpu.dot_dimension_numbers<[1], [0], [0], [1], [0, 0, 1, 1], [], []>} : vector<8x128xbf16>, vector<128x384xbf16>, vector<8x384xf32> -> vector<8x384xf32>
      %c0_112 = arith.constant 0 : index
      %c0_113 = arith.constant 0 : index
      %274 = vector.load %arg6[%c0_112, %c0_113] : memref<128x384xbf16, #tpu.memory_space<vmem>>, vector<128x384xbf16>
      %cst_114 = arith.constant dense<0.000000e+00> : vector<8x384xf32>
      %275 = tpu.matmul %256, %274, %cst_114 {dimension_numbers = #tpu.dot_dimension_numbers<[1], [0], [0], [1], [0, 0, 1, 1], [], []>} : vector<8x128xbf16>, vector<128x384xbf16>, vector<8x384xf32> -> vector<8x384xf32>
      %c0_115 = arith.constant 0 : index
      %c0_116 = arith.constant 0 : index
      %276 = vector.load %arg9[%c0_115, %c0_116] : memref<1x128xf32, #tpu.memory_space<vmem>>, vector<1x128xf32>
      %277 = vector.extract_strided_slice %269 {offsets = [0, 0], sizes = [8, 128], strides = [1, 1]} : vector<8x384xf32> to vector<8x128xf32>
      %278 = vector.extract_strided_slice %273 {offsets = [0, 0], sizes = [8, 128], strides = [1, 1]} : vector<8x384xf32> to vector<8x128xf32>
      %279 = arith.addf %277, %278 : vector<8x128xf32>
      %280 = arith.negf %279 : vector<8x128xf32>
      %281 = math.exp %280 : vector<8x128xf32>
      %cst_117 = arith.constant 1.000000e+00 : f32
      %282 = vector.broadcast %cst_117 : f32 to vector<8x128xf32>
      %283 = arith.addf %282, %281 : vector<8x128xf32>
      %284 = arith.divf %282, %283 : vector<8x128xf32>
      %285 = vector.extract_strided_slice %269 {offsets = [0, 128], sizes = [8, 128], strides = [1, 1]} : vector<8x384xf32> to vector<8x128xf32>
      %286 = vector.extract_strided_slice %273 {offsets = [0, 128], sizes = [8, 128], strides = [1, 1]} : vector<8x384xf32> to vector<8x128xf32>
      %287 = arith.addf %285, %286 : vector<8x128xf32>
      %288 = arith.negf %287 : vector<8x128xf32>
      %289 = math.exp %288 : vector<8x128xf32>
      %cst_118 = arith.constant 1.000000e+00 : f32
      %290 = vector.broadcast %cst_118 : f32 to vector<8x128xf32>
      %291 = arith.addf %290, %289 : vector<8x128xf32>
      %292 = arith.divf %290, %291 : vector<8x128xf32>
      %293 = vector.extract_strided_slice %269 {offsets = [0, 256], sizes = [8, 128], strides = [1, 1]} : vector<8x384xf32> to vector<8x128xf32>
      %294 = vector.extract_strided_slice %273 {offsets = [0, 256], sizes = [8, 128], strides = [1, 1]} : vector<8x384xf32> to vector<8x128xf32>
      %295 = vector.broadcast %276 : vector<1x128xf32> to vector<8x128xf32>
      %296 = arith.addf %294, %295 : vector<8x128xf32>
      %297 = arith.mulf %284, %296 : vector<8x128xf32>
      %298 = arith.addf %293, %297 : vector<8x128xf32>
      %299 = math.tanh %298 : vector<8x128xf32>
      %300 = arith.subf %227, %299 : vector<8x128xf32>
      %301 = arith.mulf %292, %300 : vector<8x128xf32>
      %302 = arith.addf %299, %301 : vector<8x128xf32>
      %c0_119 = arith.constant 0 : index
      %c0_120 = arith.constant 0 : index
      %303 = vector.load %arg10[%c0_119, %c0_120] : memref<1x128xf32, #tpu.memory_space<vmem>>, vector<1x128xf32>
      %304 = vector.extract_strided_slice %271 {offsets = [0, 0], sizes = [8, 128], strides = [1, 1]} : vector<8x384xf32> to vector<8x128xf32>
      %305 = vector.extract_strided_slice %275 {offsets = [0, 0], sizes = [8, 128], strides = [1, 1]} : vector<8x384xf32> to vector<8x128xf32>
      %306 = arith.addf %304, %305 : vector<8x128xf32>
      %307 = arith.negf %306 : vector<8x128xf32>
      %308 = math.exp %307 : vector<8x128xf32>
      %cst_121 = arith.constant 1.000000e+00 : f32
      %309 = vector.broadcast %cst_121 : f32 to vector<8x128xf32>
      %310 = arith.addf %309, %308 : vector<8x128xf32>
      %311 = arith.divf %309, %310 : vector<8x128xf32>
      %312 = vector.extract_strided_slice %271 {offsets = [0, 128], sizes = [8, 128], strides = [1, 1]} : vector<8x384xf32> to vector<8x128xf32>
      %313 = vector.extract_strided_slice %275 {offsets = [0, 128], sizes = [8, 128], strides = [1, 1]} : vector<8x384xf32> to vector<8x128xf32>
      %314 = arith.addf %312, %313 : vector<8x128xf32>
      %315 = arith.negf %314 : vector<8x128xf32>
      %316 = math.exp %315 : vector<8x128xf32>
      %cst_122 = arith.constant 1.000000e+00 : f32
      %317 = vector.broadcast %cst_122 : f32 to vector<8x128xf32>
      %318 = arith.addf %317, %316 : vector<8x128xf32>
      %319 = arith.divf %317, %318 : vector<8x128xf32>
      %320 = vector.extract_strided_slice %271 {offsets = [0, 256], sizes = [8, 128], strides = [1, 1]} : vector<8x384xf32> to vector<8x128xf32>
      %321 = vector.extract_strided_slice %275 {offsets = [0, 256], sizes = [8, 128], strides = [1, 1]} : vector<8x384xf32> to vector<8x128xf32>
      %322 = vector.broadcast %303 : vector<1x128xf32> to vector<8x128xf32>
      %323 = arith.addf %321, %322 : vector<8x128xf32>
      %324 = arith.mulf %311, %323 : vector<8x128xf32>
      %325 = arith.addf %320, %324 : vector<8x128xf32>
      %326 = math.tanh %325 : vector<8x128xf32>
      %327 = arith.subf %254, %326 : vector<8x128xf32>
      %328 = arith.mulf %319, %327 : vector<8x128xf32>
      %329 = arith.addf %326, %328 : vector<8x128xf32>
      %330 = arith.truncf %302 : vector<8x128xf32> to vector<8x128xbf16>
      %331 = arith.truncf %329 : vector<8x128xf32> to vector<8x128xbf16>
      %332 = arith.index_cast %264 : i32 to index
      %c0_123 = arith.constant 0 : index
      %333 = vector.load %arg17[%332, %c0_123] : memref<128x128xbf16, #tpu.memory_space<vmem>>, vector<8x128xbf16>
      tpu.vector_store %arg17[%332, %c0_123], %330 {strides = array<i32>} : memref<128x128xbf16, #tpu.memory_space<vmem>>, vector<8x128xbf16>,
      %334 = arith.index_cast %267 : i32 to index
      %c0_124 = arith.constant 0 : index
      %335 = vector.load %arg18[%334, %c0_124] : memref<128x128xbf16, #tpu.memory_space<vmem>>, vector<8x128xbf16>
      tpu.vector_store %arg18[%334, %c0_124], %331 {strides = array<i32>} : memref<128x128xbf16, #tpu.memory_space<vmem>>, vector<8x128xbf16>,
      scf.yield %302, %329, %330, %331 : vector<8x128xf32>, vector<8x128xf32>, vector<8x128xbf16>, vector<8x128xbf16>
    }
    %c4_i32_22 = arith.constant 4 : i32
    %c0_23 = arith.constant 0 : index
    %c0_24 = arith.constant 0 : index
    %25 = vector.load %arg17[%c0_23, %c0_24] : memref<128x128xbf16, #tpu.memory_space<vmem>>, vector<128x128xbf16>
    %c0_25 = arith.constant 0 : index
    %c0_26 = arith.constant 0 : index
    %26 = vector.load %arg11[%c0_25, %c0_26] : memref<128x128xbf16, #tpu.memory_space<vmem>>, vector<128x128xbf16>
    %cst_27 = arith.constant dense<0.000000e+00> : vector<128x128xf32>
    %27 = tpu.matmul %25, %26, %cst_27 {dimension_numbers = #tpu.dot_dimension_numbers<[1], [0], [0], [1], [0, 0, 1, 1], [], []>} : vector<128x128xbf16>, vector<128x128xbf16>, vector<128x128xf32> -> vector<128x128xf32>
    %c0_28 = arith.constant 0 : index
    %c0_29 = arith.constant 0 : index
    %28 = vector.load %arg18[%c0_28, %c0_29] : memref<128x128xbf16, #tpu.memory_space<vmem>>, vector<128x128xbf16>
    %c0_30 = arith.constant 0 : index
    %c0_31 = arith.constant 0 : index
    %29 = vector.load %arg12[%c0_30, %c0_31] : memref<128x128xbf16, #tpu.memory_space<vmem>>, vector<128x128xbf16>
    %cst_32 = arith.constant dense<0.000000e+00> : vector<128x128xf32>
    %30 = tpu.matmul %28, %29, %cst_32 {dimension_numbers = #tpu.dot_dimension_numbers<[1], [0], [0], [1], [0, 0, 1, 1], [], []>} : vector<128x128xbf16>, vector<128x128xbf16>, vector<128x128xf32> -> vector<128x128xf32>
    %31 = arith.addf %27, %30 : vector<128x128xf32>
    %c0_33 = arith.constant 0 : index
    %c0_34 = arith.constant 0 : index
    %32 = vector.load %arg13[%c0_33, %c0_34] : memref<1x128xf32, #tpu.memory_space<vmem>>, vector<1x128xf32>
    %33 = vector.broadcast %32 : vector<1x128xf32> to vector<128x128xf32>
    %34 = arith.addf %31, %33 : vector<128x128xf32>
    %c0_35 = arith.constant 0 : index
    %c0_36 = arith.constant 0 : index
    %35 = vector.load %arg14[%c0_35, %c0_36] : memref<128x128xf32, #tpu.memory_space<vmem>>, vector<128x128xf32>
    tpu.vector_store %arg14[%c0_35, %c0_36], %34 {strides = array<i32>} : memref<128x128xf32, #tpu.memory_space<vmem>>, vector<128x128xf32>,
    return
  }
}

</mosaic_0001>

<bundles_post_ra>
// kernel: seq_tagger_forward.1
= control target key start
LH: loop header
LB: loop body
LE: loop exit
PB: predicated region body
PF: predicated region fallthrough
CT: control target
= control target key end

     0   :  { %s7316_s1 = inlined_call_operand.vmem [shape: bf16[384,128], index: 1, kind: input, shape index: {}]   ;;  %s7317_s5 = inlined_call_operand.vmem [shape: bf16[128,384], index: 5, kind: input, shape index: {}]   ;;  %s7318_s6 = inlined_call_operand.vmem [shape: bf16[128,384], index: 6, kind: input, shape index: {}]   ;;  %s7319_s9 = inlined_call_operand.vmem [shape: f32[1,128], index: 9, kind: input, shape index: {}]   ;;  %s7320_s10 = inlined_call_operand.vmem [shape: f32[1,128], index: 10, kind: input, shape index: {}]   ;;  %s7321_s11 = inlined_call_operand.vmem [shape: bf16[128,128], index: 11, kind: input, shape index: {}]   ;;  %s7322_s12 = inlined_call_operand.vmem [shape: bf16[128,128], index: 12, kind: input, shape index: {}]   ;;  %s7323_s13 = inlined_call_operand.vmem [shape: f32[1,128], index: 13, kind: input, shape index: {}]   ;;  %s7324_s14 = inlined_call_operand.vmem [shape: f32[128,128], index: 14, kind: output, shape index: {}]   ;;  %s7325_s0 = inlined_call_operand.vmem [shape: bf16[128,384], index: 0, kind: input, shape index: {}]   ;;  %s7326_s3 = inlined_call_operand.vmem [shape: bf16[128,384], index: 3, kind: input, shape index: {}]   ;;  %s7327_s4 = inlined_call_operand.vmem [shape: bf16[128,384], index: 4, kind: input, shape index: {}]   ;;  %s7328_s2 = inlined_call_operand.vmem [shape: f32[1,128], index: 2, kind: input, shape index: {}]   ;;  %s7329_s7 = inlined_call_operand.vmem [shape: f32[1,384], index: 7, kind: input, shape index: {}]   ;;  %s7330_s8 = inlined_call_operand.vmem [shape: f32[1,384], index: 8, kind: input, shape index: {}]  }
   0x1   :  { %v5279_v0 = vld [vmem:[%s7316_s1 + $0x78] sm:$0xff]   ;;  %v5281_v2 = vld [vmem:[%s7316_s1 + $0x70] sm:$0xff]   ;;  %v5284_v5 = vld [vmem:[%s7316_s1 + $0x68] sm:$0xff]  }
   0x2   :  { %v5280_v1 = vld [vmem:[%s7316_s1 + $0x38] sm:$0xff]   ;;  %4699 = vmatprep.subr.bf16.mxu0 %v5279_v0  ;;  %v5283_v4 = vld [vmem:[%s7316_s1 + $0x30] sm:$0xff]   ;;  %v5286_v7 = vld [vmem:[%s7316_s1 + $0x28] sm:$0xff]  }
   0x3   :  { %4700 = vmatpush3.bf16.msra.mxu0 %v5280_v1  ;;  %v5282_v3 = vld [vmem:[%s7316_s1 + $0xb8] sm:$0xff]   ;;  %v5285_v6 = vld [vmem:[%s7316_s1 + $0xb0] sm:$0xff]   ;;  %v5287_v8 = vld [vmem:[%s7316_s1 + $0x60] sm:$0xff]  }
   0x4   :  { %4701 = vmatprep.subr.bf16.mxu0 %v5281_v2  ;;  %4915 = vmatprep.subr.bf16.mxu1 %v5282_v3  ;;  %v5288_v9 = vld [vmem:[%s7316_s1 + $0xa8] sm:$0xff]   ;;  %v5289_v10 = vld [vmem:[%s7316_s1 + $0x20] sm:$0xff]   ;;  %v5290_v11 = vld [vmem:[%s7316_s1 + $0x58] sm:$0xff]  }
   0x5   :  { %4916 = vmatpush3.bf16.msra.mxu1 %v5282_v3  ;;  %v5291_v12 = vld [vmem:[%s7316_s1 + $0xa0] sm:$0xff]   ;;  %v5292_v13 = vld [vmem:[%s7316_s1 + $0x18] sm:$0xff]   ;;  %v5293_v15 = vld [vmem:[%s7316_s1 + $0x50] sm:$0xff]  }
   0x6   :  { %4917 = vmatprep.subr.bf16.mxu1 %v5285_v6  ;;  %v5294_v14 = vld [vmem:[%s7316_s1 + $0x98] sm:$0xff]   ;;  %v5295_v16 = vld [vmem:[%s7316_s1 + $0x10] sm:$0xff]   ;;  %v5296_v18 = vld [vmem:[%s7316_s1 + $0x48] sm:$0xff]  }
   0x7   :  { %4702 = vmatpush3.bf16.msra.mxu0 %v5283_v4  ;;  %v5297_v17 = vld [vmem:[%s7316_s1 + $0x90] sm:$0xff]   ;;  %v5298_v19 = vld [vmem:[%s7316_s1 + $0x8] sm:$0xff]   ;;  %v5299_v20 = vld [vmem:[%s7316_s1 + $0x40] sm:$0xff]  }
   0x8   :  { %4703 = vmatprep.subr.bf16.mxu0 %v5284_v5  ;;  %v5300_v21 = vld [vmem:[%s7316_s1 + $0x88] sm:$0xff]   ;;  %v5304_v22 = vld [vmem:[%s7325_s0 + $0x4] ss:$12 sps:$4 sm:$0xff]   ;;  %v5311_v31 = vld [vmem:[%s7325_s0 + $0x34] ss:$12 sps:$4 sm:$0xff]  }
   0x9   :  { %4918 = vmatpush3.bf16.msra.mxu1 %v5285_v6  ;;  %v5301_v23 = vld [vmem:[%s7316_s1] sm:$0xff]   ;;  %439 = vmatprep.mubr.bf16.mxu0 %v5304_v22  ;;  %v5306_v24 = vld [vmem:[%s7325_s0 + $0x8] ss:$12 sps:$4 sm:$0xff]   ;;  %v5315_v32 = vld [vmem:[%s7325_s0 + $0x50] ss:$12 sps:$4 sm:$0xff]  }
   0xa   :  { %4919 = vmatprep.subr.bf16.mxu1 %v5288_v9  ;;  %v5305_v25 = vld [vmem:[%s7316_s1 + $0x80] sm:$0xff]   ;;  %4931 = vmatprep.mubr.bf16.mxu1 %v5306_v24  ;;  %v5308_v27 = vld [vmem:[%s7325_s0 + $0x1c] ss:$12 sps:$4 sm:$0xff]   ;;  %v5338_v37 = vld [vmem:[%s7326_s3 + $0xac] ss:$12 sps:$4 sm:$0xff]  }
   0xb   :  { %4704 = vmatpush3.bf16.msra.mxu0 %v5286_v7  ;;  %v5302_v26 = vld [vmem:[%s7325_s0] ss:$12 sps:$4 sm:$0xff]   ;;  %v5314_v29 = vld [vmem:[%s7325_s0 + $0x38] ss:$12 sps:$4 sm:$0xff]   ;;  %v5322_v33 = vld [vmem:[%s7325_s0 + $0x68] ss:$12 sps:$4 sm:$0xff]  }
   0xc   :  { %4705 = vmatprep.subr.bf16.mxu0 %v5287_v8  ;;  %v5307_v28 = vld [vmem:[%s7325_s0 + $0x20] ss:$12 sps:$4 sm:$0xff]   ;;  %v5310_v30 = vld [vmem:[%s7325_s0 + $0x18] ss:$12 sps:$4 sm:$0xff]   ;;  %v5335_v34 = vld [vmem:[%s7326_s3 + $0xb0] ss:$12 sps:$4 sm:$0xff]  }
   0xd   :  { %4920 = vmatpush3.bf16.msra.mxu1 %v5288_v9  ;;  %v5313_v35 = vld [vmem:[%s7325_s0 + $0x30] ss:$12 sps:$4 sm:$0xff]   ;;  %v5336_v36 = vld [vmem:[%s7326_s3 + $0xa8] ss:$12 sps:$4 sm:$0xff]   ;;  %v5316_v38 = vld [vmem:[%s7325_s0 + $0x4c] ss:$12 sps:$4 sm:$0xff]  }
   0xe   :  { %4921 = vmatprep.subr.bf16.mxu1 %v5291_v12  ;;  %v5339_v39 = vld [vmem:[%s7326_s3 + $0x90] ss:$12 sps:$4 sm:$0xff]   ;;  %v5341_v40 = vld [vmem:[%s7326_s3 + $0x94] ss:$12 sps:$4 sm:$0xff]   ;;  %v5342_v41 = vld [vmem:[%s7326_s3 + $0x98] ss:$12 sps:$4 sm:$0xff]  }
   0xf   :  { %4706 = vmatpush3.bf16.msra.mxu0 %v5289_v10  ;;  %v5323_v42 = vld [vmem:[%s7325_s0 + $0x80] ss:$12 sps:$4 sm:$0xff]   ;;  %v5345_v43 = vld [vmem:[%s7326_s3 + $0x7c] ss:$12 sps:$4 sm:$0xff]   ;;  %v5330_v44 = vld [vmem:[%s7325_s0 + $0x98] ss:$12 sps:$4 sm:$0xff]  }
  0x10   :  { %4707 = vmatprep.subr.bf16.mxu0 %v5290_v11  ;;  %v5343_v45 = vld [vmem:[%s7326_s3 + $0x78] ss:$12 sps:$4 sm:$0xff]   ;;  %v5318_v47 = vld [vmem:[%s7325_s0 + $0x48] ss:$12 sps:$4 sm:$0xff]   ;;  %v5346_v49 = vld [vmem:[%s7326_s3 + $0x60] ss:$12 sps:$4 sm:$0xff]  }
  0x11   :  { %4922 = vmatpush3.bf16.msra.mxu1 %v5291_v12  ;;  %v5348_v46 = vld [vmem:[%s7326_s3 + $0x64] ss:$12 sps:$4 sm:$0xff]   ;;  %v5321_v51 = vld [vmem:[%s7325_s0 + $0x60] ss:$12 sps:$4 sm:$0xff]   ;;  %v5324_v52 = vld [vmem:[%s7325_s0 + $0x7c] ss:$12 sps:$4 sm:$0xff]  }
  0x12   :  { %4923 = vmatprep.subr.bf16.mxu1 %v5294_v14  ;;  %v5319_v48 = vld [vmem:[%s7325_s0 + $0x64] ss:$12 sps:$4 sm:$0xff]   ;;  %v5327_v54 = vld [vmem:[%s7325_s0 + $0x94] ss:$12 sps:$4 sm:$0xff]   ;;  %v5332_v56 = vld [vmem:[%s7325_s0 + $0xac] ss:$12 sps:$4 sm:$0xff]  }
  0x13   :  { %4708 = vmatpush3.bf16.msra.mxu0 %v5292_v13  ;;  %v5331_v50 = vld [vmem:[%s7325_s0 + $0xb0] ss:$12 sps:$4 sm:$0xff]   ;;  %v5326_v53 = vld [vmem:[%s7325_s0 + $0x78] ss:$12 sps:$4 sm:$0xff]   ;;  %v5334_v57 = vld [vmem:[%s7325_s0 + $0xa8] ss:$12 sps:$4 sm:$0xff]  }
  0x14   :  { %4709 = vmatprep.subr.bf16.mxu0 %v5293_v15  ;;  %v5329_v55 = vld [vmem:[%s7325_s0 + $0x90] ss:$12 sps:$4 sm:$0xff]   ;;  %v5349_v58 = vld [vmem:[%s7326_s3 + $0x80] ss:$12 sps:$4 sm:$0xff]   ;;  %v5350_v60 = vld [vmem:[%s7326_s3 + $0x48] ss:$12 sps:$4 sm:$0xff]  }
  0x15   :  { %4924 = vmatpush3.bf16.msra.mxu1 %v5294_v14  ;;  %v5352_v59 = vld [vmem:[%s7326_s3 + $0x4c] ss:$12 sps:$4 sm:$0xff]   ;;  %v5355_v61 = vld [vmem:[%s7326_s3 + $0x34] ss:$12 sps:$4 sm:$0xff]   ;;  %v5353_v63 = vld [vmem:[%s7326_s3 + $0x30] ss:$12 sps:$4 sm:$0xff]  }
  0x16   :  { %4925 = vmatprep.subr.bf16.mxu1 %v5297_v17  ;;  %v5356_v62 = vld [vmem:[%s7326_s3 + $0x68] ss:$12 sps:$4 sm:$0xff]   ;;  %v5360_v1 = vld [vmem:[%s7326_s3 + $0x50] ss:$12 sps:$4 sm:$0xff]   ;;  %v5357_v2 = vld [vmem:[%s7326_s3 + $0x18] ss:$12 sps:$4 sm:$0xff]  }
  0x17   :  { %4710 = vmatpush3.bf16.msra.mxu0 %v5295_v16  ;;  %v5359_v0 = vld [vmem:[%s7326_s3 + $0x1c] ss:$12 sps:$4 sm:$0xff]   ;;  %v5363_v3 = vld [vmem:[%s7326_s3 + $0x4] ss:$12 sps:$4 sm:$0xff]   ;;  %v5361_v5 = vld [vmem:[%s7326_s3] ss:$12 sps:$4 sm:$0xff]  }
  0x18   :  { %4711 = vmatprep.subr.bf16.mxu0 %v5296_v18  ;;  %v5364_v4 = vld [vmem:[%s7326_s3 + $0x38] ss:$12 sps:$4 sm:$0xff]   ;;  %v5365_v6 = vld [vmem:[%s7326_s3 + $0x20] ss:$12 sps:$4 sm:$0xff]   ;;  %v5711_v7 = vmov 0  }
  0x19   :  { %4926 = vmatpush3.bf16.msra.mxu1 %v5297_v17  ;;  %v5366_v8 = vld [vmem:[%s7326_s3 + $0x8] ss:$12 sps:$4 sm:$0xff]   ;;  %v5369_v9 = vld [vmem:[%s7327_s4 + $0xac] ss:$12 sps:$4 sm:$0xff]   ;;  %v5370_v10 = vld [vmem:[%s7327_s4 + $0xb0] ss:$12 sps:$4 sm:$0xff]  }
  0x1a   :  { %4927 = vmatprep.subr.bf16.mxu1 %v5300_v21  ;;  %v6016_v13 = vld [vmem:[%s7328_s2] ss:$0 sm:$0xff] }
  0x1b   :  { %4712 = vmatpush3.bf16.msra.mxu0 %v5298_v19 }
  0x1c   :  { %4713 = vmatprep.subr.bf16.mxu0 %v5299_v20 }
  0x1d   :  { %4928 = vmatpush3.bf16.msra.mxu1 %v5300_v21 }
  0x1e   :  { %4929 = vmatprep.subr.bf16.mxu1 %v5305_v25 }
  0x1f   :  { %4714 = vmatpush3.bf16.msra.mxu0 %v5301_v23 }
  0x20   :  { %4947 = vmatprep.subr.bf16.mxu0 %v5335_v34 }
  0x21   :  { %4930 = vmatpush3.bf16.msra.mxu1 %v5305_v25 }
  0x22   :  { %440 = vmatmul.mubr.bf16.vlgmr.msra.gmra.mxu0 %v5302_v26  ;;  %802 = vmatprep.subr.bf16.mxu1 %v5338_v37  ;;  %v5374_v37 = vld [vmem:[%s7327_s4 + $0x98] ss:$12 sps:$4 sm:$0xff]  }
  0x23   :  { %447 = vmatprep.mubr.bf16.mxu0 %v5308_v27  ;;  %4948 = vmatpush3.bf16.msra.mxu0 %v5335_v34 }
  0x24   :  { %4932 = vmatmul.mubr.bf16.vlgmr.msra.gmra.mxu1 %v5307_v28  ;;  %4949 = vmatprep.subr.bf16.mxu0 %v5342_v41 }
  0x25   :  { %4935 = vmatprep.mubr.bf16.mxu1 %v5314_v29  ;;  %803 = vmatpush1.bf16.msra.mxu1 %v5336_v36 }
  0x26   :  { %804 = vmatprep.subr.bf16.mxu1 %v5341_v40 }
  0x27   :  { %4950 = vmatpush3.bf16.msra.mxu0 %v5342_v41 }
  0x28   :  { %4951 = vmatprep.subr.bf16.mxu0 %v5349_v58 }
  0x29   :  { %805 = vmatpush1.bf16.msra.mxu1 %v5339_v39 }
  0x2a   :  { %448 = vmatmul.mubr.bf16.gmra.mxu0 %v5310_v30  ;;  %806 = vmatprep.subr.bf16.mxu1 %v5345_v43 }
  0x2b   :  { %455 = vmatprep.mubr.bf16.mxu0 %v5311_v31  ;;  %4952 = vmatpush3.bf16.msra.mxu0 %v5349_v58  ;;  %v5382_v58 = vld [vmem:[%s7327_s4 + $0x68] ss:$12 sps:$4 sm:$0xff]  }
  0x2c   :  { %4936 = vmatmul.mubr.bf16.gmra.mxu1 %v5315_v32  ;;  %4953 = vmatprep.subr.bf16.mxu0 %v5356_v62 }
  0x2d   :  { %4939 = vmatprep.mubr.bf16.mxu1 %v5322_v33  ;;  %807 = vmatpush1.bf16.msra.mxu1 %v5343_v45  ;;  %v5378_v45 = vld [vmem:[%s7327_s4 + $0x80] ss:$12 sps:$4 sm:$0xff]  }
  0x2e   :  { %808 = vmatprep.subr.bf16.mxu1 %v5348_v46 }
  0x2f   :  { %4954 = vmatpush3.bf16.msra.mxu0 %v5356_v62  ;;  %v5371_v62 = vld [vmem:[%s7327_s4 + $0x90] ss:$12 sps:$4 sm:$0xff]  }
  0x30   :  { %4955 = vmatprep.subr.bf16.mxu0 %v5360_v1 }
  0x31   :  { %809 = vmatpush1.bf16.msra.mxu1 %v5346_v49 }
  0x32   :  { %456 = vmatmul.mubr.bf16.gmra.mxu0 %v5313_v35  ;;  %810 = vmatprep.subr.bf16.mxu1 %v5352_v59 }
  0x33   :  { %463 = vmatprep.mubr.bf16.mxu0 %v5316_v38  ;;  %4956 = vmatpush3.bf16.msra.mxu0 %v5360_v1  ;;  %v5377_v1 = vld [vmem:[%s7327_s4 + $0x7c] ss:$12 sps:$4 sm:$0xff]  }
  0x34   :  { %4940 = vmatmul.mubr.bf16.gmra.mxu1 %v5323_v42  ;;  %4957 = vmatprep.subr.bf16.mxu0 %v5364_v4 }
  0x35   :  { %4943 = vmatprep.mubr.bf16.mxu1 %v5330_v44  ;;  %811 = vmatpush1.bf16.msra.mxu1 %v5350_v60 }
  0x36   :  { %812 = vmatprep.subr.bf16.mxu1 %v5355_v61 }
  0x37   :  { %4958 = vmatpush3.bf16.msra.mxu0 %v5364_v4  ;;  %v5386_v4 = vld [vmem:[%s7327_s4 + $0x50] ss:$12 sps:$4 sm:$0xff]  }
  0x38   :  { %4959 = vmatprep.subr.bf16.mxu0 %v5365_v6 }
  0x39   :  { %813 = vmatpush1.bf16.msra.mxu1 %v5353_v63 }
  0x3a   :  { %464 = vmatmul.mubr.bf16.gmra.mxu0 %v5318_v47  ;;  %814 = vmatprep.subr.bf16.mxu1 %v5359_v0 }
  0x3b   :  { %471 = vmatprep.mubr.bf16.mxu0 %v5319_v48  ;;  %4960 = vmatpush3.bf16.msra.mxu0 %v5365_v6 }
  0x3c   :  { %4944 = vmatmul.mubr.bf16.gmra.mxu1 %v5331_v50  ;;  %4961 = vmatprep.subr.bf16.mxu0 %v5366_v8 }
  0x3d   :  { %815 = vmatpush1.bf16.msra.mxu1 %v5357_v2  ;;  %834 = vmatprep.mubr.bf16.mxu1 %v5711_v7 }
  0x3e   :  { %816 = vmatprep.subr.bf16.mxu1 %v5363_v3 }
  0x3f   :  { %4962 = vmatpush3.bf16.msra.mxu0 %v5366_v8 }
  0x40   :  { %1237 = vmatprep.subr.bf16.mxu0 %v5369_v9 }
  0x41   :  { %817 = vmatpush1.bf16.msra.mxu1 %v5361_v5 }
  0x42   :  { %472 = vmatmul.mubr.bf16.gmra.mxu0 %v5321_v51  ;;  %4979 = vmatprep.subr.bf16.mxu1 %v5370_v10 }
  0x43   :  { %479 = vmatprep.mubr.bf16.mxu0 %v5324_v52  ;;  %v5367_v52 = vld [vmem:[%s7327_s4 + $0xa8] ss:$12 sps:$4 sm:$0xff]  }
  0x4a   :  { %480 = vmatmul.mubr.bf16.gmra.mxu0 %v5326_v53 }
  0x4b   :  { %487 = vmatprep.mubr.bf16.mxu0 %v5327_v54 }
  0x52   :  { %488 = vmatmul.mubr.bf16.gmra.mxu0 %v5329_v55  ;;  %v5373_v55 = vld [vmem:[%s7327_s4 + $0x94] ss:$12 sps:$4 sm:$0xff]  }
  0x53   :  { %495 = vmatprep.mubr.bf16.mxu0 %v5332_v56 }
  0x5a   :  { %496 = vmatmul.mubr.bf16.gmra.mxu0 %v5334_v57 }
  0xe2   :  { %v4715_v11 = vpop.f32.mrf.mxu0 }
  0xe4   :  { %v4716_v12 = vpop.f32.mrf.mxu0  ;;  %v4933_v15 = vpop.f32.mrf.mxu1 }
  0xe5   :  { %v4717_v14 = vadd.f32 %v4716_v12, %v4715_v11 }
  0xe6   :  { %v4718_v16 = vpop.f32.mrf.mxu0  ;;  %v538_v18 = vpop.f32.mrf.mxu1 }
  0xe7   :  { %v442_v17 = vadd.f32 %v4717_v14, %v6016_v13  ;;  %v5381_v14 = vld [vmem:[%s7327_s4 + $0x64] ss:$12 sps:$4 sm:$0xff]  }
  0xe8   :  { %v4719_v19 = vpop.f32.mrf.mxu0  ;;  %v4934_v21 = vpop.f32.mrf.mxu1 }
  0xe9   :  { %v4720_v20 = vadd.f32 %v4719_v19, %v4718_v16  ;;  %v539_v23 = vadd.f32 %v538_v18, %v442_v17  ;;  %v5390_v17 = vld [vmem:[%s7327_s4 + $0x38] ss:$12 sps:$4 sm:$0xff]  }
  0xea   :  { %v4721_v22 = vpop.f32.mrf.mxu0  ;;  %v541_v25 = vpop.f32.mrf.mxu1 }
  0xeb   :  { %v445_v24 = vadd.f32 %v4720_v20, %v6016_v13  ;;  %v601_v31 = vmax.f32 %v539_v23, 0.0 }
  0xec   :  { %v4722_v26 = vpop.f32.mrf.mxu0  ;;  %v6020_v30 = vpop.f32.mrf.mxu1 }
  0xed   :  { %v4723_v27 = vadd.f32 %v4722_v26, %v4721_v22  ;;  %v542_v28 = vadd.f32 %v541_v25, %v445_v24  ;;  %v5385_v24 = vld [vmem:[%s7327_s4 + $0x4c] ss:$12 sps:$4 sm:$0xff]  }
  0xee   :  { %v4724_v29 = vpop.f32.mrf.mxu0  ;;  %v554_v39 = vpop.f32.mrf.mxu1 }
  0xef   :  { %v450_v32 = vadd.f32 %v4723_v27, %v6016_v13  ;;  %v602_v33 = vmax.f32 %v542_v28, 0.0  ;;  %v5394_v27 = vld [vmem:[%s7327_s4 + $0x20] ss:$12 sps:$4 sm:$0xff]  }
  0xf0   :  { %v4725_v34 = vpop.f32.mrf.mxu0  ;;  %v4938_v47 = vpop.f32.mrf.mxu1 }
  0xf1   :  { %v6023_v35 = vpack.c.bf16 %v602_v33, %v601_v31  ;;  %v4726_v36 = vadd.f32 %v4725_v34, %v4724_v29  ;;  %v547_v40 = vadd.f32 %v4933_v15, %v450_v32  ;;  %v5383_v32 = vld [vmem:[%s7327_s4 + $0x48] ss:$12 sps:$4 sm:$0xff]  }
  0xf2   :  { %v4727_v38 = vpop.f32.mrf.mxu0  ;;  %v557_v57 = vpop.f32.mrf.mxu1 }
  0xf3   :  { %v453_v41 = vadd.f32 %v4726_v36, %v6016_v13  ;;  %835 = vmatmul.mubr.bf16.vlgmr.msra.gmra.mxu1 %v6023_v35  ;;  %4963 = vmatprep.mubr.bf16.mxu0 %v6023_v35  ;;  %v603_v48 = vmax.f32 %v547_v40, 0.0  ;;  %v5389_v36 = vld [vmem:[%s7327_s4 + $0x34] ss:$12 sps:$4 sm:$0xff]  }
  0xf4   :  { %v4728_v42 = vpop.f32.mrf.mxu0  ;;  %844 = vmatprep.mubr.bf16.mxu1 %v5711_v7  ;;  %4980 = vmatpush3.bf16.msra.mxu1 %v5370_v10  ;;  %v6057_v3 = vpop.f32.mrf.mxu1  ;;  %v5375_v10 = vld [vmem:[%s7327_s4 + $0x78] ss:$12 sps:$4 sm:$0xff]  }
  0xf5   :  { %v550_v43 = vadd.f32 %v4934_v21, %v453_v41  ;;  %v4729_v44 = vadd.f32 %v4728_v42, %v4727_v38  ;;  %4981 = vmatprep.subr.bf16.mxu1 %v5374_v37  ;;  %v5379_v21 = vld [vmem:[%s7327_s4 + $0x60] ss:$12 sps:$4 sm:$0xff]  }
  0xf6   :  { %v4730_v46 = vpop.f32.mrf.mxu0  ;;  %v570_v16 = vpop.f32.mrf.mxu1 }
  0xf7   :  { %v604_v49 = vmax.f32 %v550_v43, 0.0  ;;  %v458_v50 = vadd.f32 %v4729_v44, %v6016_v13  ;;  %v5387_v43 = vld [vmem:[%s7327_s4 + $0x30] ss:$12 sps:$4 sm:$0xff]  }
  0xf8   :  { %v4731_v51 = vpop.f32.mrf.mxu0  ;;  %4982 = vmatpush3.bf16.msra.mxu1 %v5374_v37  ;;  %v4942_v26 = vpop.f32.mrf.mxu1 }
  0xf9   :  { %v6039_v53 = vpack.c.bf16 %v604_v49, %v603_v48  ;;  %v4732_v54 = vadd.f32 %v4731_v51, %v4730_v46  ;;  %4983 = vmatprep.subr.bf16.mxu1 %v5378_v45  ;;  %v555_v59 = vadd.f32 %v554_v39, %v458_v50  ;;  %v5398_v39 = vld [vmem:[%s7327_s4 + $0x8] ss:$12 sps:$4 sm:$0xff]  }
  0xfa   :  { %v4733_v56 = vpop.f32.mrf.mxu0  ;;  %v573_v38 = vpop.f32.mrf.mxu1  ;;  %v5393_v46 = vld [vmem:[%s7327_s4 + $0x1c] ss:$12 sps:$4 sm:$0xff]  }
  0xfb   :  { %845 = vmatmul.mubr.bf16.gmra.mxu1 %v6039_v53  ;;  %4964 = vmatmul.mubr.bf16.vlgmr.msra.gmra.mxu0 %v6039_v53  ;;  %v461_v60 = vadd.f32 %v4732_v54, %v6016_v13  ;;  %v605_v5 = vmax.f32 %v555_v59, 0.0  ;;  %v5391_v54 = vld [vmem:[%s7327_s4 + $0x18] ss:$12 sps:$4 sm:$0xff]  }
  0xfc   :  { %v4734_v61 = vpop.f32.mrf.mxu0  ;;  %854 = vmatprep.mubr.bf16.mxu1 %v5711_v7  ;;  %1238 = vmatpush1.bf16.msra.mxu0 %v5367_v52  ;;  %v4945_v48 = vpop.f32.mrf.mxu1 }
  0xfd   :  { %v4735_v63 = vadd.f32 %v4734_v61, %v4733_v56  ;;  %v558_v0 = vadd.f32 %v557_v57, %v461_v60  ;;  %1239 = vmatprep.subr.bf16.mxu0 %v5373_v55  ;;  %4984 = vmatpush3.bf16.msra.mxu1 %v5378_v45  ;;  %v5397_v57 = vld [vmem:[%s7327_s4 + $0x4] ss:$12 sps:$4 sm:$0xff]  }
  0xfe   :  { %v4736_v2 = vpop.f32.mrf.mxu0  ;;  %4985 = vmatprep.subr.bf16.mxu1 %v5382_v58  ;;  %v586_v59 = vpop.f32.mrf.mxu1 }
  0xff   :  { %v466_v6 = vadd.f32 %v4735_v63, %v6016_v13  ;;  %v606_v8 = vmax.f32 %v558_v0, 0.0  ;;  %v5395_v63 = vld [vmem:[%s7327_s4] ss:$12 sps:$4 sm:$0xff]  }
 0x100   :  { %v4737_v9 = vpop.f32.mrf.mxu0  ;;  %1240 = vmatpush1.bf16.msra.mxu0 %v5371_v62 }
 0x101   :  { %v6066_v11 = vpack.c.bf16 %v606_v8, %v605_v5  ;;  %v4738_v12 = vadd.f32 %v4737_v9, %v4736_v2  ;;  %1241 = vmatprep.subr.bf16.mxu0 %v5377_v1  ;;  %4986 = vmatpush3.bf16.msra.mxu1 %v5382_v58  ;;  %v563_v18 = vadd.f32 %v6020_v30, %v466_v6 }
 0x102   :  { %v4739_v15 = vpop.f32.mrf.mxu0  ;;  %4987 = vmatprep.subr.bf16.mxu1 %v5386_v4 }
 0x103   :  { %v469_v19 = vadd.f32 %v4738_v12, %v6016_v13  ;;  %855 = vmatmul.mubr.bf16.gmra.mxu1 %v6066_v11  ;;  %4967 = vmatprep.mubr.bf16.mxu0 %v6066_v11  ;;  %v607_v28 = vmax.f32 %v563_v18, 0.0 }
 0x104   :  { %v4740_v20 = vpop.f32.mrf.mxu0  ;;  %864 = vmatprep.mubr.bf16.mxu1 %v5711_v7  ;;  %1242 = vmatpush1.bf16.msra.mxu0 %v5375_v10 }
 0x105   :  { %v566_v22 = vadd.f32 %v4938_v47, %v469_v19  ;;  %v4741_v23 = vadd.f32 %v4740_v20, %v4739_v15  ;;  %1243 = vmatprep.subr.bf16.mxu0 %v5381_v14  ;;  %4988 = vmatpush3.bf16.msra.mxu1 %v5386_v4  ;;  %v4946_v4 = vpop.f32.mrf.mxu1 }
 0x106   :  { %v4742_v25 = vpop.f32.mrf.mxu0  ;;  %4989 = vmatprep.subr.bf16.mxu1 %v5390_v17 }
 0x107   :  { %v608_v29 = vmax.f32 %v566_v22, 0.0  ;;  %v474_v30 = vadd.f32 %v4741_v23, %v6016_v13  ;;  %v589_v14 = vpop.f32.mrf.mxu1 }
 0x108   :  { %v4743_v31 = vpop.f32.mrf.mxu0  ;;  %1244 = vmatpush1.bf16.msra.mxu0 %v5379_v21 }
 0x109   :  { %v6092_v33 = vpack.c.bf16 %v608_v29, %v607_v28  ;;  %v4744_v34 = vadd.f32 %v4743_v31, %v4742_v25  ;;  %1245 = vmatprep.subr.bf16.mxu0 %v5385_v24  ;;  %4990 = vmatpush3.bf16.msra.mxu1 %v5390_v17  ;;  %v571_v40 = vadd.f32 %v570_v16, %v474_v30 }
 0x10a   :  { %v4745_v37 = vpop.f32.mrf.mxu0  ;;  %4991 = vmatprep.subr.bf16.mxu1 %v5394_v27 }
 0x10b   :  { %865 = vmatmul.mubr.bf16.gmra.mxu1 %v6092_v33  ;;  %4968 = vmatmul.mubr.bf16.gmra.mxu0 %v6092_v33  ;;  %v477_v41 = vadd.f32 %v4744_v34, %v6016_v13  ;;  %v609_v49 = vmax.f32 %v571_v40, 0.0 }
 0x10c   :  { %v4746_v42 = vpop.f32.mrf.mxu0  ;;  %874 = vmatprep.mubr.bf16.mxu1 %v5711_v7  ;;  %1246 = vmatpush1.bf16.msra.mxu0 %v5383_v32 }
 0x10d   :  { %v4747_v44 = vadd.f32 %v4746_v42, %v4745_v37  ;;  %v574_v45 = vadd.f32 %v573_v38, %v477_v41  ;;  %1247 = vmatprep.subr.bf16.mxu0 %v5389_v36  ;;  %4992 = vmatpush3.bf16.msra.mxu1 %v5394_v27 }
 0x10e   :  { %v4748_v47 = vpop.f32.mrf.mxu0  ;;  %4993 = vmatprep.subr.bf16.mxu1 %v5398_v39 }
 0x10f   :  { %v482_v50 = vadd.f32 %v4747_v44, %v6016_v13  ;;  %v610_v51 = vmax.f32 %v574_v45, 0.0 }
 0x110   :  { %v4749_v52 = vpop.f32.mrf.mxu0  ;;  %1248 = vmatpush1.bf16.msra.mxu0 %v5387_v43 }
 0x111   :  { %v6114_v55 = vpack.c.bf16 %v610_v51, %v609_v49  ;;  %v4750_v56 = vadd.f32 %v4749_v52, %v4748_v47  ;;  %1249 = vmatprep.subr.bf16.mxu0 %v5393_v46  ;;  %4994 = vmatpush3.bf16.msra.mxu1 %v5398_v39  ;;  %v579_v60 = vadd.f32 %v6057_v3, %v482_v50 }
 0x112   :  { %v4751_v58 = vpop.f32.mrf.mxu0 }
 0x113   :  { %v485_v61 = vadd.f32 %v4750_v56, %v6016_v13  ;;  %875 = vmatmul.mubr.bf16.gmra.mxu1 %v6114_v55  ;;  %4971 = vmatprep.mubr.bf16.mxu0 %v6114_v55  ;;  %v611_v3 = vmax.f32 %v579_v60, 0.0 }
 0x114   :  { %v4752_v62 = vpop.f32.mrf.mxu0  ;;  %884 = vmatprep.mubr.bf16.mxu1 %v5711_v7  ;;  %1250 = vmatpush1.bf16.msra.mxu0 %v5391_v54 }
 0x115   :  { %v582_v0 = vadd.f32 %v4942_v26, %v485_v61  ;;  %v4753_v1 = vadd.f32 %v4752_v62, %v4751_v58  ;;  %1251 = vmatprep.subr.bf16.mxu0 %v5397_v57 }
 0x116   :  { %v4754_v2 = vpop.f32.mrf.mxu0 }
 0x117   :  { %v612_v5 = vmax.f32 %v582_v0, 0.0  ;;  %v490_v6 = vadd.f32 %v4753_v1, %v6016_v13 }
 0x118   :  { %v4755_v8 = vpop.f32.mrf.mxu0  ;;  %1252 = vmatpush1.bf16.msra.mxu0 %v5395_v63 }
 0x119   :  { %v622_v9 = vpack.c.bf16 %v612_v5, %v611_v3  ;;  %v4756_v10 = vadd.f32 %v4755_v8, %v4754_v2  ;;  %v587_v15 = vadd.f32 %v586_v59, %v490_v6 }
 0x11a   :  { %v4757_v12 = vpop.f32.mrf.mxu0 }
 0x11b   :  { %885 = vmatmul.mubr.bf16.gmra.mxu1 %v622_v9  ;;  %4972 = vmatmul.mubr.bf16.gmra.mxu0 %v622_v9  ;;  %v493_v16 = vadd.f32 %v4756_v10, %v6016_v13  ;;  %v613_v21 = vmax.f32 %v587_v15, 0.0 }
 0x11c   :  { %v4758_v17 = vpop.f32.mrf.mxu0  ;;  %894 = vmatprep.mubr.bf16.mxu1 %v5711_v7 }
 0x11d   :  { %v4759_v18 = vadd.f32 %v4758_v17, %v4757_v12  ;;  %v590_v19 = vadd.f32 %v589_v14, %v493_v16 }
 0x11e   :  { %v4760_v20 = vpop.f32.mrf.mxu0 }
 0x11f   :  { %v498_v22 = vadd.f32 %v4759_v18, %v6016_v13  ;;  %v614_v23 = vmax.f32 %v590_v19, 0.0 }
 0x120   :  { %v4761_v24 = vpop.f32.mrf.mxu0 }
 0x121   :  { %v623_v25 = vpack.c.bf16 %v614_v23, %v613_v21  ;;  %v4762_v26 = vadd.f32 %v4761_v24, %v4760_v20  ;;  %v595_v27 = vadd.f32 %v4945_v48, %v498_v22 }
 0x123   :  { %v501_v28 = vadd.f32 %v4762_v26, %v6016_v13  ;;  %895 = vmatmul.mubr.bf16.gmra.mxu1 %v623_v25  ;;  %4975 = vmatprep.mubr.bf16.mxu0 %v623_v25  ;;  %v615_v30 = vmax.f32 %v595_v27, 0.0  ;;  %v659_v13 = vlaneseq }
 0x124   :  { %904 = vmatprep.mubr.bf16.mxu1 %v5711_v7 }
 0x125   :  { %v598_v29 = vadd.f32 %v4946_v4, %v501_v28 }
 0x127   :  { %v616_v31 = vmax.f32 %v598_v29, 0.0 }
 0x129   :  { %v624_v32 = vpack.c.bf16 %v616_v31, %v615_v30 }
 0x12b   :  { %905 = vmatmul.mubr.bf16.gmra.mxu1 %v624_v32  ;;  %4976 = vmatmul.mubr.bf16.gmra.mxu0 %v624_v32 }
 0x12c   :  { %4995 = vmatprep.mubr.bf16.mxu1 %v6023_v35  ;;  %1269 = vmatprep.mubr.bf16.mxu0 %v5711_v7 }
 0x133   :  { %1270 = vmatmul.mubr.bf16.vlgmr.msra.gmra.mxu0 %v6023_v35  ;;  %4996 = vmatmul.mubr.bf16.vlgmr.msra.gmra.mxu1 %v6039_v53  ;;  %v6151_v35 = vshrl.u32 %v659_v13, 7 }
 0x134   :  { %4999 = vmatprep.mubr.bf16.mxu1 %v6066_v11  ;;  %1279 = vmatprep.mubr.bf16.mxu0 %v5711_v7 }
 0x135   :  { %v669_v38 = vsub.s32 2, %v6151_v35 }
 0x13b   :  { %1280 = vmatmul.mubr.bf16.gmra.mxu0 %v6039_v53  ;;  %5000 = vmatmul.mubr.bf16.gmra.mxu1 %v6092_v33  ;;  %v661_v53 = vsub.s32 0, %v6151_v35 }
 0x13c   :  { %5003 = vmatprep.mubr.bf16.mxu1 %v6114_v55  ;;  %1289 = vmatprep.mubr.bf16.mxu0 %v5711_v7 }
 0x143   :  { %1290 = vmatmul.mubr.bf16.gmra.mxu0 %v6066_v11  ;;  %5004 = vmatmul.mubr.bf16.gmra.mxu1 %v622_v9  ;;  %v657_v11 = vld [vmem:[%s7329_s7] sm:$0x7] }
 0x144   :  { %5007 = vmatprep.mubr.bf16.mxu1 %v623_v25  ;;  %1299 = vmatprep.mubr.bf16.mxu0 %v5711_v7  ;;  %v6160_v34 = vrot.slane %v657_v11, %v661_v53  ;;  %v6172_v43 = vrot.slane %v657_v11, %v669_v38 }
 0x14b   :  { %1300 = vmatmul.mubr.bf16.gmra.mxu0 %v6092_v33  ;;  %5008 = vmatmul.mubr.bf16.gmra.mxu1 %v624_v32  ;;  %v665_v33 = vsub.s32 1, %v6151_v35 }
 0x14c   :  { %1309 = vmatprep.mubr.bf16.mxu0 %v5711_v7 }
 0x14d   :  { %v6164_v36 = vrot.slane %v657_v11, %v665_v33 }
 0x153   :  { %1310 = vmatmul.mubr.bf16.gmra.mxu0 %v6114_v55 }
 0x154   :  { %1319 = vmatprep.mubr.bf16.mxu0 %v5711_v7 }
 0x15b   :  { %1320 = vmatmul.mubr.bf16.gmra.mxu0 %v622_v9 }
 0x15c   :  { %1329 = vmatprep.mubr.bf16.mxu0 %v5711_v7 }
 0x163   :  { %1330 = vmatmul.mubr.bf16.gmra.mxu0 %v623_v25 }
 0x164   :  { %1339 = vmatprep.mubr.bf16.mxu0 %v5711_v7 }
 0x16b   :  { %1340 = vmatmul.mubr.bf16.gmra.mxu0 %v624_v32 }
 0x1b3   :  { %v836_v7 = vpop.f32.mrf.mxu1 }
 0x1b4   :  { %v837_v37 = vadd.f32 %v836_v7, %v6160_v34 }
 0x1b5   :  { %v838_v39 = vpop.f32.mrf.mxu1 }
 0x1b6   :  { %1012 = vst [vmem:[#allocation2] sm:$0xff] %v837_v37  ;;  %v839_v40 = vadd.f32 %v838_v39, %v6164_v36 }
 0x1b7   :  { %v840_v41 = vpop.f32.mrf.mxu1 }
 0x1b8   :  { %1013 = vst [vmem:[#allocation2 + $0x8] sm:$0xff] %v839_v40  ;;  %v841_v42 = vadd.f32 %v840_v41, %v6160_v34 }
 0x1b9   :  { %v842_v44 = vpop.f32.mrf.mxu1 }
 0x1ba   :  { %1015 = vst [vmem:[#allocation2 + $0x18] sm:$0xff] %v841_v42  ;;  %v843_v45 = vadd.f32 %v842_v44, %v6164_v36 }
 0x1bb   :  { %v846_v46 = vpop.f32.mrf.mxu1  ;;  %v4965_v47 = vpop.f32.mrf.mxu0 }
 0x1bc   :  { %1016 = vst [vmem:[#allocation2 + $0x20] sm:$0xff] %v843_v45  ;;  %v847_v48 = vadd.f32 %v846_v46, %v6160_v34  ;;  %v958_v49 = vadd.f32 %v4965_v47, %v6172_v43 }
 0x1bd   :  { %v848_v50 = vpop.f32.mrf.mxu1  ;;  %v949_v51 = vpop.f32.mrf.mxu0 }
 0x1be   :  { %1018 = vst [vmem:[#allocation2 + $0x30] sm:$0xff] %v847_v48  ;;  %1020 = vst [vmem:[#allocation2 + $0x40] sm:$0xff] %v958_v49  ;;  %v849_v52 = vadd.f32 %v848_v50, %v6164_v36  ;;  %v950_v54 = vadd.f32 %v949_v51, %v6172_v43 }
 0x1bf   :  { %v850_v55 = vpop.f32.mrf.mxu1  ;;  %v4966_v56 = vpop.f32.mrf.mxu0 }
 0x1c0   :  { %1019 = vst [vmem:[#allocation2 + $0x38] sm:$0xff] %v849_v52  ;;  %1014 = vst [vmem:[#allocation2 + $0x10] sm:$0xff] %v950_v54  ;;  %v851_v57 = vadd.f32 %v850_v55, %v6160_v34  ;;  %v961_v58 = vadd.f32 %v4966_v56, %v6172_v43 }
 0x1c1   :  { %v852_v59 = vpop.f32.mrf.mxu1  ;;  %v952_v60 = vpop.f32.mrf.mxu0 }
 0x1c2   :  { %1021 = vst [vmem:[#allocation2 + $0x48] sm:$0xff] %v851_v57  ;;  %1023 = vst [vmem:[#allocation2 + $0x58] sm:$0xff] %v961_v58  ;;  %v853_v61 = vadd.f32 %v852_v59, %v6164_v36  ;;  %v953_v62 = vadd.f32 %v952_v60, %v6172_v43 }
 0x1c3   :  { %v856_v63 = vpop.f32.mrf.mxu1 }
 0x1c4   :  { %1022 = vst [vmem:[#allocation2 + $0x50] sm:$0xff] %v853_v61  ;;  %1017 = vst [vmem:[#allocation2 + $0x28] sm:$0xff] %v953_v62  ;;  %v857_v0 = vadd.f32 %v856_v63, %v6160_v34 }
 0x1c5   :  { %v858_v1 = vpop.f32.mrf.mxu1 }
 0x1c6   :  { %1024 = vst [vmem:[#allocation2 + $0x60] sm:$0xff] %v857_v0  ;;  %v859_v2 = vadd.f32 %v858_v1, %v6164_v36 }
 0x1c7   :  { %v860_v4 = vpop.f32.mrf.mxu1 }
 0x1c8   :  { %1025 = vst [vmem:[#allocation2 + $0x68] sm:$0xff] %v859_v2  ;;  %v861_v3 = vadd.f32 %v860_v4, %v6160_v34 }
 0x1c9   :  { %v862_v5 = vpop.f32.mrf.mxu1 }
 0x1ca   :  { %1027 = vst [vmem:[#allocation2 + $0x78] sm:$0xff] %v861_v3  ;;  %v863_v6 = vadd.f32 %v862_v5, %v6164_v36  ;;  %v1092_v3 = vld [vmem:[%s7330_s8] sm:$0x7]  ;;  %s6290_s8 = smov 0  }
 0x1cb   :  { %v866_v8 = vpop.f32.mrf.mxu1  ;;  %v4969_v9 = vpop.f32.mrf.mxu0 }
 0x1cc   :  { %1028 = vst [vmem:[#allocation2 + $0x80] sm:$0xff] %v863_v6  ;;  %v867_v10 = vadd.f32 %v866_v8, %v6160_v34  ;;  %v974_v12 = vadd.f32 %v4969_v9, %v6172_v43 }
 0x1cd   :  { %v868_v14 = vpop.f32.mrf.mxu1  ;;  %v965_v15 = vpop.f32.mrf.mxu0 }
 0x1ce   :  { %1030 = vst [vmem:[#allocation2 + $0x90] sm:$0xff] %v867_v10  ;;  %1032 = vst [vmem:[#allocation2 + $0xa0] sm:$0xff] %v974_v12  ;;  %v869_v16 = vadd.f32 %v868_v14, %v6164_v36  ;;  %v966_v17 = vadd.f32 %v965_v15, %v6172_v43  ;;  %v6222_v14 = vrot.slane %v1092_v3, %v661_v53 }
 0x1cf   :  { %v870_v18 = vpop.f32.mrf.mxu1  ;;  %v4970_v19 = vpop.f32.mrf.mxu0  ;;  %v6226_v15 = vrot.slane %v1092_v3, %v669_v38 }
 0x1d0   :  { %1031 = vst [vmem:[#allocation2 + $0x98] sm:$0xff] %v869_v16  ;;  %1026 = vst [vmem:[#allocation2 + $0x70] sm:$0xff] %v966_v17  ;;  %v871_v20 = vadd.f32 %v870_v18, %v6160_v34  ;;  %v977_v21 = vadd.f32 %v4970_v19, %v6172_v43 }
 0x1d1   :  { %v872_v22 = vpop.f32.mrf.mxu1  ;;  %v968_v23 = vpop.f32.mrf.mxu0 }
 0x1d2   :  { %1033 = vst [vmem:[#allocation2 + $0xa8] sm:$0xff] %v871_v20  ;;  %1035 = vst [vmem:[#allocation2 + $0xb8] sm:$0xff] %v977_v21  ;;  %v873_v24 = vadd.f32 %v872_v22, %v6164_v36  ;;  %v969_v25 = vadd.f32 %v968_v23, %v6172_v43 }
 0x1d3   :  { %v876_v26 = vpop.f32.mrf.mxu1 }
 0x1d4   :  { %1034 = vst [vmem:[#allocation2 + $0xb0] sm:$0xff] %v873_v24  ;;  %1029 = vst [vmem:[#allocation2 + $0x88] sm:$0xff] %v969_v25  ;;  %v877_v27 = vadd.f32 %v876_v26, %v6160_v34 }
 0x1d5   :  { %v878_v28 = vpop.f32.mrf.mxu1 }
 0x1d6   :  { %1036 = vst [vmem:[#allocation2 + $0xc0] sm:$0xff] %v877_v27  ;;  %v879_v29 = vadd.f32 %v878_v28, %v6164_v36 }
 0x1d7   :  { %v880_v30 = vpop.f32.mrf.mxu1 }
 0x1d8   :  { %1037 = vst [vmem:[#allocation2 + $0xc8] sm:$0xff] %v879_v29  ;;  %v881_v31 = vadd.f32 %v880_v30, %v6160_v34 }
 0x1d9   :  { %v882_v32 = vpop.f32.mrf.mxu1 }
 0x1da   :  { %1039 = vst [vmem:[#allocation2 + $0xd8] sm:$0xff] %v881_v31  ;;  %v883_v13 = vadd.f32 %v882_v32, %v6164_v36 }
 0x1db   :  { %v886_v11 = vpop.f32.mrf.mxu1  ;;  %v4973_v7 = vpop.f32.mrf.mxu0 }
 0x1dc   :  { %1040 = vst [vmem:[#allocation2 + $0xe0] sm:$0xff] %v883_v13  ;;  %v887_v37 = vadd.f32 %v886_v11, %v6160_v34  ;;  %v990_v39 = vadd.f32 %v4973_v7, %v6172_v43 }
 0x1dd   :  { %v888_v40 = vpop.f32.mrf.mxu1  ;;  %v981_v41 = vpop.f32.mrf.mxu0 }
 0x1de   :  { %1042 = vst [vmem:[#allocation2 + $0xf0] sm:$0xff] %v887_v37  ;;  %1044 = vst [vmem:[#allocation2 + $0x100] sm:$0xff] %v990_v39  ;;  %v889_v42 = vadd.f32 %v888_v40, %v6164_v36  ;;  %v982_v44 = vadd.f32 %v981_v41, %v6172_v43 }
 0x1df   :  { %v890_v45 = vpop.f32.mrf.mxu1  ;;  %v4974_v46 = vpop.f32.mrf.mxu0 }
 0x1e0   :  { %1043 = vst [vmem:[#allocation2 + $0xf8] sm:$0xff] %v889_v42  ;;  %1038 = vst [vmem:[#allocation2 + $0xd0] sm:$0xff] %v982_v44  ;;  %v891_v47 = vadd.f32 %v890_v45, %v6160_v34  ;;  %v993_v48 = vadd.f32 %v4974_v46, %v6172_v43 }
 0x1e1   :  { %v892_v49 = vpop.f32.mrf.mxu1  ;;  %v984_v50 = vpop.f32.mrf.mxu0 }
 0x1e2   :  { %1045 = vst [vmem:[#allocation2 + $0x108] sm:$0xff] %v891_v47  ;;  %1047 = vst [vmem:[#allocation2 + $0x118] sm:$0xff] %v993_v48  ;;  %v893_v51 = vadd.f32 %v892_v49, %v6164_v36  ;;  %v985_v52 = vadd.f32 %v984_v50, %v6172_v43 }
 0x1e3   :  { %v896_v54 = vpop.f32.mrf.mxu1 }
 0x1e4   :  { %1046 = vst [vmem:[#allocation2 + $0x110] sm:$0xff] %v893_v51  ;;  %1041 = vst [vmem:[#allocation2 + $0xe8] sm:$0xff] %v985_v52  ;;  %v897_v55 = vadd.f32 %v896_v54, %v6160_v34 }
 0x1e5   :  { %v898_v56 = vpop.f32.mrf.mxu1 }
 0x1e6   :  { %1048 = vst [vmem:[#allocation2 + $0x120] sm:$0xff] %v897_v55  ;;  %v899_v57 = vadd.f32 %v898_v56, %v6164_v36 }
 0x1e7   :  { %v900_v58 = vpop.f32.mrf.mxu1 }
 0x1e8   :  { %1049 = vst [vmem:[#allocation2 + $0x128] sm:$0xff] %v899_v57  ;;  %v901_v59 = vadd.f32 %v900_v58, %v6160_v34 }
 0x1e9   :  { %v902_v60 = vpop.f32.mrf.mxu1 }
 0x1ea   :  { %1051 = vst [vmem:[#allocation2 + $0x138] sm:$0xff] %v901_v59  ;;  %v903_v61 = vadd.f32 %v902_v60, %v6164_v36 }
 0x1eb   :  { %v906_v62 = vpop.f32.mrf.mxu1  ;;  %v4977_v63 = vpop.f32.mrf.mxu0 }
 0x1ec   :  { %1052 = vst [vmem:[#allocation2 + $0x140] sm:$0xff] %v903_v61  ;;  %v907_v0 = vadd.f32 %v906_v62, %v6160_v34  ;;  %v1006_v1 = vadd.f32 %v4977_v63, %v6172_v43 }
 0x1ed   :  { %v908_v2 = vpop.f32.mrf.mxu1  ;;  %v997_v4 = vpop.f32.mrf.mxu0 }
 0x1ee   :  { %1054 = vst [vmem:[#allocation2 + $0x150] sm:$0xff] %v907_v0  ;;  %1056 = vst [vmem:[#allocation2 + $0x160] sm:$0xff] %v1006_v1  ;;  %v909_v5 = vadd.f32 %v908_v2, %v6164_v36  ;;  %v998_v6 = vadd.f32 %v997_v4, %v6172_v43 }
 0x1ef   :  { %v910_v8 = vpop.f32.mrf.mxu1  ;;  %v4978_v9 = vpop.f32.mrf.mxu0 }
 0x1f0   :  { %1055 = vst [vmem:[#allocation2 + $0x158] sm:$0xff] %v909_v5  ;;  %1050 = vst [vmem:[#allocation2 + $0x130] sm:$0xff] %v998_v6  ;;  %v911_v10 = vadd.f32 %v910_v8, %v6160_v34  ;;  %v1009_v12 = vadd.f32 %v4978_v9, %v6172_v43  ;;  %v6232_v34 = vrot.slane %v1092_v3, %v665_v33 }
 0x1f1   :  { %v912_v16 = vpop.f32.mrf.mxu1  ;;  %v1000_v17 = vpop.f32.mrf.mxu0 }
 0x1f2   :  { %1057 = vst [vmem:[#allocation2 + $0x168] sm:$0xff] %v911_v10  ;;  %1059 = vst [vmem:[#allocation2 + $0x178] sm:$0xff] %v1009_v12  ;;  %v913_v18 = vadd.f32 %v912_v16, %v6164_v36  ;;  %v1001_v19 = vadd.f32 %v1000_v17, %v6172_v43 }
 0x1f3   :  { %v1271_v20 = vpop.f32.mrf.mxu0  ;;  %v4997_v21 = vpop.f32.mrf.mxu1 }
 0x1f4   :  { %1058 = vst [vmem:[#allocation2 + $0x170] sm:$0xff] %v913_v18  ;;  %1053 = vst [vmem:[#allocation2 + $0x148] sm:$0xff] %v1001_v19  ;;  %v1272_v53 = vadd.f32 %v1271_v20, %v6222_v14  ;;  %v1393_v38 = vadd.f32 %v4997_v21, %v6226_v15 }
 0x1f5   :  { %v1273_v22 = vpop.f32.mrf.mxu0  ;;  %v1384_v23 = vpop.f32.mrf.mxu1 }
 0x1f6   :  { %1447 = vst [vmem:[#allocation3] sm:$0xff] %v1272_v53  ;;  %1455 = vst [vmem:[#allocation3 + $0x40] sm:$0xff] %v1393_v38  ;;  %v1274_v36 = vadd.f32 %v1273_v22, %v6232_v34  ;;  %v1385_v43 = vadd.f32 %v1384_v23, %v6226_v15 }
 0x1f7   :  { %v1275_v24 = vpop.f32.mrf.mxu0  ;;  %v4998_v35 = vpop.f32.mrf.mxu1 }
 0x1f8   :  { %1448 = vst [vmem:[#allocation3 + $0x8] sm:$0xff] %v1274_v36  ;;  %1449 = vst [vmem:[#allocation3 + $0x10] sm:$0xff] %v1385_v43  ;;  %v1276_v33 = vadd.f32 %v1275_v24, %v6222_v14  ;;  %v1396_v25 = vadd.f32 %v4998_v35, %v6226_v15 }
 0x1f9   :  { %v1277_v26 = vpop.f32.mrf.mxu0  ;;  %v1387_v27 = vpop.f32.mrf.mxu1 }
 0x1fa   :  { %1450 = vst [vmem:[#allocation3 + $0x18] sm:$0xff] %v1276_v33  ;;  %1458 = vst [vmem:[#allocation3 + $0x58] sm:$0xff] %v1396_v25  ;;  %v1278_v28 = vadd.f32 %v1277_v26, %v6232_v34  ;;  %v1388_v29 = vadd.f32 %v1387_v27, %v6226_v15 }
 0x1fb   :  { %v1281_v30 = vpop.f32.mrf.mxu0  ;;  %v5001_v31 = vpop.f32.mrf.mxu1 }
 0x1fc   :  { %1451 = vst [vmem:[#allocation3 + $0x20] sm:$0xff] %v1278_v28  ;;  %1452 = vst [vmem:[#allocation3 + $0x28] sm:$0xff] %v1388_v29  ;;  %v1282_v32 = vadd.f32 %v1281_v30, %v6222_v14  ;;  %v1409_v13 = vadd.f32 %v5001_v31, %v6226_v15 }
 0x1fd   :  { %v1283_v11 = vpop.f32.mrf.mxu0  ;;  %v1400_v7 = vpop.f32.mrf.mxu1 }
 0x1fe   :  { %1453 = vst [vmem:[#allocation3 + $0x30] sm:$0xff] %v1282_v32  ;;  %1467 = vst [vmem:[#allocation3 + $0xa0] sm:$0xff] %v1409_v13  ;;  %v1284_v37 = vadd.f32 %v1283_v11, %v6232_v34  ;;  %v1401_v39 = vadd.f32 %v1400_v7, %v6226_v15 }
 0x1ff   :  { %v1285_v40 = vpop.f32.mrf.mxu0  ;;  %v5002_v41 = vpop.f32.mrf.mxu1 }
 0x200   :  { %1454 = vst [vmem:[#allocation3 + $0x38] sm:$0xff] %v1284_v37  ;;  %1461 = vst [vmem:[#allocation3 + $0x70] sm:$0xff] %v1401_v39  ;;  %v1286_v42 = vadd.f32 %v1285_v40, %v6222_v14  ;;  %v1412_v44 = vadd.f32 %v5002_v41, %v6226_v15 }
 0x201   :  { %v1287_v45 = vpop.f32.mrf.mxu0  ;;  %v1403_v46 = vpop.f32.mrf.mxu1 }
 0x202   :  { %1456 = vst [vmem:[#allocation3 + $0x48] sm:$0xff] %v1286_v42  ;;  %1470 = vst [vmem:[#allocation3 + $0xb8] sm:$0xff] %v1412_v44  ;;  %v1288_v47 = vadd.f32 %v1287_v45, %v6232_v34  ;;  %v1404_v48 = vadd.f32 %v1403_v46, %v6226_v15 }
 0x203   :  { %v1291_v49 = vpop.f32.mrf.mxu0  ;;  %v5005_v50 = vpop.f32.mrf.mxu1 }
 0x204   :  { %1457 = vst [vmem:[#allocation3 + $0x50] sm:$0xff] %v1288_v47  ;;  %1464 = vst [vmem:[#allocation3 + $0x88] sm:$0xff] %v1404_v48  ;;  %v1292_v51 = vadd.f32 %v1291_v49, %v6222_v14  ;;  %v1425_v52 = vadd.f32 %v5005_v50, %v6226_v15 }
 0x205   :  { %v1293_v54 = vpop.f32.mrf.mxu0  ;;  %v1416_v55 = vpop.f32.mrf.mxu1 }
 0x206   :  { %1459 = vst [vmem:[#allocation3 + $0x60] sm:$0xff] %v1292_v51  ;;  %1479 = vst [vmem:[#allocation3 + $0x100] sm:$0xff] %v1425_v52  ;;  %v1294_v56 = vadd.f32 %v1293_v54, %v6232_v34  ;;  %v1417_v57 = vadd.f32 %v1416_v55, %v6226_v15  ;;  %v6282_v51 = vmov 0   ;;  %v6284_v52 = vmov 0  }
 0x207   :  { %v1295_v58 = vpop.f32.mrf.mxu0  ;;  %v5006_v59 = vpop.f32.mrf.mxu1  ;;  %v6286_v54 = vmov 0.0   ;;  %v6288_v55 = vmov 0.0  }
 0x208   :  { %1460 = vst [vmem:[#allocation3 + $0x68] sm:$0xff] %v1294_v56  ;;  %1473 = vst [vmem:[#allocation3 + $0xd0] sm:$0xff] %v1417_v57  ;;  %v1296_v60 = vadd.f32 %v1295_v58, %v6222_v14  ;;  %v1428_v61 = vadd.f32 %v5006_v59, %v6226_v15 }
 0x209   :  { %v1297_v62 = vpop.f32.mrf.mxu0  ;;  %v1419_v63 = vpop.f32.mrf.mxu1 }
 0x20a   :  { %1462 = vst [vmem:[#allocation3 + $0x78] sm:$0xff] %v1296_v60  ;;  %1482 = vst [vmem:[#allocation3 + $0x118] sm:$0xff] %v1428_v61  ;;  %v1298_v0 = vadd.f32 %v1297_v62, %v6232_v34  ;;  %v1420_v1 = vadd.f32 %v1419_v63, %v6226_v15 }
 0x20b   :  { %v1301_v2 = vpop.f32.mrf.mxu0  ;;  %v5009_v4 = vpop.f32.mrf.mxu1 }
 0x20c   :  { %1463 = vst [vmem:[#allocation3 + $0x80] sm:$0xff] %v1298_v0  ;;  %1476 = vst [vmem:[#allocation3 + $0xe8] sm:$0xff] %v1420_v1  ;;  %v1302_v3 = vadd.f32 %v1301_v2, %v6222_v14  ;;  %v1441_v5 = vadd.f32 %v5009_v4, %v6226_v15 }
 0x20d   :  { %v1303_v6 = vpop.f32.mrf.mxu0  ;;  %v1432_v8 = vpop.f32.mrf.mxu1 }
 0x20e   :  { %1465 = vst [vmem:[#allocation3 + $0x90] sm:$0xff] %v1302_v3  ;;  %1491 = vst [vmem:[#allocation3 + $0x160] sm:$0xff] %v1441_v5  ;;  %v1304_v9 = vadd.f32 %v1303_v6, %v6232_v34  ;;  %v1433_v10 = vadd.f32 %v1432_v8, %v6226_v15 }
 0x20f   :  { %v1305_v12 = vpop.f32.mrf.mxu0  ;;  %v5010_v16 = vpop.f32.mrf.mxu1 }
 0x210   :  { %1466 = vst [vmem:[#allocation3 + $0x98] sm:$0xff] %v1304_v9  ;;  %1485 = vst [vmem:[#allocation3 + $0x130] sm:$0xff] %v1433_v10  ;;  %v1306_v17 = vadd.f32 %v1305_v12, %v6222_v14  ;;  %v1444_v18 = vadd.f32 %v5010_v16, %v6226_v15 }
 0x211   :  { %v1307_v19 = vpop.f32.mrf.mxu0  ;;  %v1435_v20 = vpop.f32.mrf.mxu1 }
 0x212   :  { %1468 = vst [vmem:[#allocation3 + $0xa8] sm:$0xff] %v1306_v17  ;;  %1494 = vst [vmem:[#allocation3 + $0x178] sm:$0xff] %v1444_v18  ;;  %v1308_v21 = vadd.f32 %v1307_v19, %v6232_v34  ;;  %v1436_v53 = vadd.f32 %v1435_v20, %v6226_v15 }
 0x213   :  { %v1311_v38 = vpop.f32.mrf.mxu0 }
 0x214   :  { %1469 = vst [vmem:[#allocation3 + $0xb0] sm:$0xff] %v1308_v21  ;;  %1488 = vst [vmem:[#allocation3 + $0x148] sm:$0xff] %v1436_v53  ;;  %v1312_v22 = vadd.f32 %v1311_v38, %v6222_v14 }
 0x215   :  { %v1313_v23 = vpop.f32.mrf.mxu0 }
 0x216   :  { %1471 = vst [vmem:[#allocation3 + $0xc0] sm:$0xff] %v1312_v22  ;;  %v1314_v36 = vadd.f32 %v1313_v23, %v6232_v34 }
 0x217   :  { %v1315_v43 = vpop.f32.mrf.mxu0 }
 0x218   :  { %1472 = vst [vmem:[#allocation3 + $0xc8] sm:$0xff] %v1314_v36  ;;  %v1316_v24 = vadd.f32 %v1315_v43, %v6222_v14 }
 0x219   :  { %v1317_v35 = vpop.f32.mrf.mxu0 }
 0x21a   :  { %1474 = vst [vmem:[#allocation3 + $0xd8] sm:$0xff] %v1316_v24  ;;  %v1318_v33 = vadd.f32 %v1317_v35, %v6232_v34 }
 0x21b   :  { %v1321_v25 = vpop.f32.mrf.mxu0 }
 0x21c   :  { %1475 = vst [vmem:[#allocation3 + $0xe0] sm:$0xff] %v1318_v33  ;;  %v1322_v15 = vadd.f32 %v1321_v25, %v6222_v14 }
 0x21d   :  { %v1323_v26 = vpop.f32.mrf.mxu0 }
 0x21e   :  { %1477 = vst [vmem:[#allocation3 + $0xf0] sm:$0xff] %v1322_v15  ;;  %v1324_v27 = vadd.f32 %v1323_v26, %v6232_v34 }
 0x21f   :  { %v1325_v28 = vpop.f32.mrf.mxu0 }
 0x220   :  { %1478 = vst [vmem:[#allocation3 + $0xf8] sm:$0xff] %v1324_v27  ;;  %v1326_v29 = vadd.f32 %v1325_v28, %v6222_v14 }
 0x221   :  { %v1327_v30 = vpop.f32.mrf.mxu0 }
 0x222   :  { %1480 = vst [vmem:[#allocation3 + $0x108] sm:$0xff] %v1326_v29  ;;  %v1328_v31 = vadd.f32 %v1327_v30, %v6232_v34 }
 0x223   :  { %v1331_v32 = vpop.f32.mrf.mxu0 }
 0x224   :  { %1481 = vst [vmem:[#allocation3 + $0x110] sm:$0xff] %v1328_v31  ;;  %v1332_v13 = vadd.f32 %v1331_v32, %v6222_v14 }
 0x225   :  { %v1333_v11 = vpop.f32.mrf.mxu0 }
 0x226   :  { %1483 = vst [vmem:[#allocation3 + $0x120] sm:$0xff] %v1332_v13  ;;  %v1334_v7 = vadd.f32 %v1333_v11, %v6232_v34 }
 0x227   :  { %v1335_v37 = vpop.f32.mrf.mxu0 }
 0x228   :  { %1484 = vst [vmem:[#allocation3 + $0x128] sm:$0xff] %v1334_v7  ;;  %v1336_v39 = vadd.f32 %v1335_v37, %v6222_v14 }
 0x229   :  { %v1337_v40 = vpop.f32.mrf.mxu0 }
 0x22a   :  { %1486 = vst [vmem:[#allocation3 + $0x138] sm:$0xff] %v1336_v39  ;;  %v1338_v41 = vadd.f32 %v1337_v40, %v6232_v34 }
 0x22b   :  { %v1341_v42 = vpop.f32.mrf.mxu0 }
 0x22c   :  { %1487 = vst [vmem:[#allocation3 + $0x140] sm:$0xff] %v1338_v41  ;;  %v1342_v44 = vadd.f32 %v1341_v42, %v6222_v14 }
 0x22d   :  { %v1343_v45 = vpop.f32.mrf.mxu0 }
 0x22e   :  { %1489 = vst [vmem:[#allocation3 + $0x150] sm:$0xff] %v1342_v44  ;;  %v1344_v46 = vadd.f32 %v1343_v45, %v6232_v34 }
 0x22f   :  { %v1345_v47 = vpop.f32.mrf.mxu0 }
 0x230   :  { %1490 = vst [vmem:[#allocation3 + $0x158] sm:$0xff] %v1344_v46  ;;  %v1346_v48 = vadd.f32 %v1345_v47, %v6222_v14 }
 0x231   :  { %v1347_v49 = vpop.f32.mrf.mxu0 }
 0x232   :  { %1492 = vst [vmem:[#allocation3 + $0x168] sm:$0xff] %v1346_v48  ;;  %v1348_v50 = vadd.f32 %v1347_v49, %v6232_v34 }
 0x234   :  { %1493 = vst [vmem:[#allocation3 + $0x170] sm:$0xff] %v1348_v50 }
 0x235 LB: > { %v6310_v14 = vld [vmem:[%s7317_s5 + $0xac] ss:$12 sps:$4 sm:$0xff]   ;;  %v6315_v34 = vld [vmem:[%s7317_s5 + $0xa8] ss:$12 sps:$4 sm:$0xff]   ;;  %v5712_v56 = vmov 0.0   ;;  %v5713_v57 = vmov 0   ;;  %s5709_s8 = sphi %s6290_s8, %s1500_s8   ;;  %v5705_v55 = vphi %v6288_v55, %v3732_v55   ;;  %v5701_v54 = vphi %v6286_v54, %v3760_v54   ;;  %v5697_v52 = vphi %v6284_v52, %v3761_v52   ;;  %v5693_v51 = vphi %v6282_v51, %v3762_v51  }
 0x236   : > { %5011 = vmatprep.subr.bf16.mxu1 %v5712_v56  ;;  %1717 = vmatprep.mubr.bf16.mxu0 %v5713_v57  ;;  %v6323_v58 = vld [vmem:[%s7317_s5 + $0x94] ss:$12 sps:$4 sm:$0xff]   ;;  %vm5714_vm0 = vmmov 0   ;;  %v6331_v59 = vld [vmem:[%s7317_s5 + $0x90] ss:$12 sps:$4 sm:$0xff]   ;;  %s6627_s17 = sshll.u32 %s5709_s8, 5 }
 0x237   : > { %1685 = vmatprep.subr.bf16.mxu0 %v6310_v14  ;;  %5027 = vmatprep.mubr.msk.bf16.mxu1 %vm5714_vm0, %v5712_v56  ;;  %v6337_v60 = vld [vmem:[%s7317_s5 + $0x7c] ss:$12 sps:$4 sm:$0xff]   ;;  %v6343_v61 = vld [vmem:[%s7317_s5 + $0x78] ss:$12 sps:$4 sm:$0xff]   ;;  %v6358_v0 = vld [vmem:[%s7317_s5 + $0x60] ss:$12 sps:$4 sm:$0xff]  }
 0x238   : > { %1686 = vmatpush1.bf16.msra.mxu0 %v6315_v34  ;;  %v6349_v62 = vld [vmem:[%s7317_s5 + $0x64] ss:$12 sps:$4 sm:$0xff]   ;;  %v6363_v1 = vld [vmem:[%s7317_s5 + $0x4c] ss:$12 sps:$4 sm:$0xff]   ;;  %v6373_v4 = vld [vmem:[%s7317_s5 + $0x48] ss:$12 sps:$4 sm:$0xff]  }
 0x239   : > { %1687 = vmatprep.subr.bf16.mxu0 %v6323_v58  ;;  %v5420_v63 = vld [vmem:[%s7317_s5 + $0xb0] ss:$12 sps:$4 sm:$0xff]   ;;  %v5424_v2 = vld [vmem:[%s7317_s5 + $0x98] ss:$12 sps:$4 sm:$0xff]   ;;  %v6379_v3 = vld [vmem:[%s7317_s5 + $0x34] ss:$12 sps:$4 sm:$0xff]  }
 0x23a   : > { %5012 = vmatpush3.bf16.msra.mxu1 %v5420_v63  ;;  %v5428_v5 = vld [vmem:[%s7317_s5 + $0x80] ss:$12 sps:$4 sm:$0xff]   ;;  %v6390_v6 = vld [vmem:[%s7317_s5 + $0x30] ss:$12 sps:$4 sm:$0xff]   ;;  %v5432_v9 = vld [vmem:[%s7317_s5 + $0x68] ss:$12 sps:$4 sm:$0xff]  }
 0x23b   : > { %5013 = vmatprep.subr.bf16.mxu1 %v5712_v56  ;;  %v6396_v8 = vld [vmem:[%s7317_s5 + $0x1c] ss:$12 sps:$4 sm:$0xff]   ;;  %v6405_v10 = vld [vmem:[%s7317_s5 + $0x18] ss:$12 sps:$4 sm:$0xff]   ;;  %v6422_v17 = vld [vmem:[%s7317_s5] ss:$12 sps:$4 sm:$0xff]  }
 0x23c   : > { %1688 = vmatpush1.bf16.msra.mxu0 %v6331_v59  ;;  %v6411_v12 = vld [vmem:[%s7317_s5 + $0x4] ss:$12 sps:$4 sm:$0xff]   ;;  %v6427_v18 = vld [vmem:[%s7318_s6 + $0xac] ss:$12 sps:$4 sm:$0xff]   ;;  %v6437_v20 = vld [vmem:[%s7318_s6 + $0xa8] ss:$12 sps:$4 sm:$0xff]  }
 0x23d   : > { %1689 = vmatprep.subr.bf16.mxu0 %v6337_v60  ;;  %v5436_v16 = vld [vmem:[%s7317_s5 + $0x50] ss:$12 sps:$4 sm:$0xff]   ;;  %v5440_v19 = vld [vmem:[%s7317_s5 + $0x38] ss:$12 sps:$4 sm:$0xff]   ;;  %v6443_v21 = vld [vmem:[%s7318_s6 + $0x94] ss:$12 sps:$4 sm:$0xff]  }
 0x23e   : > { %5014 = vmatpush3.bf16.msra.mxu1 %v5424_v2  ;;  %v5444_v53 = vld [vmem:[%s7317_s5 + $0x20] ss:$12 sps:$4 sm:$0xff]   ;;  %v6454_v38 = vld [vmem:[%s7318_s6 + $0x90] ss:$12 sps:$4 sm:$0xff]   ;;  %v5448_v23 = vld [vmem:[%s7317_s5 + $0x8] ss:$12 sps:$4 sm:$0xff]  }
 0x23f   : > { %5015 = vmatprep.subr.bf16.mxu1 %v5712_v56  ;;  %v6460_v22 = vld [vmem:[%s7318_s6 + $0x7c] ss:$12 sps:$4 sm:$0xff]   ;;  %v6470_v36 = vld [vmem:[%s7318_s6 + $0x78] ss:$12 sps:$4 sm:$0xff]   ;;  %v6486_v35 = vld [vmem:[%s7318_s6 + $0x60] ss:$12 sps:$4 sm:$0xff]  }
 0x240   : > { %1690 = vmatpush1.bf16.msra.mxu0 %v6343_v61  ;;  %v6476_v43 = vld [vmem:[%s7318_s6 + $0x64] ss:$12 sps:$4 sm:$0xff]   ;;  %v6492_v33 = vld [vmem:[%s7318_s6 + $0x4c] ss:$12 sps:$4 sm:$0xff]   ;;  %v6503_v15 = vld [vmem:[%s7318_s6 + $0x48] ss:$12 sps:$4 sm:$0xff]  }
 0x241   : > { %1691 = vmatprep.subr.bf16.mxu0 %v6349_v62  ;;  %v5452_v24 = vld [vmem:[%s7318_s6 + $0xb0] ss:$12 sps:$4 sm:$0xff]   ;;  %v5456_v25 = vld [vmem:[%s7318_s6 + $0x98] ss:$12 sps:$4 sm:$0xff]   ;;  %v6511_v26 = vld [vmem:[%s7318_s6 + $0x34] ss:$12 sps:$4 sm:$0xff]  }
 0x242   : > { %5016 = vmatpush3.bf16.msra.mxu1 %v5428_v5  ;;  %v5457_v27 = vld [vmem:[%s7318_s6 + $0x80] ss:$12 sps:$4 sm:$0xff]   ;;  %v6521_v28 = vld [vmem:[%s7318_s6 + $0x30] ss:$12 sps:$4 sm:$0xff]   ;;  %v5458_v30 = vld [vmem:[%s7318_s6 + $0x68] ss:$12 sps:$4 sm:$0xff]  }
 0x243   : > { %5017 = vmatprep.subr.bf16.mxu1 %v5712_v56  ;;  %v6527_v29 = vld [vmem:[%s7318_s6 + $0x1c] ss:$12 sps:$4 sm:$0xff]   ;;  %v6537_v31 = vld [vmem:[%s7318_s6 + $0x18] ss:$12 sps:$4 sm:$0xff]   ;;  %v6553_v11 = vld [vmem:[%s7318_s6] ss:$12 sps:$4 sm:$0xff]  }
 0x244   : > { %1692 = vmatpush1.bf16.msra.mxu0 %v6358_v0  ;;  %v6543_v32 = vld [vmem:[%s7318_s6 + $0x4] ss:$12 sps:$4 sm:$0xff]   ;;  %v5461_v37 = vld [vmem:[%s7318_s6 + $0x20] ss:$12 sps:$4 sm:$0xff]   ;;  %v5462_v39 = vld [vmem:[%s7318_s6 + $0x8] ss:$12 sps:$4 sm:$0xff]  }
 0x245   : > { %1693 = vmatprep.subr.bf16.mxu0 %v6363_v1  ;;  %v5459_v13 = vld [vmem:[%s7318_s6 + $0x50] ss:$12 sps:$4 sm:$0xff]   ;;  %v5460_v7 = vld [vmem:[%s7318_s6 + $0x38] ss:$12 sps:$4 sm:$0xff]   ;;  %v5465_v42 = vld [vmem:[%s7317_s5 + $0x80] ss:$12 sps:$4 sm:$0xff]  }
 0x246   : > { %5018 = vmatpush3.bf16.msra.mxu1 %v5432_v9  ;;  %v5463_v40 = vld [vmem:[%s7317_s5 + $0xb0] ss:$12 sps:$4 sm:$0xff]   ;;  %v5464_v41 = vld [vmem:[%s7317_s5 + $0x98] ss:$12 sps:$4 sm:$0xff]   ;;  %v5466_v44 = vld [vmem:[%s7317_s5 + $0x68] ss:$12 sps:$4 sm:$0xff]  }
 0x247   : > { %5019 = vmatprep.subr.bf16.mxu1 %v5712_v56  ;;  %v5467_v45 = vld [vmem:[%s7317_s5 + $0x50] ss:$12 sps:$4 sm:$0xff]   ;;  %v5468_v46 = vld [vmem:[%s7317_s5 + $0x38] ss:$12 sps:$4 sm:$0xff]   ;;  %v5469_v47 = vld [vmem:[%s7317_s5 + $0x20] ss:$12 sps:$4 sm:$0xff]  }
 0x248   : > { %1694 = vmatpush1.bf16.msra.mxu0 %v6373_v4  ;;  %v5470_v48 = vld [vmem:[%s7317_s5 + $0x8] ss:$12 sps:$4 sm:$0xff]   ;;  %s1509_s18 = sshra.s32 %s6627_s17, 3  ;;  %s6637_s0 = sshll.u32 %s5709_s8, 2 }
 0x249   : > { %1695 = vmatprep.subr.bf16.mxu0 %v6379_v3  ;;  %s4682_s19 = smul.u32 24, %s1509_s18  ;;  %s1507_s21 = ssub.s32 15, %s6637_s0 }
 0x24a   : > { %5020 = vmatpush3.bf16.msra.mxu1 %v5436_v16  ;;  %s6640_s22 = sshll.u32 %s1507_s21, 3  ;;  %s4467_s2 = sshll.u32 %s1509_s18, 2 }
 0x24b   : > { %5021 = vmatprep.subr.bf16.mxu1 %v5712_v56  ;;  %s6632_s20 = scalar_lea.vmem [#allocation2], %s4682_s19  ;;  %s1517_s1 = sshra.s32 %s6640_s22, 3 }
 0x24c   : > { %1696 = vmatpush1.bf16.msra.mxu0 %v6390_v6  ;;  %v1514_v49 = vld [vmem:[%s6632_s20] sm:$0xff]  ;;  %s4683_s23 = smul.u32 24, %s1517_s1  ;;  %s2066_s29 = scalar_lea.vmem [#allocation4], %s4467_s2 }
 0x24d   : > { %1697 = vmatprep.subr.bf16.mxu0 %v6396_v8  ;;  %s4468_s27 = sshll.u32 %s1517_s1, 2  ;;  %s4685_s15 = sadd.s32 8, %s6627_s17 }
 0x24e   : > { %5022 = vmatpush3.bf16.msra.mxu1 %v5440_v19  ;;  %s6650_s26 = scalar_lea.vmem [#allocation3], %s4683_s23  ;;  %s2069_s28 = scalar_lea.vmem [#allocation5], %s4468_s27 }
 0x24f   : > { %5023 = vmatprep.subr.bf16.mxu1 %v5712_v56  ;;  %s6855_s16 = sshra.s32 %s4685_s15, 3  ;;  %s1500_s8 = sadd.s32 1, %s5709_s8  }
 0x250   : > { %1698 = vmatpush1.bf16.msra.mxu0 %v6405_v10  ;;  %s4686_s18 = smul.u32 24, %s6855_s16  ;;  %p1497_p0 = scmp.ge.s32.totalorder %s1500_s8, 4  }
 0x251   : > { %1699 = vmatprep.subr.bf16.mxu0 %v6411_v12 }
 0x252   : > { %5024 = vmatpush3.bf16.msra.mxu1 %v5444_v53  ;;  %s6858_s19 = scalar_lea.vmem [#allocation2], %s4686_s18 }
 0x253   : > { %5025 = vmatprep.subr.bf16.mxu1 %v5712_v56 }
 0x254   : > { %1700 = vmatpush1.bf16.msra.mxu0 %v6422_v17 }
 0x255   : > { %1926 = vmatprep.subr.bf16.mxu0 %v6427_v18 }
 0x256   : > { %5026 = vmatpush3.bf16.msra.mxu1 %v5448_v23 }
 0x257   : > { %1718 = vmatmul.mubr.bf16.vlgmr.msra.gmra.mxu0 %v5697_v52  ;;  %5031 = vmatprep.subr.bf16.mxu1 %v5712_v56 }
 0x258   : > { %1927 = vmatpush1.bf16.msra.mxu0 %v6437_v20  ;;  %1958 = vmatprep.mubr.bf16.mxu0 %v5713_v57 }
 0x259   : > { %1928 = vmatprep.subr.bf16.mxu0 %v6443_v21  ;;  %5028 = vmatmul.mubr.bf16.vlgmr.msra.gmra.mxu1 %v5697_v52 }
 0x25a   : > { %5032 = vmatpush3.bf16.msra.mxu1 %v5452_v24  ;;  %5047 = vmatprep.mubr.msk.bf16.mxu1 %vm5714_vm0, %v5712_v56 }
 0x25b   : > { %5033 = vmatprep.subr.bf16.mxu1 %v5712_v56 }
 0x25c   : > { %1929 = vmatpush1.bf16.msra.mxu0 %v6454_v38 }
 0x25d   : > { %1930 = vmatprep.subr.bf16.mxu0 %v6460_v22 }
 0x25e   : > { %5034 = vmatpush3.bf16.msra.mxu1 %v5456_v25 }
 0x25f   : > { %5035 = vmatprep.subr.bf16.mxu1 %v5712_v56 }
 0x260   : > { %1931 = vmatpush1.bf16.msra.mxu0 %v6470_v36 }
 0x261   : > { %1932 = vmatprep.subr.bf16.mxu0 %v6476_v43 }
 0x262   : > { %5036 = vmatpush3.bf16.msra.mxu1 %v5457_v27 }
 0x263   : > { %5037 = vmatprep.subr.bf16.mxu1 %v5712_v56 }
 0x264   : > { %1933 = vmatpush1.bf16.msra.mxu0 %v6486_v35 }
 0x265   : > { %1934 = vmatprep.subr.bf16.mxu0 %v6492_v33 }
 0x266   : > { %5038 = vmatpush3.bf16.msra.mxu1 %v5458_v30 }
 0x267   : > { %5039 = vmatprep.subr.bf16.mxu1 %v5712_v56 }
 0x268   : > { %1935 = vmatpush1.bf16.msra.mxu0 %v6503_v15 }
 0x269   : > { %1936 = vmatprep.subr.bf16.mxu0 %v6511_v26 }
 0x26a   : > { %5040 = vmatpush3.bf16.msra.mxu1 %v5459_v13  ;;  %v1523_v13 = vld [vmem:[%s6650_s26 + $0x8] sm:$0xff] }
 0x26b   : > { %5041 = vmatprep.subr.bf16.mxu1 %v5712_v56 }
 0x26c   : > { %1937 = vmatpush1.bf16.msra.mxu0 %v6521_v28 }
 0x26d   : > { %1938 = vmatprep.subr.bf16.mxu0 %v6527_v29 }
 0x26e   : > { %5042 = vmatpush3.bf16.msra.mxu1 %v5460_v7 }
 0x26f   : > { %5043 = vmatprep.subr.bf16.mxu1 %v5712_v56 }
 0x270   : > { %1939 = vmatpush1.bf16.msra.mxu0 %v6537_v31 }
 0x271   : > { %1940 = vmatprep.subr.bf16.mxu0 %v6543_v32 }
 0x272   : > { %5044 = vmatpush3.bf16.msra.mxu1 %v5461_v37 }
 0x273   : > { %5045 = vmatprep.subr.bf16.mxu1 %v5712_v56 }
 0x274   : > { %1941 = vmatpush1.bf16.msra.mxu0 %v6553_v11 }
 0x275   : > { %2251 = vmatprep.subr.bf16.mxu0 %v6310_v14 }
 0x276   : > { %5046 = vmatpush3.bf16.msra.mxu1 %v5462_v39 }
 0x277   : > { %1959 = vmatmul.mubr.bf16.vlgmr.msra.gmra.mxu0 %v5693_v51  ;;  %5051 = vmatprep.subr.bf16.mxu1 %v5712_v56 }
 0x278   : > { %2252 = vmatpush1.bf16.msra.mxu0 %v6315_v34  ;;  %2283 = vmatprep.mubr.bf16.mxu0 %v5713_v57 }
 0x279   : > { %2253 = vmatprep.subr.bf16.mxu0 %v6323_v58  ;;  %5048 = vmatmul.mubr.bf16.vlgmr.msra.gmra.mxu1 %v5693_v51 }
 0x27a   : > { %5067 = vmatprep.mubr.msk.bf16.mxu1 %vm5714_vm0, %v5712_v56  ;;  %5052 = vmatpush3.bf16.msra.mxu1 %v5463_v40 }
 0x27b   : > { %5053 = vmatprep.subr.bf16.mxu1 %v5712_v56 }
 0x27c   : > { %2254 = vmatpush1.bf16.msra.mxu0 %v6331_v59 }
 0x27d   : > { %2255 = vmatprep.subr.bf16.mxu0 %v6337_v60 }
 0x27e   : > { %5054 = vmatpush3.bf16.msra.mxu1 %v5464_v41 }
 0x27f   : > { %5055 = vmatprep.subr.bf16.mxu1 %v5712_v56 }
 0x280   : > { %2256 = vmatpush1.bf16.msra.mxu0 %v6343_v61  ;;  %v1515_v61 = vld [vmem:[%s6632_s20 + $0x8] sm:$0xff] }
 0x281   : > { %2257 = vmatprep.subr.bf16.mxu0 %v6349_v62 }
 0x282   : > { %5056 = vmatpush3.bf16.msra.mxu1 %v5465_v42 }
 0x283   : > { %5057 = vmatprep.subr.bf16.mxu1 %v5712_v56 }
 0x284   : > { %2258 = vmatpush1.bf16.msra.mxu0 %v6358_v0 }
 0x285   : > { %2259 = vmatprep.subr.bf16.mxu0 %v6363_v1 }
 0x286   : > { %5058 = vmatpush3.bf16.msra.mxu1 %v5466_v44 }
 0x287   : > { %5059 = vmatprep.subr.bf16.mxu1 %v5712_v56 }
 0x288   : > { %2260 = vmatpush1.bf16.msra.mxu0 %v6373_v4 }
 0x289   : > { %2261 = vmatprep.subr.bf16.mxu0 %v6379_v3 }
 0x28a   : > { %5060 = vmatpush3.bf16.msra.mxu1 %v5467_v45 }
 0x28b   : > { %5061 = vmatprep.subr.bf16.mxu1 %v5712_v56 }
 0x28c   : > { %2262 = vmatpush1.bf16.msra.mxu0 %v6390_v6  ;;  %v6648_v6 = vld [vmem:[%s7319_s9] ss:$0 sm:$0xff] }
 0x28d   : > { %2263 = vmatprep.subr.bf16.mxu0 %v6396_v8  ;;  %v1522_v8 = vld [vmem:[%s6650_s26] sm:$0xff] }
 0x28e   : > { %5062 = vmatpush3.bf16.msra.mxu1 %v5468_v46 }
 0x28f   : > { %5063 = vmatprep.subr.bf16.mxu1 %v5712_v56 }
 0x290   : > { %2264 = vmatpush1.bf16.msra.mxu0 %v6405_v10 }
 0x291   : > { %2265 = vmatprep.subr.bf16.mxu0 %v6411_v12 }
 0x292   : > { %5064 = vmatpush3.bf16.msra.mxu1 %v5469_v47 }
 0x293   : > { %5065 = vmatprep.subr.bf16.mxu1 %v5712_v56 }
 0x294   : > { %2266 = vmatpush1.bf16.msra.mxu0 %v6422_v17 }
 0x295   : > { %2492 = vmatprep.subr.bf16.mxu0 %v6427_v18  ;;  %v1516_v18 = vld [vmem:[%s6632_s20 + $0x10] sm:$0xff]  ;;  %s2073_s20 = ssub.s32 14, %s6637_s0 }
 0x296   : > { %5066 = vmatpush3.bf16.msra.mxu1 %v5470_v48  ;;  %s6863_s21 = sshll.u32 %s2073_s20, 3 }
 0x297   : > { %5071 = vmatprep.subr.bf16.mxu1 %v5712_v56  ;;  %s2083_s23 = sshra.s32 %s6863_s21, 3  ;;  %s4689_s21 = sadd.s32 16, %s6627_s17 }
 0x298   : > { %s4687_s24 = smul.u32 24, %s2083_s23 }
 0x29a   : > { %s6868_s25 = scalar_lea.vmem [#allocation3], %s4687_s24  ;;  %s2639_s24 = ssub.s32 13, %s6637_s0 }
 0x317   : > { %v1719_v50 = vpop.f32.mrf.mxu0 }
 0x318   : > { %v2008_v51 = vadd.f32 %v1719_v50, %v1514_v49 }
 0x319   : > { %v1721_v52 = vpop.f32.mrf.mxu0  ;;  %v1760_v62 = vpop.f32.mrf.mxu1 }
 0x31a   : > { %v4461_v58 = vmul.f32 -1.442695, %v2008_v51  ;;  %v2015_v0 = vadd.f32 %v1721_v52, %v1515_v61  ;;  %v2028_v9 = vadd.f32 %v6648_v6, %v1760_v62  ;;  %v5471_v51 = vld [vmem:[%s7318_s6 + $0xb0] ss:$12 sps:$4 sm:$0xff]  }
 0x31b   : > { %v1723_v59 = vpop.f32.mrf.mxu0  ;;  %v5029_v63 = vpop.f32.mrf.mxu1  ;;  %v1524_v62 = vld [vmem:[%s6650_s26 + $0x10] sm:$0xff]  ;;  %s4527_s26 = sshll.u32 %s6855_s16, 2  ;;  %s4528_s16 = sshll.u32 %s2083_s23, 2 }
 0x31c   : > { %5559 = vpow2.f32 %v4461_v58  ;;  %v4462_v4 = vmul.f32 -1.442695, %v2015_v0  ;;  %v6669_v58 = vld [vmem:[%s7320_s10] ss:$0 sm:$0xff]  ;;  %s2632_s4 = scalar_lea.vmem [#allocation4], %s4527_s26  ;;  %s2635_s18 = scalar_lea.vmem [#allocation5], %s4528_s16 }
 0x31d   : > { %v1724_v60 = vpop.f32.mrf.mxu0  ;;  %v1763_v1 = vpop.f32.mrf.mxu1  ;;  %s7071_s23 = sshra.s32 %s4689_s21, 3  ;;  %s7079_s26 = sshll.u32 %s2639_s24, 3 }
 0x31e   : > { %5561 = vpow2.f32 %v4462_v4  ;;  %v5474_v1 = vld [vmem:[%s7318_s6 + $0x68] ss:$12 sps:$4 sm:$0xff]   ;;  %v6770_v4 = vld [vmem:[%s7317_s5 + $0x64] ss:$12 sps:$4 sm:$0xff]   ;;  %s2649_s2 = sshra.s32 %s7079_s26, 3  ;;  %s4587_s22 = sshll.u32 %s7071_s23, 2 }
 0x31f   : > { %v5030_v2 = vpop.f32.mrf.mxu1  ;;  %s4691_s3 = smul.u32 24, %s2649_s2 }
 0x320   : > { %v5487_v2 = vld [vmem:[%s7317_s5 + $0x80] ss:$12 sps:$4 sm:$0xff]  }
 0x329   : > { %v5560_v3 = vpop.eup %5559 }
 0x32a   : > { %v2012_v5 = vadd.f32 1.0, %v5560_v3  ;;  %v6776_v3 = vld [vmem:[%s7317_s5 + $0x60] ss:$12 sps:$4 sm:$0xff]  }
 0x32b   : > { %v5562_v12 = vpop.eup %5561 }
 0x32c   : > { %5563 = vrcp.f32 %v2012_v5  ;;  %v2019_v25 = vadd.f32 1.0, %v5562_v12  ;;  %v5491_v5 = vld [vmem:[%s7317_s5 + $0x68] ss:$12 sps:$4 sm:$0xff]  }
 0x32d   : > { %v6802_v12 = vld [vmem:[%s7317_s5 + $0x34] ss:$12 sps:$4 sm:$0xff]  }
 0x337   : > { %v1960_v10 = vpop.f32.mrf.mxu0 }
 0x338   : > { %v2036_v16 = vadd.f32 %v1960_v10, %v1522_v8  ;;  %v6786_v8 = vld [vmem:[%s7317_s5 + $0x4c] ss:$12 sps:$4 sm:$0xff]   ;;  %v5495_v10 = vld [vmem:[%s7317_s5 + $0x50] ss:$12 sps:$4 sm:$0xff]  }
 0x339   : > { %v5564_v17 = vpop.eup %5563  ;;  %v1962_v19 = vpop.f32.mrf.mxu0 }
 0x33a   : > { %v2029_v53 = vmul.f32 %v5564_v17, %v2028_v9  ;;  %v4464_v23 = vmul.f32 -1.442695, %v2036_v16  ;;  %v2001_v7 = vpop.f32.mrf.mxu1  ;;  %v2043_v39 = vadd.f32 %v1962_v19, %v1523_v13  ;;  %v6792_v9 = vld [vmem:[%s7317_s5 + $0x48] ss:$12 sps:$4 sm:$0xff]   ;;  %v6808_v16 = vld [vmem:[%s7317_s5 + $0x30] ss:$12 sps:$4 sm:$0xff]  }
 0x33b   : > { %v1964_v24 = vpop.f32.mrf.mxu0  ;;  %v2056_v59 = vadd.f32 %v6669_v58, %v2001_v7  ;;  %v5499_v17 = vld [vmem:[%s7317_s5 + $0x38] ss:$12 sps:$4 sm:$0xff]  }
 0x33c   : > { %v2030_v27 = vadd.f32 %v2029_v53, %v1516_v18  ;;  %5565 = vpow2.f32 %v4464_v23  ;;  %v5049_v37 = vpop.f32.mrf.mxu1  ;;  %v4465_v42 = vmul.f32 -1.442695, %v2043_v39  ;;  %v6818_v18 = vld [vmem:[%s7317_s5 + $0x1c] ss:$12 sps:$4 sm:$0xff]   ;;  %v6824_v19 = vld [vmem:[%s7317_s5 + $0x18] ss:$12 sps:$4 sm:$0xff]  }
 0x33d   : > { %v1965_v30 = vpop.f32.mrf.mxu0  ;;  %v5503_v53 = vld [vmem:[%s7317_s5 + $0x20] ss:$12 sps:$4 sm:$0xff]   ;;  %v6834_v23 = vld [vmem:[%s7317_s5 + $0x4] ss:$12 sps:$4 sm:$0xff]  }
 0x33e   : > { %5567 = vtanh.f32 %v2030_v27  ;;  %v2004_v40 = vpop.f32.mrf.mxu1  ;;  %v6840_v24 = vld [vmem:[%s7317_s5] ss:$12 sps:$4 sm:$0xff]  }
 0x33f   : > { %5569 = vrcp.f32 %v2019_v25  ;;  %v5507_v25 = vld [vmem:[%s7317_s5 + $0x8] ss:$12 sps:$4 sm:$0xff]   ;;  %v6850_v27 = vld [vmem:[%s7318_s6 + $0xac] ss:$12 sps:$4 sm:$0xff]   ;;  %v2080_v30 = vld [vmem:[%s6858_s19] sm:$0xff] }
 0x340   : > { %v5050_v41 = vpop.f32.mrf.mxu1  ;;  %5571 = vpow2.f32 %v4465_v42 }
 0x349   : > { %v5566_v44 = vpop.eup %5565 }
 0x34a   : > { %v2040_v45 = vadd.f32 1.0, %v5566_v44 }
 0x34b   : > { %v5568_v46 = vpop.eup %5567 }
 0x34c   : > { %5573 = vrcp.f32 %v2040_v45  ;;  %v2032_v47 = vsub.f32 %v5705_v55, %v5568_v46  ;;  %v5570_v48 = vpop.eup %5569  ;;  %v5472_v55 = vld [vmem:[%s7318_s6 + $0x98] ss:$12 sps:$4 sm:$0xff]  }
 0x34d   : > { %v5572_v60 = vpop.eup %5571 }
 0x34e   : > { %v2033_v49 = vmul.f32 %v5570_v48, %v2032_v47  ;;  %v2081_v47 = vld [vmem:[%s6858_s19 + $0x8] sm:$0xff] }
 0x350   : > { %v6659_v50 = vadd.f32 %v5568_v46, %v2033_v49 }
 0x352   : > { %v2063_v52 = vpack.c.bf16 %v6659_v50, %v6659_v50 }
 0x354   : > { %2067 = vst [vmem:[%s2066_s29] sm:$0xf] %v2063_v52  ;;  %2284 = vmatmul.mubr.bf16.vlgmr.msra.gmra.mxu0 %v2063_v52  ;;  %5068 = vmatmul.mubr.bf16.vlgmr.msra.gmra.mxu1 %v2063_v52  ;;  %s3198_s29 = scalar_lea.vmem [#allocation4], %s4587_s22  ;;  %s4588_s22 = sshll.u32 %s2649_s2, 2 }
 0x355   : > { %2493 = vmatpush1.bf16.msra.mxu0 %v6437_v20  ;;  %5072 = vmatpush3.bf16.msra.mxu1 %v5471_v51  ;;  %v5473_v20 = vld [vmem:[%s7318_s6 + $0x80] ss:$12 sps:$4 sm:$0xff]   ;;  %s3201_s1 = scalar_lea.vmem [#allocation5], %s4588_s22 }
 0x356   : > { %2494 = vmatprep.subr.bf16.mxu0 %v6443_v21  ;;  %5073 = vmatprep.subr.bf16.mxu1 %v5712_v56  ;;  %v2047_v21 = vadd.f32 1.0, %v5572_v60 }
 0x357   : > { %2524 = vmatprep.mubr.bf16.mxu0 %v5713_v57  ;;  %5087 = vmatprep.mubr.msk.bf16.mxu1 %vm5714_vm0, %v5712_v56 }
 0x359   : > { %v5574_v61 = vpop.eup %5573  ;;  %2495 = vmatpush1.bf16.msra.mxu0 %v6454_v38  ;;  %5074 = vmatpush3.bf16.msra.mxu1 %v5472_v55  ;;  %v5475_v38 = vld [vmem:[%s7318_s6 + $0x50] ss:$12 sps:$4 sm:$0xff]   ;;  %v2088_v55 = vld [vmem:[%s6868_s25] sm:$0xff] }
 0x35a   : > { %v2057_v63 = vmul.f32 %v5574_v61, %v2056_v59  ;;  %2496 = vmatprep.subr.bf16.mxu0 %v6460_v22  ;;  %5075 = vmatprep.subr.bf16.mxu1 %v5712_v56  ;;  %v5476_v22 = vld [vmem:[%s7318_s6 + $0x38] ss:$12 sps:$4 sm:$0xff]  }
 0x35c   : > { %v2058_v0 = vadd.f32 %v2057_v63, %v1524_v62 }
 0x35d   : > { %2497 = vmatpush1.bf16.msra.mxu0 %v6470_v36  ;;  %5076 = vmatpush3.bf16.msra.mxu1 %v5473_v20  ;;  %v5477_v36 = vld [vmem:[%s7318_s6 + $0x20] ss:$12 sps:$4 sm:$0xff]  }
 0x35e   : > { %5575 = vtanh.f32 %v2058_v0  ;;  %2498 = vmatprep.subr.bf16.mxu0 %v6476_v43  ;;  %5077 = vmatprep.subr.bf16.mxu1 %v5712_v56 }
 0x35f   : > { %5577 = vrcp.f32 %v2047_v21  ;;  %v2082_v21 = vld [vmem:[%s6858_s19 + $0x10] sm:$0xff]  ;;  %s4690_s19 = smul.u32 24, %s7071_s23 }
 0x361   : > { %2499 = vmatpush1.bf16.msra.mxu0 %v6486_v35  ;;  %5078 = vmatpush3.bf16.msra.mxu1 %v5474_v1  ;;  %s7074_s20 = scalar_lea.vmem [#allocation2], %s4690_s19 }
 0x362   : > { %2500 = vmatprep.subr.bf16.mxu0 %v6492_v33  ;;  %5079 = vmatprep.subr.bf16.mxu1 %v5712_v56 }
 0x365   : > { %2501 = vmatpush1.bf16.msra.mxu0 %v6503_v15  ;;  %5080 = vmatpush3.bf16.msra.mxu1 %v5475_v38  ;;  %v5478_v15 = vld [vmem:[%s7318_s6 + $0x8] ss:$12 sps:$4 sm:$0xff]  }
 0x366   : > { %2502 = vmatprep.subr.bf16.mxu0 %v6511_v26  ;;  %5081 = vmatprep.subr.bf16.mxu1 %v5712_v56 }
 0x369   : > { %2503 = vmatpush1.bf16.msra.mxu0 %v6521_v28  ;;  %5082 = vmatpush3.bf16.msra.mxu1 %v5476_v22 }
 0x36a   : > { %2504 = vmatprep.subr.bf16.mxu0 %v6527_v29  ;;  %5083 = vmatprep.subr.bf16.mxu1 %v5712_v56  ;;  %v5479_v29 = vld [vmem:[%s7317_s5 + $0xb0] ss:$12 sps:$4 sm:$0xff]  }
 0x36b   : > { %v5576_v43 = vpop.eup %5575 }
 0x36c   : > { %v2060_v35 = vsub.f32 %v5701_v54, %v5576_v43  ;;  %v5578_v33 = vpop.eup %5577 }
 0x36d   : > { %2505 = vmatpush1.bf16.msra.mxu0 %v6537_v31  ;;  %5084 = vmatpush3.bf16.msra.mxu1 %v5477_v36  ;;  %v5483_v31 = vld [vmem:[%s7317_s5 + $0x98] ss:$12 sps:$4 sm:$0xff]  }
 0x36e   : > { %2506 = vmatprep.subr.bf16.mxu0 %v6543_v32  ;;  %5085 = vmatprep.subr.bf16.mxu1 %v5712_v56  ;;  %v2061_v26 = vmul.f32 %v5578_v33, %v2060_v35  ;;  %v6754_v32 = vld [vmem:[%s7317_s5 + $0x7c] ss:$12 sps:$4 sm:$0xff]  }
 0x370   : > { %v6721_v28 = vadd.f32 %v5576_v43, %v2061_v26 }
 0x371   : > { %2507 = vmatpush1.bf16.msra.mxu0 %v6553_v11  ;;  %5086 = vmatpush3.bf16.msra.mxu1 %v5478_v15  ;;  %v6760_v11 = vld [vmem:[%s7317_s5 + $0x78] ss:$12 sps:$4 sm:$0xff]  }
 0x372   : > { %v2064_v54 = vpack.c.bf16 %v6721_v28, %v6721_v28  ;;  %2817 = vmatprep.subr.bf16.mxu0 %v6310_v14  ;;  %5091 = vmatprep.subr.bf16.mxu1 %v5712_v56  ;;  %v6738_v14 = vld [vmem:[%s7317_s5 + $0x94] ss:$12 sps:$4 sm:$0xff]  }
 0x374   : > { %2070 = vst [vmem:[%s2069_s28] sm:$0xf] %v2064_v54  ;;  %2525 = vmatmul.mubr.bf16.vlgmr.msra.gmra.mxu0 %v2064_v54  ;;  %5088 = vmatmul.mubr.bf16.vlgmr.msra.gmra.mxu1 %v2064_v54  ;;  %v2089_v54 = vld [vmem:[%s6868_s25 + $0x8] sm:$0xff]  ;;  %s7089_s28 = scalar_lea.vmem [#allocation3], %s4691_s3 }
 0x375   : > { %2818 = vmatpush1.bf16.msra.mxu0 %v6315_v34  ;;  %2849 = vmatprep.mubr.bf16.mxu0 %v5713_v57  ;;  %v6744_v34 = vld [vmem:[%s7317_s5 + $0x90] ss:$12 sps:$4 sm:$0xff]  }
 0x376   : > { %5107 = vmatprep.mubr.msk.bf16.mxu1 %vm5714_vm0, %v5712_v56  ;;  %5092 = vmatpush3.bf16.msra.mxu1 %v5479_v29 }
 0x377   : > { %5093 = vmatprep.subr.bf16.mxu1 %v5712_v56  ;;  %2819 = vmatprep.subr.bf16.mxu0 %v6738_v14 }
 0x379   : > { %2820 = vmatpush1.bf16.msra.mxu0 %v6744_v34 }
 0x37a   : > { %5094 = vmatpush3.bf16.msra.mxu1 %v5483_v31  ;;  %2821 = vmatprep.subr.bf16.mxu0 %v6754_v32 }
 0x37b   : > { %5095 = vmatprep.subr.bf16.mxu1 %v5712_v56 }
 0x37d   : > { %2822 = vmatpush1.bf16.msra.mxu0 %v6760_v11 }
 0x37e   : > { %5096 = vmatpush3.bf16.msra.mxu1 %v5487_v2  ;;  %2823 = vmatprep.subr.bf16.mxu0 %v6770_v4 }
 0x37f   : > { %5097 = vmatprep.subr.bf16.mxu1 %v5712_v56 }
 0x381   : > { %2824 = vmatpush1.bf16.msra.mxu0 %v6776_v3 }
 0x382   : > { %5098 = vmatpush3.bf16.msra.mxu1 %v5491_v5  ;;  %2825 = vmatprep.subr.bf16.mxu0 %v6786_v8 }
 0x383   : > { %5099 = vmatprep.subr.bf16.mxu1 %v5712_v56 }
 0x385   : > { %2826 = vmatpush1.bf16.msra.mxu0 %v6792_v9 }
 0x386   : > { %5100 = vmatpush3.bf16.msra.mxu1 %v5495_v10  ;;  %2827 = vmatprep.subr.bf16.mxu0 %v6802_v12 }
 0x387   : > { %5101 = vmatprep.subr.bf16.mxu1 %v5712_v56 }
 0x389   : > { %2828 = vmatpush1.bf16.msra.mxu0 %v6808_v16 }
 0x38a   : > { %5102 = vmatpush3.bf16.msra.mxu1 %v5499_v17  ;;  %2829 = vmatprep.subr.bf16.mxu0 %v6818_v18 }
 0x38b   : > { %5103 = vmatprep.subr.bf16.mxu1 %v5712_v56 }
 0x38d   : > { %2830 = vmatpush1.bf16.msra.mxu0 %v6824_v19 }
 0x38e   : > { %5104 = vmatpush3.bf16.msra.mxu1 %v5503_v53  ;;  %2831 = vmatprep.subr.bf16.mxu0 %v6834_v23 }
 0x38f   : > { %5105 = vmatprep.subr.bf16.mxu1 %v5712_v56 }
 0x391   : > { %2832 = vmatpush1.bf16.msra.mxu0 %v6840_v24 }
 0x392   : > { %5106 = vmatpush3.bf16.msra.mxu1 %v5507_v25  ;;  %3058 = vmatprep.subr.bf16.mxu0 %v6850_v27 }
 0x393   : > { %5111 = vmatprep.subr.bf16.mxu1 %v5712_v56 }
 0x414   : > { %v2285_v13 = vpop.f32.mrf.mxu0  ;;  %v2326_v7 = vpop.f32.mrf.mxu1 }
 0x415   : > { %v2574_v37 = vadd.f32 %v2285_v13, %v2080_v30  ;;  %v2594_v62 = vadd.f32 %v6648_v6, %v2326_v7  ;;  %v6881_v30 = vld [vmem:[%s7318_s6 + $0xa8] ss:$12 sps:$4 sm:$0xff]   ;;  %v5511_v13 = vld [vmem:[%s7318_s6 + $0xb0] ss:$12 sps:$4 sm:$0xff]  }
 0x416   : > { %v2287_v39 = vpop.f32.mrf.mxu0  ;;  %v5069_v40 = vpop.f32.mrf.mxu1 }
 0x417   : > { %v4521_v41 = vmul.f32 -1.442695, %v2574_v37  ;;  %v2581_v48 = vadd.f32 %v2287_v39, %v2081_v47  ;;  %v6897_v37 = vld [vmem:[%s7318_s6 + $0x90] ss:$12 sps:$4 sm:$0xff]   ;;  %v5515_v39 = vld [vmem:[%s7318_s6 + $0x98] ss:$12 sps:$4 sm:$0xff]  }
 0x418   : > { %v2289_v42 = vpop.f32.mrf.mxu0  ;;  %v2329_v44 = vpop.f32.mrf.mxu1  ;;  %v6907_v40 = vld [vmem:[%s7318_s6 + $0x7c] ss:$12 sps:$4 sm:$0xff]   ;;  %v5519_v47 = vld [vmem:[%s7318_s6 + $0x80] ss:$12 sps:$4 sm:$0xff]  }
 0x419   : > { %5579 = vpow2.f32 %v4521_v41  ;;  %v4522_v49 = vmul.f32 -1.442695, %v2581_v48 }
 0x41a   : > { %v2290_v45 = vpop.f32.mrf.mxu0  ;;  %v5070_v46 = vpop.f32.mrf.mxu1 }
 0x41b   : > { %5581 = vpow2.f32 %v4522_v49  ;;  %v2090_v45 = vld [vmem:[%s6868_s25 + $0x10] sm:$0xff]  ;;  %v6918_v46 = vld [vmem:[%s7318_s6 + $0x78] ss:$12 sps:$4 sm:$0xff]  }
 0x41c   : > { %v6928_v49 = vld [vmem:[%s7318_s6 + $0x64] ss:$12 sps:$4 sm:$0xff]  }
 0x426   : > { %v5580_v51 = vpop.eup %5579 }
 0x427   : > { %v2578_v52 = vadd.f32 1.0, %v5580_v51 }
 0x428   : > { %v5582_v61 = vpop.eup %5581 }
 0x429   : > { %5583 = vrcp.f32 %v2578_v52  ;;  %v2585_v33 = vadd.f32 1.0, %v5582_v61  ;;  %v6950_v61 = vld [vmem:[%s7318_s6 + $0x48] ss:$12 sps:$4 sm:$0xff]  }
 0x434   : > { %v2526_v59 = vpop.f32.mrf.mxu0  ;;  %v2567_v60 = vpop.f32.mrf.mxu1 }
 0x435   : > { %v2602_v20 = vadd.f32 %v2526_v59, %v2088_v55  ;;  %v2622_v42 = vadd.f32 %v6669_v58, %v2567_v60  ;;  %v6934_v55 = vld [vmem:[%s7318_s6 + $0x60] ss:$12 sps:$4 sm:$0xff]   ;;  %v5523_v59 = vld [vmem:[%s7318_s6 + $0x68] ss:$12 sps:$4 sm:$0xff]  }
 0x436   : > { %v5584_v63 = vpop.eup %5583  ;;  %v2528_v0 = vpop.f32.mrf.mxu0  ;;  %v6944_v60 = vld [vmem:[%s7318_s6 + $0x4c] ss:$12 sps:$4 sm:$0xff]  }
 0x437   : > { %v5089_v1 = vpop.f32.mrf.mxu1  ;;  %v2595_v38 = vmul.f32 %v5584_v63, %v2594_v62  ;;  %v4524_v22 = vmul.f32 -1.442695, %v2602_v20  ;;  %v2609_v6 = vadd.f32 %v2528_v0, %v2089_v54  ;;  %v5527_v62 = vld [vmem:[%s7318_s6 + $0x50] ss:$12 sps:$4 sm:$0xff]   ;;  %v6960_v20 = vld [vmem:[%s7318_s6 + $0x34] ss:$12 sps:$4 sm:$0xff]  }
 0x438   : > { %v2530_v36 = vpop.f32.mrf.mxu0  ;;  %v6966_v63 = vld [vmem:[%s7318_s6 + $0x30] ss:$12 sps:$4 sm:$0xff]   ;;  %v6982_v1 = vld [vmem:[%s7318_s6 + $0x18] ss:$12 sps:$4 sm:$0xff]  }
 0x439   : > { %v2570_v43 = vpop.f32.mrf.mxu1  ;;  %v2596_v35 = vadd.f32 %v2595_v38, %v2082_v21  ;;  %5585 = vpow2.f32 %v4524_v22  ;;  %v4525_v29 = vmul.f32 -1.442695, %v2609_v6  ;;  %v5531_v21 = vld [vmem:[%s7318_s6 + $0x38] ss:$12 sps:$4 sm:$0xff]   ;;  %v6976_v0 = vld [vmem:[%s7318_s6 + $0x1c] ss:$12 sps:$4 sm:$0xff]  }
 0x43a   : > { %v2531_v15 = vpop.f32.mrf.mxu0  ;;  %v5535_v38 = vld [vmem:[%s7318_s6 + $0x20] ss:$12 sps:$4 sm:$0xff]   ;;  %v6992_v22 = vld [vmem:[%s7318_s6 + $0x4] ss:$12 sps:$4 sm:$0xff]  }
 0x43b   : > { %v5090_v26 = vpop.f32.mrf.mxu1  ;;  %5587 = vtanh.f32 %v2596_v35  ;;  %v5539_v15 = vld [vmem:[%s7318_s6 + $0x8] ss:$12 sps:$4 sm:$0xff]   ;;  %v5542_v6 = vld [vmem:[%s7317_s5 + $0xac] ss:$12 sps:$4 sm:$0xff]  }
 0x43c   : > { %5589 = vrcp.f32 %v2585_v33  ;;  %v6999_v33 = vld [vmem:[%s7318_s6] ss:$12 sps:$4 sm:$0xff]  }
 0x43d   : > { %5591 = vpow2.f32 %v4525_v29  ;;  %v5540_v29 = vld [vmem:[%s7317_s5 + $0xa8] ss:$12 sps:$4 sm:$0xff]  }
 0x446   : > { %v5586_v31 = vpop.eup %5585 }
 0x447   : > { %v2606_v2 = vadd.f32 1.0, %v5586_v31  ;;  %v5543_v31 = vld [vmem:[%s7317_s5 + $0xb0] ss:$12 sps:$4 sm:$0xff]  }
 0x448   : > { %v5588_v5 = vpop.eup %5587 }
 0x449   : > { %5593 = vrcp.f32 %v2606_v2  ;;  %v2598_v10 = vsub.f32 %v6659_v50, %v5588_v5  ;;  %v5590_v17 = vpop.eup %5589  ;;  %v6891_v50 = vld [vmem:[%s7318_s6 + $0x94] ss:$12 sps:$4 sm:$0xff]   ;;  %v5544_v2 = vld [vmem:[%s7317_s5 + $0x98] ss:$12 sps:$4 sm:$0xff]  }
 0x44a   : > { %v5592_v41 = vpop.eup %5591 }
 0x44b   : > { %v2599_v53 = vmul.f32 %v5590_v17, %v2598_v10  ;;  %v2613_v52 = vadd.f32 1.0, %v5592_v41  ;;  %v2647_v17 = vld [vmem:[%s7074_s20 + $0x8] sm:$0xff]  ;;  %v7087_v41 = vld [vmem:[%s7319_s9] ss:$0 sm:$0xff] }
 0x44d   : > { %v6876_v25 = vadd.f32 %v5588_v5, %v2599_v53  ;;  %v5545_v5 = vld [vmem:[%s7317_s5 + $0x80] ss:$12 sps:$4 sm:$0xff]  }
 0x44f   : > { %v2629_v7 = vpack.c.bf16 %v6876_v25, %v6876_v25 }
 0x451   : > { %2633 = vst [vmem:[%s2632_s4] sm:$0xf] %v2629_v7  ;;  %2850 = vmatmul.mubr.bf16.vlgmr.msra.gmra.mxu0 %v2629_v7  ;;  %5108 = vmatmul.mubr.bf16.vlgmr.msra.gmra.mxu1 %v2629_v7  ;;  %s4693_s4 = sadd.s32 24, %s6627_s17  ;;  %s3205_s17 = ssub.s32 12, %s6637_s0 }
 0x452   : > { %3059 = vmatpush1.bf16.msra.mxu0 %v6881_v30  ;;  %5112 = vmatpush3.bf16.msra.mxu1 %v5511_v13  ;;  %s7160_s26 = sshra.s32 %s4693_s4, 3  ;;  %s7168_s7 = sshll.u32 %s3205_s17, 3 }
 0x453   : > { %3060 = vmatprep.subr.bf16.mxu0 %v6891_v50  ;;  %5113 = vmatprep.subr.bf16.mxu1 %v5712_v56  ;;  %s4694_s2 = smul.u32 24, %s7160_s26  ;;  %s3215_s30 = sshra.s32 %s7168_s7, 3 }
 0x454   : > { %3090 = vmatprep.mubr.bf16.mxu0 %v5713_v57  ;;  %5127 = vmatprep.mubr.msk.bf16.mxu1 %vm5714_vm0, %v5712_v56  ;;  %s4695_s15 = smul.u32 24, %s3215_s30  ;;  %s4647_s0 = sshll.u32 %s7160_s26, 2 }
 0x455   : > { %s4648_s19 = sshll.u32 %s3215_s30, 2 }
 0x456   : > { %v5594_v44 = vpop.eup %5593  ;;  %3061 = vmatpush1.bf16.msra.mxu0 %v6897_v37  ;;  %5114 = vmatpush3.bf16.msra.mxu1 %v5515_v39  ;;  %s7173_s16 = scalar_lea.vmem [#allocation3], %s4695_s15 }
 0x457   : > { %v2623_v48 = vmul.f32 %v5594_v44, %v2622_v42  ;;  %3062 = vmatprep.subr.bf16.mxu0 %v6907_v40  ;;  %5115 = vmatprep.subr.bf16.mxu1 %v5712_v56  ;;  %v2654_v42 = vld [vmem:[%s7089_s28] sm:$0xff] }
 0x459   : > { %v2624_v51 = vadd.f32 %v2623_v48, %v2090_v45 }
 0x45a   : > { %3063 = vmatpush1.bf16.msra.mxu0 %v6918_v46  ;;  %5116 = vmatpush3.bf16.msra.mxu1 %v5519_v47 }
 0x45b   : > { %5595 = vtanh.f32 %v2624_v51  ;;  %3064 = vmatprep.subr.bf16.mxu0 %v6928_v49  ;;  %5117 = vmatprep.subr.bf16.mxu1 %v5712_v56 }
 0x45c   : > { %5597 = vrcp.f32 %v2613_v52 }
 0x45e   : > { %3065 = vmatpush1.bf16.msra.mxu0 %v6934_v55  ;;  %5118 = vmatpush3.bf16.msra.mxu1 %v5523_v59  ;;  %v2648_v59 = vld [vmem:[%s7074_s20 + $0x10] sm:$0xff] }
 0x45f   : > { %3066 = vmatprep.subr.bf16.mxu0 %v6944_v60  ;;  %5119 = vmatprep.subr.bf16.mxu1 %v5712_v56 }
 0x462   : > { %3067 = vmatpush1.bf16.msra.mxu0 %v6950_v61  ;;  %5120 = vmatpush3.bf16.msra.mxu1 %v5527_v62 }
 0x463   : > { %3068 = vmatprep.subr.bf16.mxu0 %v6960_v20  ;;  %5121 = vmatprep.subr.bf16.mxu1 %v5712_v56 }
 0x466   : > { %3069 = vmatpush1.bf16.msra.mxu0 %v6966_v63  ;;  %5122 = vmatpush3.bf16.msra.mxu1 %v5531_v21 }
 0x467   : > { %3070 = vmatprep.subr.bf16.mxu0 %v6976_v0  ;;  %5123 = vmatprep.subr.bf16.mxu1 %v5712_v56 }
 0x468   : > { %v5596_v36 = vpop.eup %5595 }
 0x469   : > { %v2626_v43 = vsub.f32 %v6721_v28, %v5596_v36  ;;  %v5598_v35 = vpop.eup %5597 }
 0x46a   : > { %3071 = vmatpush1.bf16.msra.mxu0 %v6982_v1  ;;  %5124 = vmatpush3.bf16.msra.mxu1 %v5535_v38 }
 0x46b   : > { %3072 = vmatprep.subr.bf16.mxu0 %v6992_v22  ;;  %5125 = vmatprep.subr.bf16.mxu1 %v5712_v56  ;;  %v2627_v28 = vmul.f32 %v5598_v35, %v2626_v43 }
 0x46d   : > { %v7008_v26 = vadd.f32 %v5596_v36, %v2627_v28 }
 0x46e   : > { %3073 = vmatpush1.bf16.msra.mxu0 %v6999_v33  ;;  %5126 = vmatpush3.bf16.msra.mxu1 %v5539_v15 }
 0x46f   : > { %v2630_v54 = vpack.c.bf16 %v7008_v26, %v7008_v26  ;;  %5131 = vmatprep.subr.bf16.mxu1 %v5712_v56  ;;  %3383 = vmatprep.subr.bf16.mxu0 %v5542_v6 }
 0x471   : > { %2636 = vst [vmem:[%s2635_s18] sm:$0xf] %v2630_v54  ;;  %3091 = vmatmul.mubr.bf16.vlgmr.msra.gmra.mxu0 %v2630_v54  ;;  %5128 = vmatmul.mubr.bf16.vlgmr.msra.gmra.mxu1 %v2630_v54  ;;  %s3764_s18 = scalar_lea.vmem [#allocation4], %s4647_s0 }
 0x472   : > { %3415 = vmatprep.mubr.bf16.mxu0 %v5713_v57  ;;  %5147 = vmatprep.mubr.msk.bf16.mxu1 %vm5714_vm0, %v5712_v56 }
 0x473   : > { %3384 = vmatpush1.bf16.msra.mxu0 %v5540_v29  ;;  %5132 = vmatpush3.bf16.msra.mxu1 %v5543_v31  ;;  %v2655_v29 = vld [vmem:[%s7089_s28 + $0x8] sm:$0xff] }
 0x474   : > { %3385 = vmatprep.subr.bf16.mxu0 %v6738_v14  ;;  %5133 = vmatprep.subr.bf16.mxu1 %v5712_v56  ;;  %v5546_v14 = vld [vmem:[%s7317_s5 + $0x68] ss:$12 sps:$4 sm:$0xff]  }
 0x477   : > { %3386 = vmatpush1.bf16.msra.mxu0 %v6744_v34  ;;  %5134 = vmatpush3.bf16.msra.mxu1 %v5544_v2  ;;  %v5547_v34 = vld [vmem:[%s7317_s5 + $0x50] ss:$12 sps:$4 sm:$0xff]  }
 0x478   : > { %3387 = vmatprep.subr.bf16.mxu0 %v6754_v32  ;;  %5135 = vmatprep.subr.bf16.mxu1 %v5712_v56  ;;  %v5548_v32 = vld [vmem:[%s7317_s5 + $0x38] ss:$12 sps:$4 sm:$0xff]  }
 0x47b   : > { %3388 = vmatpush1.bf16.msra.mxu0 %v6760_v11  ;;  %5136 = vmatpush3.bf16.msra.mxu1 %v5545_v5  ;;  %v5549_v11 = vld [vmem:[%s7317_s5 + $0x20] ss:$12 sps:$4 sm:$0xff]  }
 0x47c   : > { %3389 = vmatprep.subr.bf16.mxu0 %v6770_v4  ;;  %5137 = vmatprep.subr.bf16.mxu1 %v5712_v56  ;;  %v5550_v4 = vld [vmem:[%s7317_s5 + $0x8] ss:$12 sps:$4 sm:$0xff]  }
 0x47f   : > { %3390 = vmatpush1.bf16.msra.mxu0 %v6776_v3  ;;  %5138 = vmatpush3.bf16.msra.mxu1 %v5546_v14  ;;  %v2646_v3 = vld [vmem:[%s7074_s20] sm:$0xff]  ;;  %s3767_s20 = scalar_lea.vmem [#allocation5], %s4648_s19 }
 0x480   : > { %3391 = vmatprep.subr.bf16.mxu0 %v6786_v8  ;;  %5139 = vmatprep.subr.bf16.mxu1 %v5712_v56 }
 0x483   : > { %3392 = vmatpush1.bf16.msra.mxu0 %v6792_v9  ;;  %5140 = vmatpush3.bf16.msra.mxu1 %v5547_v34 }
 0x484   : > { %3393 = vmatprep.subr.bf16.mxu0 %v6802_v12  ;;  %5141 = vmatprep.subr.bf16.mxu1 %v5712_v56 }
 0x487   : > { %3394 = vmatpush1.bf16.msra.mxu0 %v6808_v16  ;;  %5142 = vmatpush3.bf16.msra.mxu1 %v5548_v32 }
 0x488   : > { %3395 = vmatprep.subr.bf16.mxu0 %v6818_v18  ;;  %5143 = vmatprep.subr.bf16.mxu1 %v5712_v56 }
 0x48b   : > { %3396 = vmatpush1.bf16.msra.mxu0 %v6824_v19  ;;  %5144 = vmatpush3.bf16.msra.mxu1 %v5549_v11 }
 0x48c   : > { %3397 = vmatprep.subr.bf16.mxu0 %v6834_v23  ;;  %5145 = vmatprep.subr.bf16.mxu1 %v5712_v56 }
 0x48f   : > { %3398 = vmatpush1.bf16.msra.mxu0 %v6840_v24  ;;  %5146 = vmatpush3.bf16.msra.mxu1 %v5550_v4 }
 0x490   : > { %3624 = vmatprep.subr.bf16.mxu0 %v6850_v27  ;;  %5151 = vmatprep.subr.bf16.mxu1 %v5712_v56 }
 0x511   : > { %v2851_v8 = vpop.f32.mrf.mxu0  ;;  %v2892_v9 = vpop.f32.mrf.mxu1 }
 0x512   : > { %v3140_v12 = vadd.f32 %v2851_v8, %v2646_v3  ;;  %v3160_v48 = vadd.f32 %v7087_v41, %v2892_v9  ;;  %v5551_v8 = vld [vmem:[%s7318_s6 + $0xb0] ss:$12 sps:$4 sm:$0xff]  }
 0x513   : > { %v2853_v16 = vpop.f32.mrf.mxu0  ;;  %v5109_v18 = vpop.f32.mrf.mxu1 }
 0x514   : > { %v4581_v19 = vmul.f32 -1.442695, %v3140_v12  ;;  %v3147_v53 = vadd.f32 %v2853_v16, %v2647_v17 }
 0x515   : > { %v2855_v23 = vpop.f32.mrf.mxu0  ;;  %v2895_v24 = vpop.f32.mrf.mxu1 }
 0x516   : > { %5599 = vpow2.f32 %v4581_v19  ;;  %v4582_v13 = vmul.f32 -1.442695, %v3147_v53  ;;  %v2656_v19 = vld [vmem:[%s7089_s28 + $0x10] sm:$0xff] }
 0x517   : > { %v2856_v27 = vpop.f32.mrf.mxu0  ;;  %v5110_v10 = vpop.f32.mrf.mxu1 }
 0x518   : > { %5601 = vpow2.f32 %v4582_v13 }
 0x523   : > { %v5600_v7 = vpop.eup %5599 }
 0x524   : > { %v3144_v39 = vadd.f32 1.0, %v5600_v7 }
 0x525   : > { %v5602_v47 = vpop.eup %5601 }
 0x526   : > { %5603 = vrcp.f32 %v3144_v39  ;;  %v3151_v28 = vadd.f32 1.0, %v5602_v47  ;;  %v3220_v47 = vld [vmem:[%s7173_s16] sm:$0xff] }
 0x531   : > { %v3092_v44 = vpop.f32.mrf.mxu0  ;;  %v3133_v45 = vpop.f32.mrf.mxu1 }
 0x532   : > { %v3168_v51 = vadd.f32 %v3092_v44, %v2654_v42  ;;  %v3188_v16 = vadd.f32 %v6669_v58, %v3133_v45  ;;  %v5554_v58 = vld [vmem:[%s7318_s6 + $0x68] ss:$12 sps:$4 sm:$0xff]  }
 0x533   : > { %v5604_v52 = vpop.eup %5603  ;;  %v3094_v62 = vpop.f32.mrf.mxu0 }
 0x534   : > { %v5129_v21 = vpop.f32.mrf.mxu1  ;;  %v3161_v38 = vmul.f32 %v5604_v52, %v3160_v48  ;;  %v4584_v36 = vmul.f32 -1.442695, %v3168_v51  ;;  %v3175_v31 = vadd.f32 %v3094_v62, %v2655_v29 }
 0x535   : > { %v3096_v43 = vpop.f32.mrf.mxu0 }
 0x536   : > { %v3136_v35 = vpop.f32.mrf.mxu1  ;;  %v3162_v15 = vadd.f32 %v3161_v38, %v2648_v59  ;;  %5605 = vpow2.f32 %v4584_v36  ;;  %v4585_v2 = vmul.f32 -1.442695, %v3175_v31 }
 0x537   : > { %v3097_v54 = vpop.f32.mrf.mxu0 }
 0x538   : > { %v5130_v6 = vpop.f32.mrf.mxu1  ;;  %5607 = vtanh.f32 %v3162_v15 }
 0x539   : > { %5609 = vrcp.f32 %v3151_v28 }
 0x53a   : > { %5611 = vpow2.f32 %v4585_v2 }
 0x543   : > { %v5606_v5 = vpop.eup %5605 }
 0x544   : > { %v3172_v14 = vadd.f32 1.0, %v5606_v5  ;;  %v3221_v5 = vld [vmem:[%s7173_s16 + $0x8] sm:$0xff] }
 0x545   : > { %v5608_v34 = vpop.eup %5607 }
 0x546   : > { %5613 = vrcp.f32 %v3172_v14  ;;  %v3164_v32 = vsub.f32 %v6876_v25, %v5608_v34  ;;  %v5610_v11 = vpop.eup %5609  ;;  %v5552_v25 = vld [vmem:[%s7318_s6 + $0x98] ss:$12 sps:$4 sm:$0xff]  }
 0x547   : > { %v5612_v12 = vpop.eup %5611 }
 0x548   : > { %v3165_v4 = vmul.f32 %v5610_v11, %v3164_v32  ;;  %v3179_v23 = vadd.f32 1.0, %v5612_v12 }
 0x54a   : > { %v7097_v3 = vadd.f32 %v5608_v34, %v3165_v4 }
 0x54c   : > { %v3195_v9 = vpack.c.bf16 %v7097_v3, %v7097_v3 }
 0x54e   : > { %3199 = vst [vmem:[%s3198_s29] sm:$0xf] %v3195_v9  ;;  %3416 = vmatmul.mubr.bf16.vlgmr.msra.gmra.mxu0 %v3195_v9  ;;  %5148 = vmatmul.mubr.bf16.vlgmr.msra.gmra.mxu1 %v3195_v9  ;;  %s7163_s29 = scalar_lea.vmem [#allocation2], %s4694_s2 }
 0x54f   : > { %3625 = vmatpush1.bf16.msra.mxu0 %v6881_v30  ;;  %5152 = vmatpush3.bf16.msra.mxu1 %v5551_v8  ;;  %v5553_v30 = vld [vmem:[%s7318_s6 + $0x80] ss:$12 sps:$4 sm:$0xff]   ;;  %v3214_v38 = vld [vmem:[%s7163_s29 + $0x10] sm:$0xff] }
 0x550   : > { %3626 = vmatprep.subr.bf16.mxu0 %v6891_v50  ;;  %5153 = vmatprep.subr.bf16.mxu1 %v5712_v56  ;;  %v3213_v7 = vld [vmem:[%s7163_s29 + $0x8] sm:$0xff] }
 0x551   : > { %3656 = vmatprep.mubr.bf16.mxu0 %v5713_v57  ;;  %5167 = vmatprep.mubr.msk.bf16.mxu1 %vm5714_vm0, %v5712_v56 }
 0x553   : > { %v5614_v18 = vpop.eup %5613  ;;  %3627 = vmatpush1.bf16.msra.mxu0 %v6897_v37  ;;  %5154 = vmatpush3.bf16.msra.mxu1 %v5552_v25  ;;  %v5555_v37 = vld [vmem:[%s7318_s6 + $0x50] ss:$12 sps:$4 sm:$0xff]   ;;  %v4646_v25 = vld [vmem:[%s7320_s10] ss:$0 sm:$0xff] }
 0x554   : > { %v3189_v50 = vmul.f32 %v5614_v18, %v3188_v16  ;;  %3628 = vmatprep.subr.bf16.mxu0 %v6907_v40  ;;  %5155 = vmatprep.subr.bf16.mxu1 %v5712_v56  ;;  %v5556_v40 = vld [vmem:[%s7318_s6 + $0x38] ss:$12 sps:$4 sm:$0xff]  }
 0x556   : > { %v3190_v57 = vadd.f32 %v3189_v50, %v2656_v19  ;;  %v3222_v19 = vld [vmem:[%s7173_s16 + $0x10] sm:$0xff] }
 0x557   : > { %3629 = vmatpush1.bf16.msra.mxu0 %v6918_v46  ;;  %5156 = vmatpush3.bf16.msra.mxu1 %v5553_v30  ;;  %v5557_v46 = vld [vmem:[%s7318_s6 + $0x20] ss:$12 sps:$4 sm:$0xff]  }
 0x558   : > { %5615 = vtanh.f32 %v3190_v57  ;;  %3630 = vmatprep.subr.bf16.mxu0 %v6928_v49  ;;  %5157 = vmatprep.subr.bf16.mxu1 %v5712_v56 }
 0x559   : > { %5617 = vrcp.f32 %v3179_v23 }
 0x55b   : > { %3631 = vmatpush1.bf16.msra.mxu0 %v6934_v55  ;;  %5158 = vmatpush3.bf16.msra.mxu1 %v5554_v58 }
 0x55c   : > { %3632 = vmatprep.subr.bf16.mxu0 %v6944_v60  ;;  %5159 = vmatprep.subr.bf16.mxu1 %v5712_v56 }
 0x55f   : > { %3633 = vmatpush1.bf16.msra.mxu0 %v6950_v61  ;;  %5160 = vmatpush3.bf16.msra.mxu1 %v5555_v37  ;;  %v5558_v61 = vld [vmem:[%s7318_s6 + $0x8] ss:$12 sps:$4 sm:$0xff]  }
 0x560   : > { %3634 = vmatprep.subr.bf16.mxu0 %v6960_v20  ;;  %5161 = vmatprep.subr.bf16.mxu1 %v5712_v56 }
 0x563   : > { %3635 = vmatpush1.bf16.msra.mxu0 %v6966_v63  ;;  %5162 = vmatpush3.bf16.msra.mxu1 %v5556_v40  ;;  %v5639_v40 = vld [vmem:[%s7322_s12 + $0x38] sm:$0xff] (%p1497_p0)  }
 0x564   : > { %3636 = vmatprep.subr.bf16.mxu0 %v6976_v0  ;;  %5163 = vmatprep.subr.bf16.mxu1 %v5712_v56 }
 0x565   : > { %v5616_v49 = vpop.eup %5615 }
 0x566   : > { %v3192_v55 = vsub.f32 %v7008_v26, %v5616_v49  ;;  %v5618_v60 = vpop.eup %5617 }
 0x567   : > { %3637 = vmatpush1.bf16.msra.mxu0 %v6982_v1  ;;  %5164 = vmatpush3.bf16.msra.mxu1 %v5557_v46  ;;  %v5640_v46 = vld [vmem:[%s7321_s11 + $0x38] sm:$0xff] (%p1497_p0)  }
 0x568   : > { %3638 = vmatprep.subr.bf16.mxu0 %v6992_v22  ;;  %5165 = vmatprep.subr.bf16.mxu1 %v5712_v56  ;;  %v3193_v20 = vmul.f32 %v5618_v60, %v3192_v55  ;;  %v3212_v56 = vld [vmem:[%s7163_s29] sm:$0xff]  ;;  %v5643_v60 = vld [vmem:[%s7322_s12 + $0x28] sm:$0xff] (%p1497_p0)  }
 0x56a   : > { %v7154_v63 = vadd.f32 %v5616_v49, %v3193_v20  ;;  %v5641_v49 = vld [vmem:[%s7322_s12 + $0x30] sm:$0xff] (%p1497_p0)   ;;  %v5645_v20 = vld [vmem:[%s7322_s12 + $0x20] sm:$0xff] (%p1497_p0)  }
 0x56b   : > { %3639 = vmatpush1.bf16.msra.mxu0 %v6999_v33  ;;  %5166 = vmatpush3.bf16.msra.mxu1 %v5558_v61  ;;  %v5644_v61 = vld [vmem:[%s7321_s11 + $0x28] sm:$0xff] (%p1497_p0)  }
 0x56c   : > { %v3196_v0 = vpack.c.bf16 %v7154_v63, %v7154_v63  ;;  %5171 = vmatprep.subr.bf16.mxu0 (%p1497_p0), %v5639_v40  ;;  %5203 = vmatprep.subr.bf16.mxu1 (%p1497_p0), %v5640_v46 }
 0x56e   : > { %3202 = vst [vmem:[%s3201_s1] sm:$0xf] %v3196_v0  ;;  %3657 = vmatmul.mubr.bf16.vlgmr.msra.gmra.mxu0 %v3196_v0  ;;  %5168 = vmatmul.mubr.bf16.vlgmr.msra.gmra.mxu1 %v3196_v0  ;;  %v5647_v0 = vld [vmem:[%s7322_s12 + $0x18] sm:$0xff] (%p1497_p0)  }
 0x56f   :  { %5172 = vmatpush3.bf16.msra.mxu0 (%p1497_p0), %v5639_v40  ;;  %5204 = vmatpush3.bf16.msra.mxu1 (%p1497_p0), %v5640_v46 }
 0x570   :  { %5173 = vmatprep.subr.bf16.mxu0 (%p1497_p0), %v5641_v49 }
 0x573   :  { %5174 = vmatpush3.bf16.msra.mxu0 (%p1497_p0), %v5641_v49 }
 0x574   :  { %5175 = vmatprep.subr.bf16.mxu0 (%p1497_p0), %v5643_v60 }
 0x577   :  { %5176 = vmatpush3.bf16.msra.mxu0 (%p1497_p0), %v5643_v60 }
 0x578   :  { %5177 = vmatprep.subr.bf16.mxu0 (%p1497_p0), %v5645_v20 }
 0x57b   :  { %5178 = vmatpush3.bf16.msra.mxu0 (%p1497_p0), %v5645_v20 }
 0x57c   :  { %5179 = vmatprep.subr.bf16.mxu0 (%p1497_p0), %v5647_v0 }
 0x57f   :  { %5180 = vmatpush3.bf16.msra.mxu0 (%p1497_p0), %v5647_v0 }
 0x60e   : > { %v3417_v1 = vpop.f32.mrf.mxu0  ;;  %v3458_v22 = vpop.f32.mrf.mxu1 }
 0x60f   : > { %v3706_v33 = vadd.f32 %v3417_v1, %v3212_v56  ;;  %v3726_v59 = vadd.f32 %v7087_v41, %v3458_v22  ;;  %v5648_v56 = vld [vmem:[%s7321_s11 + $0x18] sm:$0xff] (%p1497_p0)   ;;  %v5649_v1 = vld [vmem:[%s7322_s12 + $0x10] sm:$0xff] (%p1497_p0)  }
 0x610   : > { %v3419_v26 = vpop.f32.mrf.mxu0  ;;  %v5149_v24 = vpop.f32.mrf.mxu1  ;;  %v5650_v22 = vld [vmem:[%s7321_s11 + $0x10] sm:$0xff] (%p1497_p0)   ;;  %5181 = vmatprep.subr.bf16.mxu0 (%p1497_p0), %v5649_v1 }
 0x611   : > { %v4641_v27 = vmul.f32 -1.442695, %v3706_v33  ;;  %v3713_v39 = vadd.f32 %v3419_v26, %v3213_v7  ;;  %v5651_v24 = vld [vmem:[%s7322_s12 + $0x8] sm:$0xff] (%p1497_p0)   ;;  %5182 = vmatpush3.bf16.msra.mxu0 (%p1497_p0), %v5649_v1 }
 0x612   : > { %v3421_v10 = vpop.f32.mrf.mxu0  ;;  %v3461_v17 = vpop.f32.mrf.mxu1  ;;  %5183 = vmatprep.subr.bf16.mxu0 (%p1497_p0), %v5651_v24 }
 0x613   : > { %5619 = vpow2.f32 %v4641_v27  ;;  %v4642_v42 = vmul.f32 -1.442695, %v3713_v39  ;;  %v5652_v27 = vld [vmem:[%s7321_s11 + $0x8] sm:$0xff] (%p1497_p0)   ;;  %v5653_v10 = vld [vmem:[%s7322_s12] sm:$0xff] (%p1497_p0)  }
 0x614   : > { %v3422_v53 = vpop.f32.mrf.mxu0  ;;  %v5150_v13 = vpop.f32.mrf.mxu1  ;;  %v5654_v17 = vld [vmem:[%s7321_s11] sm:$0xff] (%p1497_p0)  }
 0x615   : > { %5621 = vpow2.f32 %v4642_v42  ;;  %5184 = vmatpush3.bf16.msra.mxu0 (%p1497_p0), %v5651_v24 }
 0x616   :  { %5185 = vmatprep.subr.bf16.mxu0 (%p1497_p0), %v5653_v10 }
 0x619   :  { %5186 = vmatpush3.bf16.msra.mxu0 (%p1497_p0), %v5653_v10 }
 0x620   : > { %v5620_v44 = vpop.eup %5619 }
 0x621   : > { %v3710_v45 = vadd.f32 1.0, %v5620_v44 }
 0x622   : > { %v5622_v52 = vpop.eup %5621 }
 0x623   : > { %5623 = vrcp.f32 %v3710_v45  ;;  %v3717_v29 = vadd.f32 1.0, %v5622_v52 }
 0x62e   : > { %v3658_v48 = vpop.f32.mrf.mxu0  ;;  %v3699_v51 = vpop.f32.mrf.mxu1 }
 0x62f   : > { %v3734_v62 = vadd.f32 %v3658_v48, %v3220_v47  ;;  %v3754_v16 = vadd.f32 %v4646_v25, %v3699_v51 }
 0x630   : > { %v5624_v21 = vpop.eup %5623  ;;  %v3660_v36 = vpop.f32.mrf.mxu0 }
 0x631   : > { %v5169_v43 = vpop.f32.mrf.mxu1  ;;  %v3727_v35 = vmul.f32 %v5624_v21, %v3726_v59  ;;  %v4644_v15 = vmul.f32 -1.442695, %v3734_v62  ;;  %v3741_v41 = vadd.f32 %v3660_v36, %v3221_v5 }
 0x632   : > { %v3662_v28 = vpop.f32.mrf.mxu0  ;;  %v7250_v43 = vld [vmem:[%s7323_s13] ss:$0 sm:$0xff] (%p1497_p0) }
 0x633   : > { %v3702_v54 = vpop.f32.mrf.mxu1  ;;  %v3728_v6 = vadd.f32 %v3727_v35, %v3214_v38  ;;  %5625 = vpow2.f32 %v4644_v15  ;;  %v4645_v14 = vmul.f32 -1.442695, %v3741_v41 }
 0x634   : > { %v3663_v31 = vpop.f32.mrf.mxu0 }
 0x635   : > { %v5170_v2 = vpop.f32.mrf.mxu1  ;;  %5627 = vtanh.f32 %v3728_v6 }
 0x636   : > { %5629 = vrcp.f32 %v3717_v29 }
 0x637   : > { %5631 = vpow2.f32 %v4645_v14 }
 0x640   : > { %v5626_v34 = vpop.eup %5625 }
 0x641   : > { %v3738_v32 = vadd.f32 1.0, %v5626_v34 }
 0x642   : > { %v5628_v11 = vpop.eup %5627 }
 0x643   : > { %v3730_v4 = vsub.f32 %v7097_v3, %v5628_v11  ;;  %5633 = vrcp.f32 %v3738_v32  ;;  %v5630_v8 = vpop.eup %5629 }
 0x644   : > { %v5632_v12 = vpop.eup %5631 }
 0x645   : > { %v3731_v9 = vmul.f32 %v5630_v8, %v3730_v4  ;;  %v3745_v3 = vadd.f32 1.0, %v5632_v12 }
 0x647   : > { %v3732_v55 = vadd.f32 %v5628_v11, %v3731_v9  }
 0x649   : > { %v3761_v52 = vpack.c.bf16 %v3732_v55, %v3732_v55   ;;  %v5642_v55 = vld [vmem:[%s7321_s11 + $0x30] sm:$0xff] (%p1497_p0)  }
 0x64a   :  { %5205 = vmatprep.subr.bf16.mxu1 (%p1497_p0), %v5642_v55 }
 0x64b   : > { %3765 = vst [vmem:[%s3764_s18] sm:$0xf] %v3761_v52  ;;  %5206 = vmatpush3.bf16.msra.mxu1 (%p1497_p0), %v5642_v55 }
 0x64c   :  { %5207 = vmatprep.subr.bf16.mxu1 (%p1497_p0), %v5644_v61 }
 0x64f   :  { %5208 = vmatpush3.bf16.msra.mxu1 (%p1497_p0), %v5644_v61 }
 0x650   : > { %v5634_v18 = vpop.eup %5633 }
 0x651   : > { %v3755_v30 = vmul.f32 %v5634_v18, %v3754_v16 }
 0x652   :  { %v5656_v26 = vld [vmem:[#allocation4] sm:$0xff] (%p1497_p0)   ;;  %v5658_v13 = vld [vmem:[#allocation4 + $0x8] sm:$0xff] (%p1497_p0)   ;;  %v5660_v39 = vld [vmem:[#allocation4 + $0x10] sm:$0xff] (%p1497_p0)  }
 0x653   : > { %v3756_v50 = vadd.f32 %v3755_v30, %v3222_v19  ;;  %5219 = vmatprep.mubr.bf16.mxu1 (%p1497_p0), %v5656_v26  ;;  %v5662_v44 = vld [vmem:[#allocation4 + $0x18] sm:$0xff] (%p1497_p0)   ;;  %v5664_v47 = vld [vmem:[#allocation4 + $0x20] sm:$0xff] (%p1497_p0)   ;;  %v5668_v59 = vld [vmem:[#allocation4 + $0x30] sm:$0xff] (%p1497_p0)  }
 0x654   :  { %v5670_v21 = vld [vmem:[#allocation4 + $0x38] sm:$0xff] (%p1497_p0)  }
 0x655   : > { %5635 = vtanh.f32 %v3756_v50 }
 0x656   : > { %5637 = vrcp.f32 %v3745_v3 }
 0x662   : > { %v5636_v57 = vpop.eup %5635 }
 0x663   : > { %v3758_v23 = vsub.f32 %v7154_v63, %v5636_v57  ;;  %v5638_v58 = vpop.eup %5637  ;;  %v5646_v63 = vld [vmem:[%s7321_s11 + $0x20] sm:$0xff] (%p1497_p0)  }
 0x664   :  { %5209 = vmatprep.subr.bf16.mxu1 (%p1497_p0), %v5646_v63 }
 0x665   : > { %v3759_v37 = vmul.f32 %v5638_v58, %v3758_v23  ;;  %5210 = vmatpush3.bf16.msra.mxu1 (%p1497_p0), %v5646_v63 }
 0x666   :  { %5211 = vmatprep.subr.bf16.mxu1 (%p1497_p0), %v5648_v56 }
 0x667   : > { %v3760_v54 = vadd.f32 %v5636_v57, %v3759_v37   ;;  %1499 = sbr.rel (!%p1497_p0) target bundleno = 565 (0x235), region = 99 }
 0x669   : > { %v3762_v51 = vpack.c.bf16 %v3760_v54, %v3760_v54   ;;  %5212 = vmatpush3.bf16.msra.mxu1 (%p1497_p0), %v5648_v56 }
 0x66a   :  { %5213 = vmatprep.subr.bf16.mxu1 (%p1497_p0), %v5650_v22 }
 0x66b   : > { %3768 = vst [vmem:[%s3767_s20] sm:$0xf] %v3762_v51  ;;  %v5666_v51 = vld [vmem:[#allocation4 + $0x28] sm:$0xff] (%p1497_p0)  }
 0x66d   :  { %5214 = vmatpush3.bf16.msra.mxu1 %v5650_v22 }
 0x66e   :  { %5215 = vmatprep.subr.bf16.mxu1 %v5652_v27 }
 0x671   :  { %5216 = vmatpush3.bf16.msra.mxu1 %v5652_v27 }
 0x672   :  { %v5655_v33 = vld [vmem:[#allocation5] sm:$0xff]   ;;  %5217 = vmatprep.subr.bf16.mxu1 %v5654_v17  ;;  %v5657_v53 = vld [vmem:[#allocation5 + $0x8] sm:$0xff]   ;;  %v5659_v7 = vld [vmem:[#allocation5 + $0x10] sm:$0xff]  }
 0x673   :  { %5187 = vmatprep.mubr.bf16.mxu0 %v5655_v33  ;;  %v5661_v42 = vld [vmem:[#allocation5 + $0x18] sm:$0xff]   ;;  %v5663_v45 = vld [vmem:[#allocation5 + $0x20] sm:$0xff]   ;;  %v5665_v48 = vld [vmem:[#allocation5 + $0x28] sm:$0xff]  }
 0x674   :  { %5188 = vmatmul.mubr.bf16.vlgmr.msra.gmra.mxu0 %v5657_v53  ;;  %v5667_v52 = vld [vmem:[#allocation5 + $0x30] sm:$0xff]   ;;  %v5669_v62 = vld [vmem:[#allocation5 + $0x38] sm:$0xff]  }
 0x675   :  { %5218 = vmatpush3.bf16.msra.mxu1 %v5654_v17  ;;  %5191 = vmatprep.mubr.bf16.mxu0 %v5659_v7 }
 0x678   :  { %5220 = vmatmul.mubr.bf16.vlgmr.msra.gmra.mxu1 %v5658_v13 }
 0x679   :  { %5223 = vmatprep.mubr.bf16.mxu1 %v5660_v39 }
 0x67c   :  { %5192 = vmatmul.mubr.bf16.gmra.mxu0 %v5661_v42 }
 0x67d   :  { %5195 = vmatprep.mubr.bf16.mxu0 %v5663_v45 }
 0x680   :  { %5224 = vmatmul.mubr.bf16.gmra.mxu1 %v5662_v44 }
 0x681   :  { %5227 = vmatprep.mubr.bf16.mxu1 %v5664_v47 }
 0x684   :  { %5196 = vmatmul.mubr.bf16.gmra.mxu0 %v5665_v48 }
 0x685   :  { %5199 = vmatprep.mubr.bf16.mxu0 %v5667_v52 }
 0x688   :  { %5228 = vmatmul.mubr.bf16.gmra.mxu1 %v5666_v51 }
 0x689   :  { %5231 = vmatprep.mubr.bf16.mxu1 %v5668_v59 }
 0x68c   :  { %5200 = vmatmul.mubr.bf16.gmra.mxu0 %v5669_v62 }
 0x690   :  { %5232 = vmatmul.mubr.bf16.gmra.mxu1 %v5670_v21 }
 0x734   :  { %v5189_v38 = vpop.f32.mrf.mxu0 }
 0x736   :  { %v3963_v15 = vpop.f32.mrf.mxu0 }
 0x738   :  { %v5221_v36 = vpop.f32.mrf.mxu1  ;;  %v5190_v29 = vpop.f32.mrf.mxu0 }
 0x739   :  { %v4165_v35 = vadd.f32 %v5221_v36, %v5189_v38 }
 0x73a   :  { %v4156_v28 = vpop.f32.mrf.mxu1  ;;  %v3966_v41 = vpop.f32.mrf.mxu0 }
 0x73b   :  { %v4228_v54 = vadd.f32 %v7250_v43, %v4165_v35  ;;  %v4157_v6 = vadd.f32 %v4156_v28, %v3963_v15 }
 0x73c   :  { %v5222_v31 = vpop.f32.mrf.mxu1  ;;  %v5193_v11 = vpop.f32.mrf.mxu0 }
 0x73d   :  { %4244 = vst [vmem:[%s7324_s14 + $0x10] sm:$0xff] %v4228_v54  ;;  %v4226_v2 = vadd.f32 %v7250_v43, %v4157_v6  ;;  %v4168_v5 = vadd.f32 %v5222_v31, %v5190_v29 }
 0x73e   :  { %v4159_v14 = vpop.f32.mrf.mxu1  ;;  %v3979_v25 = vpop.f32.mrf.mxu0 }
 0x73f   :  { %4242 = vst [vmem:[%s7324_s14] sm:$0xff] %v4226_v2  ;;  %v4229_v34 = vadd.f32 %v7250_v43, %v4168_v5  ;;  %v4160_v32 = vadd.f32 %v4159_v14, %v3966_v41 }
 0x740   :  { %v5225_v4 = vpop.f32.mrf.mxu1  ;;  %v5194_v19 = vpop.f32.mrf.mxu0 }
 0x741   :  { %4245 = vst [vmem:[%s7324_s14 + $0x18] sm:$0xff] %v4229_v34  ;;  %v4227_v8 = vadd.f32 %v7250_v43, %v4160_v32  ;;  %v4181_v9 = vadd.f32 %v5225_v4, %v5193_v11 }
 0x742   :  { %v4172_v12 = vpop.f32.mrf.mxu1  ;;  %v3982_v57 = vpop.f32.mrf.mxu0 }
 0x743   :  { %4243 = vst [vmem:[%s7324_s14 + $0x8] sm:$0xff] %v4227_v8  ;;  %v4232_v16 = vadd.f32 %v7250_v43, %v4181_v9  ;;  %v4173_v18 = vadd.f32 %v4172_v12, %v3979_v25 }
 0x744   :  { %v5226_v30 = vpop.f32.mrf.mxu1  ;;  %v5197_v40 = vpop.f32.mrf.mxu0 }
 0x745   :  { %4248 = vst [vmem:[%s7324_s14 + $0x30] sm:$0xff] %v4232_v16  ;;  %v4230_v50 = vadd.f32 %v7250_v43, %v4173_v18  ;;  %v4184_v3 = vadd.f32 %v5226_v30, %v5194_v19 }
 0x746   :  { %v4175_v23 = vpop.f32.mrf.mxu1  ;;  %v3995_v60 = vpop.f32.mrf.mxu0 }
 0x747   :  { %4246 = vst [vmem:[%s7324_s14 + $0x20] sm:$0xff] %v4230_v50  ;;  %v4233_v58 = vadd.f32 %v7250_v43, %v4184_v3  ;;  %v4176_v37 = vadd.f32 %v4175_v23, %v3982_v57 }
 0x748   :  { %v5229_v46 = vpop.f32.mrf.mxu1  ;;  %v5198_v0 = vpop.f32.mrf.mxu0 }
 0x749   :  { %4249 = vst [vmem:[%s7324_s14 + $0x38] sm:$0xff] %v4233_v58  ;;  %v4231_v49 = vadd.f32 %v7250_v43, %v4176_v37  ;;  %v4197_v55 = vadd.f32 %v5229_v46, %v5197_v40 }
 0x74a   :  { %v4188_v61 = vpop.f32.mrf.mxu1  ;;  %v3998_v33 = vpop.f32.mrf.mxu0 }
 0x74b   :  { %4247 = vst [vmem:[%s7324_s14 + $0x28] sm:$0xff] %v4231_v49  ;;  %v4236_v20 = vadd.f32 %v7250_v43, %v4197_v55  ;;  %v4189_v63 = vadd.f32 %v4188_v61, %v3995_v60 }
 0x74c   :  { %v5230_v56 = vpop.f32.mrf.mxu1  ;;  %v5201_v10 = vpop.f32.mrf.mxu0 }
 0x74d   :  { %4252 = vst [vmem:[%s7324_s14 + $0x50] sm:$0xff] %v4236_v20  ;;  %v4234_v1 = vadd.f32 %v7250_v43, %v4189_v63  ;;  %v4200_v22 = vadd.f32 %v5230_v56, %v5198_v0 }
 0x74e   :  { %v4191_v26 = vpop.f32.mrf.mxu1  ;;  %v4011_v7 = vpop.f32.mrf.mxu0 }
 0x74f   :  { %4250 = vst [vmem:[%s7324_s14 + $0x40] sm:$0xff] %v4234_v1  ;;  %v4237_v24 = vadd.f32 %v7250_v43, %v4200_v22  ;;  %v4192_v27 = vadd.f32 %v4191_v26, %v3998_v33 }
 0x750   :  { %v5233_v17 = vpop.f32.mrf.mxu1  ;;  %v5202_v45 = vpop.f32.mrf.mxu0 }
 0x751   :  { %4253 = vst [vmem:[%s7324_s14 + $0x58] sm:$0xff] %v4237_v24  ;;  %v4235_v53 = vadd.f32 %v7250_v43, %v4192_v27  ;;  %v4213_v13 = vadd.f32 %v5233_v17, %v5201_v10 }
 0x752   :  { %v4204_v39 = vpop.f32.mrf.mxu1  ;;  %v4014_v52 = vpop.f32.mrf.mxu0 }
 0x753   :  { %4251 = vst [vmem:[%s7324_s14 + $0x48] sm:$0xff] %v4235_v53  ;;  %v4240_v42 = vadd.f32 %v7250_v43, %v4213_v13  ;;  %v4205_v44 = vadd.f32 %v4204_v39, %v4011_v7 }
 0x754   :  { %v5234_v47 = vpop.f32.mrf.mxu1 }
 0x755   :  { %4256 = vst [vmem:[%s7324_s14 + $0x70] sm:$0xff] %v4240_v42  ;;  %v4238_v48 = vadd.f32 %v7250_v43, %v4205_v44  ;;  %v4216_v51 = vadd.f32 %v5234_v47, %v5202_v45 }
 0x756   :  { %v4207_v59 = vpop.f32.mrf.mxu1 }
 0x757   :  { %4254 = vst [vmem:[%s7324_s14 + $0x60] sm:$0xff] %v4238_v48  ;;  %v4241_v62 = vadd.f32 %v7250_v43, %v4216_v51  ;;  %v4208_v21 = vadd.f32 %v4207_v59, %v4014_v52 }
 0x759   :  { %4257 = vst [vmem:[%s7324_s14 + $0x78] sm:$0xff] %v4241_v62  ;;  %v4239_v38 = vadd.f32 %v7250_v43, %v4208_v21 }
 0x75b   :  { %4255 = vst [vmem:[%s7324_s14 + $0x68] sm:$0xff] %v4239_v38 }

</bundles_post_ra>
